<compile_context>
chip_gen: v5e
topology: v5e:2x2
jax: 0.10.0
libtpu: 0.0.40
codegen_flags: <defaults>
</compile_context>

<pallas_src>
import jax
import jax.numpy as jnp
from jax.experimental import pallas as pl
from jax.experimental.pallas import tpu as pltpu


def _swish(v):
    return v * jax.nn.sigmoid(v)


# --------------------------------------------------------------------------
# Host-side weight preparation: BN folding, LSTM gate packing, head fusion,
# and packing into two dense slabs (bf16 matmul operands, f32 biases).
# --------------------------------------------------------------------------
def _pack_slab(blocks, dtype, row_align):
    offs, parts, cur = {}, [], 0
    for name, arr in blocks:
        arr = jnp.asarray(arr, jnp.float32)
        if arr.ndim == 1:
            arr = arr[None, :]
        r, c = arr.shape
        assert c <= 128
        rp = ((r + row_align - 1) // row_align) * row_align
        parts.append(jnp.pad(arr, ((0, rp - r), (0, 128 - c))))
        offs[name] = cur
        cur += rp
    return jnp.concatenate(parts, axis=0).astype(dtype), offs


def prepare_weights(params, eps=1e-5):
    f32 = jnp.float32

    def fold_conv(p):
        W = jnp.asarray(p["w"], f32)                       # (Cout, Cin, k)
        scale = p["gamma"] / jnp.sqrt(p["var"] + eps)
        bias = scale * p["b"] + p["beta"] - p["mean"] * scale
        cout, cin, k = W.shape
        Wt = jnp.transpose(W * scale[:, None, None], (2, 1, 0)).reshape(k * cin, cout)
        return Wt, bias, (cout, cin, k)

    w1t, b1, (C1, _, K1) = fold_conv(params["sig_conv1"])
    w2t, b2, (C2, _, K2) = fold_conv(params["sig_conv2"])
    w3t, b3, (H, _, K3) = fold_conv(params["sig_conv3"])
    wmt, bm, (_, _, KM) = fold_conv(params["merge_conv1"])

    assert K1 + 2 <= 8, "conv1 taps + phase shift must fit the 8-lane widened input"
    assert 4 * H <= 128, "weight-slab packing assumes 4*hidden <= 128 lanes"
    # TODO(synk): for hidden sizes > 32 split W_ih / W_hh over several 128-lane blocks.

    # conv1 handles all 3 stride-phases in one matmul: lane d of the widened input
    # holds x[3u + d]; column group r of `wsel` produces the phase-r output.
    wsel = jnp.zeros((8, 3 * C1), f32)
    for r in range(3):
        wsel = wsel.at[r:r + K1, r * C1:(r + 1) * C1].set(w1t)
    b1t = jnp.tile(b1, 3)

    def lstm_mats(p):
        return jnp.asarray(p["w_ih"], f32).T, (p["b_ih"] + p["b_hh"]).astype(f32)

    wih1, bl1 = lstm_mats(params["lstm1"])                 # (H, 4H) gates i|f|g|o
    whh1 = jnp.asarray(params["lstm1"]["w_hh"], f32).T
    wih2_full, bl2_full = lstm_mats(params["lstm2"])
    # lstm2: only its FIRST processed step (zero initial state) is consumed by the
    # reference forward, so W_hh2 never contributes and the forget gate is dead.
    keep = jnp.concatenate([jnp.arange(0, H), jnp.arange(2 * H, 4 * H)])   # i|g|o
    wih2 = wih2_full[:, keep]
    bl2 = bl2_full[keep]

    w4, b4 = params["latent_fc4"]["w"], params["latent_fc4"]["b"]
    w5, b5 = params["latent_fc5"]["w"], params["latent_fc5"]["b"]
    LAT = w4.shape[0]
    assert 2 * LAT <= 128
    wlat = jnp.concatenate([w4.T, w5.T], axis=1)           # (H, 2*latent)
    blat = jnp.concatenate([b4, b5])

    wf4, bf4 = params["fc4"]["w"], params["fc4"]["b"]      # (2, latent)
    wf5, bf5 = params["fc5"]["w"], params["fc5"]["b"]      # (3, latent)
    n_out = wf4.shape[0] + wf5.shape[0]
    assert n_out <= 8
    whead = jnp.zeros((2 * LAT, 8), f32)                   # 8-lane padded head
    whead = whead.at[:LAT, :wf4.shape[0]].set(wf4.T)
    whead = whead.at[LAT:, wf4.shape[0]:n_out].set(wf5.T)
    bhead = jnp.zeros((8,), f32).at[:n_out].set(jnp.concatenate([bf4, bf5]))

    wslab, woffs = _pack_slab(
        [("wsel", wsel), ("w2", w2t), ("w3", w3t), ("wm", wmt),
         ("wih1", wih1), ("whh1", whh1), ("wih2", wih2),
         ("wlat", wlat), ("whead", whead)],
        jnp.bfloat16, row_align=16)
    fslab, foffs = _pack_slab(
        [("b1", b1t), ("b2", b2), ("b3", b3), ("bm", bm),
         ("bl1", bl1), ("bl2", bl2), ("blat", blat), ("bhead", bhead)],
        jnp.float32, row_align=1)

    meta = dict(H=H, LAT=LAT, C1=C1, C2=C2, K1=K1, K2=K2, K3=K3, KM=KM,
                n_out=n_out, woffs=woffs, foffs=foffs)
    return wslab, fslab, meta


# --------------------------------------------------------------------------
# Fused, batch-tiled forward.
# --------------------------------------------------------------------------
def network_forward(weights, sigs, seqs=None, *, b_tile=8):
    """sigs: (B, 1, L) as in PyTorch.  seqs accepted for signature parity; its branch
    is dead code in the reference forward and is not computed."""
    del seqs
    wslab, fslab, meta = weights
    H, LAT = meta["H"], meta["LAT"]
    C1, C2 = meta["C1"], meta["C2"]
    K1, K2, K3, KM = meta["K1"], meta["K2"], meta["K3"], meta["KM"]
    n_out = meta["n_out"]
    wo, fo = meta["woffs"], meta["foffs"]

    assert b_tile % 8 == 0, "batch tile must be a multiple of the 8-row sublane tile"
    B, _, L0 = sigs.shape
    L1 = L0 - (K1 - 1)
    L2 = L1 - (K2 - 1)
    assert L2 >= K3, "signal too short for the conv stack"
    L3 = (L2 - K3) // 3 + 1            # stride-3 conv, PyTorch floor semantics
    T = L3 - (KM - 1)                  # LSTM sequence length
    assert T >= 1, "signal too short for the conv stack"

    # Per-sample, per-phase padded lengths of the phase-major decomposition.  All
    # downstream reads are static contiguous row slices; garbage stays in the padded
    # tails and is never read by valid outputs (works for arbitrary L0, no L2%3 req).
    U3 = L3
    U2 = U3 + (K3 - 1) // 3
    U0 = U2 + (K2 + 1) // 3

    Bt = b_tile
    G = pl.cdiv(B, Bt)
    Bpad = G * Bt
    MX = U0 * Bt
    NOUTP = 8

    # Host-side layout plumbing (cheap): widen the raw signal so lane d of row (u, b)
    # holds x[b, 3u + d].  This is what removes the O(L^2) permutation matrix and all
    # strided in-kernel access for the stride-3 conv.
    x = sigs[:, 0, :].astype(jnp.float32)
    Lpad = 3 * U0 + 8
    x = jnp.pad(x, ((0, Bpad - B), (0, Lpad - L0)))
    d_idx = 3 * jnp.arange(U0)[:, None] + jnp.arange(8)[None, :]
    xw = x[:, d_idx]                                        # (Bpad, U0, 8)
    xw = xw.reshape(G, Bt, U0, 8).transpose(0, 2, 1, 3).reshape(G, MX, 8)

    def kernel(x_ref, w_ref, f_ref, o_ref):
        f32, bf16 = jnp.float32, jnp.bfloat16

        def wblk(name, r0, nrows, ncols):                   # bf16 matmul operand
            base = wo[name] + r0
            return w_ref[base:base + nrows, 0:ncols]

        def frow(name, ncols):                              # f32 bias row
            return f_ref[fo[name]:fo[name] + 1, 0:ncols]

        xt = x_ref[0].astype(bf16)                          # (U0*Bt, 8)

        # conv1 + BN + swish: all three stride-phases in a single matmul.
        o1 = _swish(jnp.dot(xt, wblk("wsel", 0, 8, 3 * C1),
                            preferred_element_type=f32) + frow("b1", 3 * C1))

        # conv2 + BN + swish, per output phase; back-to-back tap-accumulation matmuls.
        o2 = []
        for r in range(3):
            acc = jnp.zeros((U2 * Bt, C2), f32)
            for j in range(K2):
                a, rp = divmod(r + j, 3)
                src = o1[a * Bt:(a + U2) * Bt, rp * C1:(rp + 1) * C1]
                acc = acc + jnp.dot(src.astype(bf16), wblk("w2", j * C1, C1, C2),
                                    preferred_element_type=f32)
            o2.append(_swish(acc + frow("b2", C2)))

        # conv3 (stride 3) + BN + swish: phase-major reads, contiguous slices only.
        acc = jnp.zeros((U3 * Bt, H), f32)
        for j in range(K3):
            a, rp = divmod(j, 3)
            src = o2[rp][a * Bt:(a + U3) * Bt, :]
            acc = acc + jnp.dot(src.astype(bf16), wblk("w3", j * C2, C2, H),
                                preferred_element_type=f32)
        a3 = _swish(acc + frow("b3", H))                     # (U3*Bt, H)

        # merge conv + BN + swish -> LSTM inputs, rows ordered (time, batch).
        acc = jnp.zeros((T * Bt, H), f32)
        for j in range(KM):
            src = a3[j * Bt:(j + T) * Bt, :]
            acc = acc + jnp.dot(src.astype(bf16), wblk("wm", j * H, H, H),
                                preferred_element_type=f32)
        a4 = _swish(acc + frow("bm", H))                     # (T*Bt, H)

        # LSTM1 (PyTorch gate order i|f|g|o): input projection hoisted; short static
        # time loop fully unrolled so only h @ W_hh is on the serial path.
        gx = jnp.dot(a4.astype(bf16), wblk("wih1", 0, H, 4 * H),
                     preferred_element_type=f32) + frow("bl1", 4 * H)
        whh1 = wblk("whh1", 0, H, 4 * H)
        h = jnp.zeros((Bt, H), f32)
        c = jnp.zeros((Bt, H), f32)
        for t in range(T):
            g = gx[t * Bt:(t + 1) * Bt, :] + jnp.dot(
                h.astype(bf16), whh1, preferred_element_type=f32)
            i_g = jax.nn.sigmoid(g[:, 0:H])
            f_g = jax.nn.sigmoid(g[:, H:2 * H])
            g_g = jnp.tanh(g[:, 2 * H:3 * H])
            o_g = jax.nn.sigmoid(g[:, 3 * H:4 * H])
            c = f_g * c + i_g * g_g
            h = o_g * jnp.tanh(c)
        x2 = _swish(h)                                       # swish(lstm1 h_{T-1})

        # LSTM2: flip(swish(lstm2(flip(z))[0]))[-1] == swish of lstm2's FIRST step
        # with zero state -> one cell evaluation on z[T-1]; forget gate is dead.
        g2 = jnp.dot(x2.astype(bf16), wblk("wih2", 0, H, 3 * H),
                     preferred_element_type=f32) + frow("bl2", 3 * H)
        i2 = jax.nn.sigmoid(g2[:, 0:H])
        gg2 = jnp.tanh(g2[:, H:2 * H])
        og2 = jax.nn.sigmoid(g2[:, 2 * H:3 * H])
        feat = _swish(og2 * jnp.tanh(i2 * gg2))              # (Bt, H)

        # heads: latent_fc4|latent_fc5 fused; fc4|fc5 fused block-diagonally (8-pad).
        lat = jnp.tanh(jnp.dot(feat.astype(bf16), wblk("wlat", 0, H, 2 * LAT),
                               preferred_element_type=f32) + frow("blat", 2 * LAT))
        out = jnp.dot(lat.astype(bf16), wblk("whead", 0, 2 * LAT, NOUTP),
                      preferred_element_type=f32) + frow("bhead", NOUTP)
        o_ref[0] = out.astype(o_ref.dtype)                   # (Bt, 8)

    out = pl.pallas_call(
        kernel,
        out_shape=jax.ShapeDtypeStruct((G, Bt, NOUTP), jnp.float32),
        grid=(G,),
        in_specs=[
            pl.BlockSpec((1, MX, 8), lambda g: (g, 0, 0)),
            pl.BlockSpec(wslab.shape, lambda g: (0, 0)),
            pl.BlockSpec(fslab.shape, lambda g: (0, 0)),
        ],
        out_specs=pl.BlockSpec((1, Bt, NOUTP), lambda g: (g, 0, 0)),
        compiler_params=pltpu.CompilerParams(
            dimension_semantics=("parallel",),     # batch tiles -> both TCs on v7x
            vmem_limit_bytes=32 * 1024 * 1024,
        ),
    )(xw, wslab, fslab)
    return out.reshape(Bpad, NOUTP)[:B, :n_out]


# --------------------------------------------------------------------------
# Pure-JAX reference of the PyTorch forward (eval-mode BN) for validation.
# --------------------------------------------------------------------------
def _conv_bn_swish_ref(x, p, stride=1, eps=1e-5):
    out = jax.lax.conv_general_dilated(
        x, p["w"], window_strides=(stride,), padding="VALID",
        dimension_numbers=("NCH", "OIH", "NCH"),
        precision=jax.lax.Precision.HIGHEST)
    out = out + p["b"][None, :, None]
    scale = p["gamma"] / jnp.sqrt(p["var"] + eps)
    out = scale[None, :, None] * (out - p["mean"][None, :, None]) + p["beta"][None, :, None]
    return _swish(out)


def _lstm_ref(x_seq, p):
    H = x_seq.shape[-1]
    w_ih, w_hh = p["w_ih"], p["w_hh"]
    b = p["b_ih"] + p["b_hh"]

    def step(carry, xt):
        h, c = carry
        g = xt @ w_ih.T + h @ w_hh.T + b
        i = jax.nn.sigmoid(g[:, 0:H])
        f = jax.nn.sigmoid(g[:, H:2 * H])
        gg = jnp.tanh(g[:, 2 * H:3 * H])
        o = jax.nn.sigmoid(g[:, 3 * H:4 * H])
        c = f * c + i * gg
        h = o * jnp.tanh(c)
        return (h, c), h

    Bn = x_seq.shape[1]
    init = (jnp.zeros((Bn, H), jnp.float32), jnp.zeros((Bn, H), jnp.float32))
    _, hs = jax.lax.scan(step, init, x_seq)
    return hs


def reference_forward(params, sigs, seqs):
    x = _conv_bn_swish_ref(sigs, params["sig_conv1"])
    x = _conv_bn_swish_ref(x, params["sig_conv2"])
    x = _conv_bn_swish_ref(x, params["sig_conv3"], stride=3)
    # seqs branch: computed in the PyTorch forward but its result is never used.
    z = _conv_bn_swish_ref(x, params["merge_conv1"])
    z = jnp.transpose(z, (2, 0, 1))                          # (T, B, H)
    z = _swish(_lstm_ref(z, params["lstm1"]))
    z = _swish(_lstm_ref(z[::-1], params["lstm2"]))[::-1]
    z = z[-1]                                                # (B, H)
    l4 = jnp.tanh(z @ params["latent_fc4"]["w"].T + params["latent_fc4"]["b"])
    l5 = jnp.tanh(z @ params["latent_fc5"]["w"].T + params["latent_fc5"]["b"])
    z4 = l4 @ params["fc4"]["w"].T + params["fc4"]["b"]
    z5 = l5 @ params["fc5"]["w"].T + params["fc5"]["b"]
    return jnp.concatenate([z4, z5], axis=1)


# --------------------------------------------------------------------------
# Deterministic synthetic parameters.
# --------------------------------------------------------------------------
def _conv_params(key, cout, cin, k):
    k1, k2, k3, k4, k5, k6 = jax.random.split(key, 6)
    return {
        "w": 0.1 * jax.random.normal(k1, (cout, cin, k), jnp.float32),
        "b": 0.1 * jax.random.normal(k2, (cout,), jnp.float32),
        "gamma": 1.0 + 0.1 * jax.random.normal(k3, (cout,), jnp.float32),
        "beta": 0.1 * jax.random.normal(k4, (cout,), jnp.float32),
        "mean": 0.1 * jax.random.normal(k5, (cout,), jnp.float32),
        "var": 1.0 + 0.1 * jnp.abs(jax.random.normal(k6, (cout,), jnp.float32)),
    }


def _lstm_params(key, h):
    k1, k2, k3, k4 = jax.random.split(key, 4)
    return {
        "w_ih": 0.1 * jax.random.normal(k1, (4 * h, h), jnp.float32),
        "w_hh": 0.1 * jax.random.normal(k2, (4 * h, h), jnp.float32),
        "b_ih": 0.1 * jax.random.normal(k3, (4 * h,), jnp.float32),
        "b_hh": 0.1 * jax.random.normal(k4, (4 * h,), jnp.float32),
    }


def _linear_params(key, nout, nin):
    k1, k2 = jax.random.split(key)
    return {
        "w": 0.1 * jax.random.normal(k1, (nout, nin), jnp.float32),
        "b": 0.1 * jax.random.normal(k2, (nout,), jnp.float32),
    }


def make_params(key, size, kmer_len, latent_size=32):
    keys = jax.random.split(key, 12)
    return {
        "sig_conv1": _conv_params(keys[0], 4, 1, 5),
        "sig_conv2": _conv_params(keys[1], 16, 4, 5),
        "sig_conv3": _conv_params(keys[2], size, 16, 9),
        # seq branch exists in the module but its output is unused by forward().
        "seq_conv1": _conv_params(keys[3], 16, kmer_len * 4, 5),
        "seq_conv2": _conv_params(keys[4], size, 16, 13),
        "merge_conv1": _conv_params(keys[5], size, size, 5),
        "lstm1": _lstm_params(keys[6], size),
        "lstm2": _lstm_params(keys[7], size),
        "latent_fc4": _linear_params(keys[8], latent_size, size),
        "latent_fc5": _linear_params(keys[9], latent_size, size),
        "fc4": _linear_params(keys[10], 2, latent_size),
        "fc5": _linear_params(keys[11], 3, latent_size),
    }


# --------------------------------------------------------------------------
if __name__ == "__main__":
    B = 12             # not a multiple of the batch tile -> exercises padding path
    SIZE = 32          # DEFAULT_NN_SIZE stand-in (hidden / channel size)
    KMER_LEN = 4       # DEFAULT_KMER_LEN stand-in
    L_SIG = 50         # conv chain lengths: 46 -> 42 -> 12 -> 8 (LSTM T = 8)
    L_SEQ = 26

    key = jax.random.PRNGKey(0)
    k_param, k_sig, k_seq = jax.random.split(key, 3)
    params = make_params(k_param, SIZE, KMER_LEN)
    weights = prepare_weights(params)

    sigs = jax.random.normal(k_sig, (B, 1, L_SIG), jnp.float32)
    seqs = jax.random.normal(k_seq, (B, KMER_LEN * 4, L_SEQ), jnp.float32)

    fwd = jax.jit(lambda s: network_forward(weights, s, None, b_tile=8))
    out = jax.block_until_ready(fwd(sigs))
    assert out.shape == (B, 5), out.shape

    with jax.default_matmul_precision("highest"):
        ref = jax.block_until_ready(reference_forward(params, sigs, seqs))
    # bf16 MXU operands vs. f32 'highest' reference -> loosened, intentional tolerance.
    assert jnp.allclose(out, ref, atol=5e-2, rtol=5e-2), (
        float(jnp.max(jnp.abs(out - ref))), out, ref)

    print("KERNEL_OK")
</pallas_src>

<mosaic_0001>
module attributes {stable_mosaic.version = 11 : i64} {
  func.func @kernel(%arg0: i32, %arg1: memref<1x128x8xf32, #tpu.memory_space<vmem>>, %arg2: memref<544x128xbf16, #tpu.memory_space<vmem>>, %arg3: memref<8x128xf32, #tpu.memory_space<vmem>>, %arg4: memref<1x8x8xf32, #tpu.memory_space<vmem>>) attributes {dimension_semantics = [#tpu.dimension_semantics<parallel>], iteration_bounds = array<i64: 2>, scalar_prefetch = 0 : i64, scratch_operands = 0 : i64, tpu.core_type = #tpu.core_type<tc>, window_params = [{transform_indices = @transform_0, window_bounds = array<i64: 1, 128, 8>}, {pipeline_mode = #tpu.pipeline_mode<synchronous>, transform_indices = @transform_1, window_bounds = array<i64: 544, 128>}, {pipeline_mode = #tpu.pipeline_mode<synchronous>, transform_indices = @transform_2, window_bounds = array<i64: 8, 128>}, {transform_indices = @transform_3, window_bounds = array<i64: 1, 8, 8>}]} {
    %c0 = arith.constant 0 : index
    %c0_0 = arith.constant 0 : index
    %c0_1 = arith.constant 0 : index
    %0 = vector.load %arg1[%c0, %c0_0, %c0_1] : memref<1x128x8xf32, #tpu.memory_space<vmem>>, vector<1x128x8xf32>
    %1 = vector.shape_cast %0 : vector<1x128x8xf32> to vector<128x8xf32>
    %2 = arith.truncf %1 : vector<128x8xf32> to vector<128x8xbf16>
    %c0_2 = arith.constant 0 : index
    %c0_3 = arith.constant 0 : index
    %3 = vector.load %arg2[%c0_2, %c0_3] : memref<544x128xbf16, #tpu.memory_space<vmem>>, vector<8x12xbf16>
    %cst = arith.constant dense<0.000000e+00> : vector<128x12xf32>
    %4 = tpu.matmul %2, %3, %cst {dimension_numbers = #tpu.dot_dimension_numbers<[1], [0], [0], [1], [0, 0, 1, 1], [], []>} : vector<128x8xbf16>, vector<8x12xbf16>, vector<128x12xf32> -> vector<128x12xf32>
    %c0_4 = arith.constant 0 : index
    %c0_5 = arith.constant 0 : index
    %5 = vector.load %arg3[%c0_4, %c0_5] : memref<8x128xf32, #tpu.memory_space<vmem>>, vector<1x12xf32>
    %6 = vector.broadcast %5 : vector<1x12xf32> to vector<128x12xf32>
    %7 = arith.addf %4, %6 : vector<128x12xf32>
    %8 = arith.negf %7 : vector<128x12xf32>
    %9 = math.exp %8 : vector<128x12xf32>
    %cst_6 = arith.constant 1.000000e+00 : f32
    %10 = vector.broadcast %cst_6 : f32 to vector<128x12xf32>
    %11 = arith.addf %10, %9 : vector<128x12xf32>
    %12 = arith.divf %10, %11 : vector<128x12xf32>
    %13 = arith.mulf %7, %12 : vector<128x12xf32>
    %cst_7 = arith.constant 0.000000e+00 : f32
    %14 = vector.broadcast %cst_7 : f32 to vector<112x16xf32>
    %15 = vector.extract_strided_slice %13 {offsets = [0, 0], sizes = [112, 4], strides = [1, 1]} : vector<128x12xf32> to vector<112x4xf32>
    %16 = arith.truncf %15 : vector<112x4xf32> to vector<112x4xbf16>
    %c16 = arith.constant 16 : index
    %c0_8 = arith.constant 0 : index
    %17 = vector.load %arg2[%c16, %c0_8] : memref<544x128xbf16, #tpu.memory_space<vmem>>, vector<4x16xbf16>
    %cst_9 = arith.constant dense<0.000000e+00> : vector<112x16xf32>
    %18 = tpu.matmul %16, %17, %cst_9 {dimension_numbers = #tpu.dot_dimension_numbers<[1], [0], [0], [1], [0, 0, 1, 1], [], []>} : vector<112x4xbf16>, vector<4x16xbf16>, vector<112x16xf32> -> vector<112x16xf32>
    %19 = arith.addf %14, %18 : vector<112x16xf32>
    %20 = vector.extract_strided_slice %13 {offsets = [0, 4], sizes = [112, 4], strides = [1, 1]} : vector<128x12xf32> to vector<112x4xf32>
    %21 = arith.truncf %20 : vector<112x4xf32> to vector<112x4xbf16>
    %c20 = arith.constant 20 : index
    %c0_10 = arith.constant 0 : index
    %22 = vector.load %arg2[%c20, %c0_10] : memref<544x128xbf16, #tpu.memory_space<vmem>>, vector<4x16xbf16>
    %cst_11 = arith.constant dense<0.000000e+00> : vector<112x16xf32>
    %23 = tpu.matmul %21, %22, %cst_11 {dimension_numbers = #tpu.dot_dimension_numbers<[1], [0], [0], [1], [0, 0, 1, 1], [], []>} : vector<112x4xbf16>, vector<4x16xbf16>, vector<112x16xf32> -> vector<112x16xf32>
    %24 = arith.addf %19, %23 : vector<112x16xf32>
    %25 = vector.extract_strided_slice %13 {offsets = [0, 8], sizes = [112, 4], strides = [1, 1]} : vector<128x12xf32> to vector<112x4xf32>
    %26 = arith.truncf %25 : vector<112x4xf32> to vector<112x4xbf16>
    %c24 = arith.constant 24 : index
    %c0_12 = arith.constant 0 : index
    %27 = vector.load %arg2[%c24, %c0_12] : memref<544x128xbf16, #tpu.memory_space<vmem>>, vector<4x16xbf16>
    %cst_13 = arith.constant dense<0.000000e+00> : vector<112x16xf32>
    %28 = tpu.matmul %26, %27, %cst_13 {dimension_numbers = #tpu.dot_dimension_numbers<[1], [0], [0], [1], [0, 0, 1, 1], [], []>} : vector<112x4xbf16>, vector<4x16xbf16>, vector<112x16xf32> -> vector<112x16xf32>
    %29 = arith.addf %24, %28 : vector<112x16xf32>
    %30 = vector.extract_strided_slice %13 {offsets = [8, 0], sizes = [112, 4], strides = [1, 1]} : vector<128x12xf32> to vector<112x4xf32>
    %31 = arith.truncf %30 : vector<112x4xf32> to vector<112x4xbf16>
    %c28 = arith.constant 28 : index
    %c0_14 = arith.constant 0 : index
    %32 = vector.load %arg2[%c28, %c0_14] : memref<544x128xbf16, #tpu.memory_space<vmem>>, vector<4x16xbf16>
    %cst_15 = arith.constant dense<0.000000e+00> : vector<112x16xf32>
    %33 = tpu.matmul %31, %32, %cst_15 {dimension_numbers = #tpu.dot_dimension_numbers<[1], [0], [0], [1], [0, 0, 1, 1], [], []>} : vector<112x4xbf16>, vector<4x16xbf16>, vector<112x16xf32> -> vector<112x16xf32>
    %34 = arith.addf %29, %33 : vector<112x16xf32>
    %35 = vector.extract_strided_slice %13 {offsets = [8, 4], sizes = [112, 4], strides = [1, 1]} : vector<128x12xf32> to vector<112x4xf32>
    %36 = arith.truncf %35 : vector<112x4xf32> to vector<112x4xbf16>
    %c32 = arith.constant 32 : index
    %c0_16 = arith.constant 0 : index
    %37 = vector.load %arg2[%c32, %c0_16] : memref<544x128xbf16, #tpu.memory_space<vmem>>, vector<4x16xbf16>
    %cst_17 = arith.constant dense<0.000000e+00> : vector<112x16xf32>
    %38 = tpu.matmul %36, %37, %cst_17 {dimension_numbers = #tpu.dot_dimension_numbers<[1], [0], [0], [1], [0, 0, 1, 1], [], []>} : vector<112x4xbf16>, vector<4x16xbf16>, vector<112x16xf32> -> vector<112x16xf32>
    %39 = arith.addf %34, %38 : vector<112x16xf32>
    %c1 = arith.constant 1 : index
    %c0_18 = arith.constant 0 : index
    %40 = vector.load %arg3[%c1, %c0_18] : memref<8x128xf32, #tpu.memory_space<vmem>>, vector<1x16xf32>
    %41 = vector.broadcast %40 : vector<1x16xf32> to vector<112x16xf32>
    %42 = arith.addf %39, %41 : vector<112x16xf32>
    %43 = arith.negf %42 : vector<112x16xf32>
    %44 = math.exp %43 : vector<112x16xf32>
    %cst_19 = arith.constant 1.000000e+00 : f32
    %45 = vector.broadcast %cst_19 : f32 to vector<112x16xf32>
    %46 = arith.addf %45, %44 : vector<112x16xf32>
    %47 = arith.divf %45, %46 : vector<112x16xf32>
    %48 = arith.mulf %42, %47 : vector<112x16xf32>
    %cst_20 = arith.constant 0.000000e+00 : f32
    %49 = vector.broadcast %cst_20 : f32 to vector<112x16xf32>
    %50 = vector.extract_strided_slice %13 {offsets = [0, 4], sizes = [112, 4], strides = [1, 1]} : vector<128x12xf32> to vector<112x4xf32>
    %51 = arith.truncf %50 : vector<112x4xf32> to vector<112x4xbf16>
    %c16_21 = arith.constant 16 : index
    %c0_22 = arith.constant 0 : index
    %52 = vector.load %arg2[%c16_21, %c0_22] : memref<544x128xbf16, #tpu.memory_space<vmem>>, vector<4x16xbf16>
    %cst_23 = arith.constant dense<0.000000e+00> : vector<112x16xf32>
    %53 = tpu.matmul %51, %52, %cst_23 {dimension_numbers = #tpu.dot_dimension_numbers<[1], [0], [0], [1], [0, 0, 1, 1], [], []>} : vector<112x4xbf16>, vector<4x16xbf16>, vector<112x16xf32> -> vector<112x16xf32>
    %54 = arith.addf %49, %53 : vector<112x16xf32>
    %55 = vector.extract_strided_slice %13 {offsets = [0, 8], sizes = [112, 4], strides = [1, 1]} : vector<128x12xf32> to vector<112x4xf32>
    %56 = arith.truncf %55 : vector<112x4xf32> to vector<112x4xbf16>
    %c20_24 = arith.constant 20 : index
    %c0_25 = arith.constant 0 : index
    %57 = vector.load %arg2[%c20_24, %c0_25] : memref<544x128xbf16, #tpu.memory_space<vmem>>, vector<4x16xbf16>
    %cst_26 = arith.constant dense<0.000000e+00> : vector<112x16xf32>
    %58 = tpu.matmul %56, %57, %cst_26 {dimension_numbers = #tpu.dot_dimension_numbers<[1], [0], [0], [1], [0, 0, 1, 1], [], []>} : vector<112x4xbf16>, vector<4x16xbf16>, vector<112x16xf32> -> vector<112x16xf32>
    %59 = arith.addf %54, %58 : vector<112x16xf32>
    %60 = vector.extract_strided_slice %13 {offsets = [8, 0], sizes = [112, 4], strides = [1, 1]} : vector<128x12xf32> to vector<112x4xf32>
    %61 = arith.truncf %60 : vector<112x4xf32> to vector<112x4xbf16>
    %c24_27 = arith.constant 24 : index
    %c0_28 = arith.constant 0 : index
    %62 = vector.load %arg2[%c24_27, %c0_28] : memref<544x128xbf16, #tpu.memory_space<vmem>>, vector<4x16xbf16>
    %cst_29 = arith.constant dense<0.000000e+00> : vector<112x16xf32>
    %63 = tpu.matmul %61, %62, %cst_29 {dimension_numbers = #tpu.dot_dimension_numbers<[1], [0], [0], [1], [0, 0, 1, 1], [], []>} : vector<112x4xbf16>, vector<4x16xbf16>, vector<112x16xf32> -> vector<112x16xf32>
    %64 = arith.addf %59, %63 : vector<112x16xf32>
    %65 = vector.extract_strided_slice %13 {offsets = [8, 4], sizes = [112, 4], strides = [1, 1]} : vector<128x12xf32> to vector<112x4xf32>
    %66 = arith.truncf %65 : vector<112x4xf32> to vector<112x4xbf16>
    %c28_30 = arith.constant 28 : index
    %c0_31 = arith.constant 0 : index
    %67 = vector.load %arg2[%c28_30, %c0_31] : memref<544x128xbf16, #tpu.memory_space<vmem>>, vector<4x16xbf16>
    %cst_32 = arith.constant dense<0.000000e+00> : vector<112x16xf32>
    %68 = tpu.matmul %66, %67, %cst_32 {dimension_numbers = #tpu.dot_dimension_numbers<[1], [0], [0], [1], [0, 0, 1, 1], [], []>} : vector<112x4xbf16>, vector<4x16xbf16>, vector<112x16xf32> -> vector<112x16xf32>
    %69 = arith.addf %64, %68 : vector<112x16xf32>
    %70 = vector.extract_strided_slice %13 {offsets = [8, 8], sizes = [112, 4], strides = [1, 1]} : vector<128x12xf32> to vector<112x4xf32>
    %71 = arith.truncf %70 : vector<112x4xf32> to vector<112x4xbf16>
    %c32_33 = arith.constant 32 : index
    %c0_34 = arith.constant 0 : index
    %72 = vector.load %arg2[%c32_33, %c0_34] : memref<544x128xbf16, #tpu.memory_space<vmem>>, vector<4x16xbf16>
    %cst_35 = arith.constant dense<0.000000e+00> : vector<112x16xf32>
    %73 = tpu.matmul %71, %72, %cst_35 {dimension_numbers = #tpu.dot_dimension_numbers<[1], [0], [0], [1], [0, 0, 1, 1], [], []>} : vector<112x4xbf16>, vector<4x16xbf16>, vector<112x16xf32> -> vector<112x16xf32>
    %74 = arith.addf %69, %73 : vector<112x16xf32>
    %c1_36 = arith.constant 1 : index
    %c0_37 = arith.constant 0 : index
    %75 = vector.load %arg3[%c1_36, %c0_37] : memref<8x128xf32, #tpu.memory_space<vmem>>, vector<1x16xf32>
    %76 = vector.broadcast %75 : vector<1x16xf32> to vector<112x16xf32>
    %77 = arith.addf %74, %76 : vector<112x16xf32>
    %78 = arith.negf %77 : vector<112x16xf32>
    %79 = math.exp %78 : vector<112x16xf32>
    %cst_38 = arith.constant 1.000000e+00 : f32
    %80 = vector.broadcast %cst_38 : f32 to vector<112x16xf32>
    %81 = arith.addf %80, %79 : vector<112x16xf32>
    %82 = arith.divf %80, %81 : vector<112x16xf32>
    %83 = arith.mulf %77, %82 : vector<112x16xf32>
    %cst_39 = arith.constant 0.000000e+00 : f32
    %84 = vector.broadcast %cst_39 : f32 to vector<112x16xf32>
    %85 = vector.extract_strided_slice %13 {offsets = [0, 8], sizes = [112, 4], strides = [1, 1]} : vector<128x12xf32> to vector<112x4xf32>
    %86 = arith.truncf %85 : vector<112x4xf32> to vector<112x4xbf16>
    %c16_40 = arith.constant 16 : index
    %c0_41 = arith.constant 0 : index
    %87 = vector.load %arg2[%c16_40, %c0_41] : memref<544x128xbf16, #tpu.memory_space<vmem>>, vector<4x16xbf16>
    %cst_42 = arith.constant dense<0.000000e+00> : vector<112x16xf32>
    %88 = tpu.matmul %86, %87, %cst_42 {dimension_numbers = #tpu.dot_dimension_numbers<[1], [0], [0], [1], [0, 0, 1, 1], [], []>} : vector<112x4xbf16>, vector<4x16xbf16>, vector<112x16xf32> -> vector<112x16xf32>
    %89 = arith.addf %84, %88 : vector<112x16xf32>
    %90 = vector.extract_strided_slice %13 {offsets = [8, 0], sizes = [112, 4], strides = [1, 1]} : vector<128x12xf32> to vector<112x4xf32>
    %91 = arith.truncf %90 : vector<112x4xf32> to vector<112x4xbf16>
    %c20_43 = arith.constant 20 : index
    %c0_44 = arith.constant 0 : index
    %92 = vector.load %arg2[%c20_43, %c0_44] : memref<544x128xbf16, #tpu.memory_space<vmem>>, vector<4x16xbf16>
    %cst_45 = arith.constant dense<0.000000e+00> : vector<112x16xf32>
    %93 = tpu.matmul %91, %92, %cst_45 {dimension_numbers = #tpu.dot_dimension_numbers<[1], [0], [0], [1], [0, 0, 1, 1], [], []>} : vector<112x4xbf16>, vector<4x16xbf16>, vector<112x16xf32> -> vector<112x16xf32>
    %94 = arith.addf %89, %93 : vector<112x16xf32>
    %95 = vector.extract_strided_slice %13 {offsets = [8, 4], sizes = [112, 4], strides = [1, 1]} : vector<128x12xf32> to vector<112x4xf32>
    %96 = arith.truncf %95 : vector<112x4xf32> to vector<112x4xbf16>
    %c24_46 = arith.constant 24 : index
    %c0_47 = arith.constant 0 : index
    %97 = vector.load %arg2[%c24_46, %c0_47] : memref<544x128xbf16, #tpu.memory_space<vmem>>, vector<4x16xbf16>
    %cst_48 = arith.constant dense<0.000000e+00> : vector<112x16xf32>
    %98 = tpu.matmul %96, %97, %cst_48 {dimension_numbers = #tpu.dot_dimension_numbers<[1], [0], [0], [1], [0, 0, 1, 1], [], []>} : vector<112x4xbf16>, vector<4x16xbf16>, vector<112x16xf32> -> vector<112x16xf32>
    %99 = arith.addf %94, %98 : vector<112x16xf32>
    %100 = vector.extract_strided_slice %13 {offsets = [8, 8], sizes = [112, 4], strides = [1, 1]} : vector<128x12xf32> to vector<112x4xf32>
    %101 = arith.truncf %100 : vector<112x4xf32> to vector<112x4xbf16>
    %c28_49 = arith.constant 28 : index
    %c0_50 = arith.constant 0 : index
    %102 = vector.load %arg2[%c28_49, %c0_50] : memref<544x128xbf16, #tpu.memory_space<vmem>>, vector<4x16xbf16>
    %cst_51 = arith.constant dense<0.000000e+00> : vector<112x16xf32>
    %103 = tpu.matmul %101, %102, %cst_51 {dimension_numbers = #tpu.dot_dimension_numbers<[1], [0], [0], [1], [0, 0, 1, 1], [], []>} : vector<112x4xbf16>, vector<4x16xbf16>, vector<112x16xf32> -> vector<112x16xf32>
    %104 = arith.addf %99, %103 : vector<112x16xf32>
    %105 = vector.extract_strided_slice %13 {offsets = [16, 0], sizes = [112, 4], strides = [1, 1]} : vector<128x12xf32> to vector<112x4xf32>
    %106 = arith.truncf %105 : vector<112x4xf32> to vector<112x4xbf16>
    %c32_52 = arith.constant 32 : index
    %c0_53 = arith.constant 0 : index
    %107 = vector.load %arg2[%c32_52, %c0_53] : memref<544x128xbf16, #tpu.memory_space<vmem>>, vector<4x16xbf16>
    %cst_54 = arith.constant dense<0.000000e+00> : vector<112x16xf32>
    %108 = tpu.matmul %106, %107, %cst_54 {dimension_numbers = #tpu.dot_dimension_numbers<[1], [0], [0], [1], [0, 0, 1, 1], [], []>} : vector<112x4xbf16>, vector<4x16xbf16>, vector<112x16xf32> -> vector<112x16xf32>
    %109 = arith.addf %104, %108 : vector<112x16xf32>
    %c1_55 = arith.constant 1 : index
    %c0_56 = arith.constant 0 : index
    %110 = vector.load %arg3[%c1_55, %c0_56] : memref<8x128xf32, #tpu.memory_space<vmem>>, vector<1x16xf32>
    %111 = vector.broadcast %110 : vector<1x16xf32> to vector<112x16xf32>
    %112 = arith.addf %109, %111 : vector<112x16xf32>
    %113 = arith.negf %112 : vector<112x16xf32>
    %114 = math.exp %113 : vector<112x16xf32>
    %cst_57 = arith.constant 1.000000e+00 : f32
    %115 = vector.broadcast %cst_57 : f32 to vector<112x16xf32>
    %116 = arith.addf %115, %114 : vector<112x16xf32>
    %117 = arith.divf %115, %116 : vector<112x16xf32>
    %118 = arith.mulf %112, %117 : vector<112x16xf32>
    %cst_58 = arith.constant 0.000000e+00 : f32
    %119 = vector.broadcast %cst_58 : f32 to vector<96x32xf32>
    %120 = vector.extract_strided_slice %48 {offsets = [0, 0], sizes = [96, 16], strides = [1, 1]} : vector<112x16xf32> to vector<96x16xf32>
    %121 = arith.truncf %120 : vector<96x16xf32> to vector<96x16xbf16>
    %c48 = arith.constant 48 : index
    %c0_59 = arith.constant 0 : index
    %122 = vector.load %arg2[%c48, %c0_59] : memref<544x128xbf16, #tpu.memory_space<vmem>>, vector<16x32xbf16>
    %cst_60 = arith.constant dense<0.000000e+00> : vector<96x32xf32>
    %123 = tpu.matmul %121, %122, %cst_60 {dimension_numbers = #tpu.dot_dimension_numbers<[1], [0], [0], [1], [0, 0, 1, 1], [], []>} : vector<96x16xbf16>, vector<16x32xbf16>, vector<96x32xf32> -> vector<96x32xf32>
    %124 = arith.addf %119, %123 : vector<96x32xf32>
    %125 = vector.extract_strided_slice %83 {offsets = [0, 0], sizes = [96, 16], strides = [1, 1]} : vector<112x16xf32> to vector<96x16xf32>
    %126 = arith.truncf %125 : vector<96x16xf32> to vector<96x16xbf16>
    %c64 = arith.constant 64 : index
    %c0_61 = arith.constant 0 : index
    %127 = vector.load %arg2[%c64, %c0_61] : memref<544x128xbf16, #tpu.memory_space<vmem>>, vector<16x32xbf16>
    %cst_62 = arith.constant dense<0.000000e+00> : vector<96x32xf32>
    %128 = tpu.matmul %126, %127, %cst_62 {dimension_numbers = #tpu.dot_dimension_numbers<[1], [0], [0], [1], [0, 0, 1, 1], [], []>} : vector<96x16xbf16>, vector<16x32xbf16>, vector<96x32xf32> -> vector<96x32xf32>
    %129 = arith.addf %124, %128 : vector<96x32xf32>
    %130 = vector.extract_strided_slice %118 {offsets = [0, 0], sizes = [96, 16], strides = [1, 1]} : vector<112x16xf32> to vector<96x16xf32>
    %131 = arith.truncf %130 : vector<96x16xf32> to vector<96x16xbf16>
    %c80 = arith.constant 80 : index
    %c0_63 = arith.constant 0 : index
    %132 = vector.load %arg2[%c80, %c0_63] : memref<544x128xbf16, #tpu.memory_space<vmem>>, vector<16x32xbf16>
    %cst_64 = arith.constant dense<0.000000e+00> : vector<96x32xf32>
    %133 = tpu.matmul %131, %132, %cst_64 {dimension_numbers = #tpu.dot_dimension_numbers<[1], [0], [0], [1], [0, 0, 1, 1], [], []>} : vector<96x16xbf16>, vector<16x32xbf16>, vector<96x32xf32> -> vector<96x32xf32>
    %134 = arith.addf %129, %133 : vector<96x32xf32>
    %135 = vector.extract_strided_slice %48 {offsets = [8, 0], sizes = [96, 16], strides = [1, 1]} : vector<112x16xf32> to vector<96x16xf32>
    %136 = arith.truncf %135 : vector<96x16xf32> to vector<96x16xbf16>
    %c96 = arith.constant 96 : index
    %c0_65 = arith.constant 0 : index
    %137 = vector.load %arg2[%c96, %c0_65] : memref<544x128xbf16, #tpu.memory_space<vmem>>, vector<16x32xbf16>
    %cst_66 = arith.constant dense<0.000000e+00> : vector<96x32xf32>
    %138 = tpu.matmul %136, %137, %cst_66 {dimension_numbers = #tpu.dot_dimension_numbers<[1], [0], [0], [1], [0, 0, 1, 1], [], []>} : vector<96x16xbf16>, vector<16x32xbf16>, vector<96x32xf32> -> vector<96x32xf32>
    %139 = arith.addf %134, %138 : vector<96x32xf32>
    %140 = vector.extract_strided_slice %83 {offsets = [8, 0], sizes = [96, 16], strides = [1, 1]} : vector<112x16xf32> to vector<96x16xf32>
    %141 = arith.truncf %140 : vector<96x16xf32> to vector<96x16xbf16>
    %c112 = arith.constant 112 : index
    %c0_67 = arith.constant 0 : index
    %142 = vector.load %arg2[%c112, %c0_67] : memref<544x128xbf16, #tpu.memory_space<vmem>>, vector<16x32xbf16>
    %cst_68 = arith.constant dense<0.000000e+00> : vector<96x32xf32>
    %143 = tpu.matmul %141, %142, %cst_68 {dimension_numbers = #tpu.dot_dimension_numbers<[1], [0], [0], [1], [0, 0, 1, 1], [], []>} : vector<96x16xbf16>, vector<16x32xbf16>, vector<96x32xf32> -> vector<96x32xf32>
    %144 = arith.addf %139, %143 : vector<96x32xf32>
    %145 = vector.extract_strided_slice %118 {offsets = [8, 0], sizes = [96, 16], strides = [1, 1]} : vector<112x16xf32> to vector<96x16xf32>
    %146 = arith.truncf %145 : vector<96x16xf32> to vector<96x16xbf16>
    %c128 = arith.constant 128 : index
    %c0_69 = arith.constant 0 : index
    %147 = vector.load %arg2[%c128, %c0_69] : memref<544x128xbf16, #tpu.memory_space<vmem>>, vector<16x32xbf16>
    %cst_70 = arith.constant dense<0.000000e+00> : vector<96x32xf32>
    %148 = tpu.matmul %146, %147, %cst_70 {dimension_numbers = #tpu.dot_dimension_numbers<[1], [0], [0], [1], [0, 0, 1, 1], [], []>} : vector<96x16xbf16>, vector<16x32xbf16>, vector<96x32xf32> -> vector<96x32xf32>
    %149 = arith.addf %144, %148 : vector<96x32xf32>
    %150 = vector.extract_strided_slice %48 {offsets = [16, 0], sizes = [96, 16], strides = [1, 1]} : vector<112x16xf32> to vector<96x16xf32>
    %151 = arith.truncf %150 : vector<96x16xf32> to vector<96x16xbf16>
    %c144 = arith.constant 144 : index
    %c0_71 = arith.constant 0 : index
    %152 = vector.load %arg2[%c144, %c0_71] : memref<544x128xbf16, #tpu.memory_space<vmem>>, vector<16x32xbf16>
    %cst_72 = arith.constant dense<0.000000e+00> : vector<96x32xf32>
    %153 = tpu.matmul %151, %152, %cst_72 {dimension_numbers = #tpu.dot_dimension_numbers<[1], [0], [0], [1], [0, 0, 1, 1], [], []>} : vector<96x16xbf16>, vector<16x32xbf16>, vector<96x32xf32> -> vector<96x32xf32>
    %154 = arith.addf %149, %153 : vector<96x32xf32>
    %155 = vector.extract_strided_slice %83 {offsets = [16, 0], sizes = [96, 16], strides = [1, 1]} : vector<112x16xf32> to vector<96x16xf32>
    %156 = arith.truncf %155 : vector<96x16xf32> to vector<96x16xbf16>
    %c160 = arith.constant 160 : index
    %c0_73 = arith.constant 0 : index
    %157 = vector.load %arg2[%c160, %c0_73] : memref<544x128xbf16, #tpu.memory_space<vmem>>, vector<16x32xbf16>
    %cst_74 = arith.constant dense<0.000000e+00> : vector<96x32xf32>
    %158 = tpu.matmul %156, %157, %cst_74 {dimension_numbers = #tpu.dot_dimension_numbers<[1], [0], [0], [1], [0, 0, 1, 1], [], []>} : vector<96x16xbf16>, vector<16x32xbf16>, vector<96x32xf32> -> vector<96x32xf32>
    %159 = arith.addf %154, %158 : vector<96x32xf32>
    %160 = vector.extract_strided_slice %118 {offsets = [16, 0], sizes = [96, 16], strides = [1, 1]} : vector<112x16xf32> to vector<96x16xf32>
    %161 = arith.truncf %160 : vector<96x16xf32> to vector<96x16xbf16>
    %c176 = arith.constant 176 : index
    %c0_75 = arith.constant 0 : index
    %162 = vector.load %arg2[%c176, %c0_75] : memref<544x128xbf16, #tpu.memory_space<vmem>>, vector<16x32xbf16>
    %cst_76 = arith.constant dense<0.000000e+00> : vector<96x32xf32>
    %163 = tpu.matmul %161, %162, %cst_76 {dimension_numbers = #tpu.dot_dimension_numbers<[1], [0], [0], [1], [0, 0, 1, 1], [], []>} : vector<96x16xbf16>, vector<16x32xbf16>, vector<96x32xf32> -> vector<96x32xf32>
    %164 = arith.addf %159, %163 : vector<96x32xf32>
    %c2 = arith.constant 2 : index
    %c0_77 = arith.constant 0 : index
    %165 = vector.load %arg3[%c2, %c0_77] : memref<8x128xf32, #tpu.memory_space<vmem>>, vector<1x32xf32>
    %166 = vector.broadcast %165 : vector<1x32xf32> to vector<96x32xf32>
    %167 = arith.addf %164, %166 : vector<96x32xf32>
    %168 = arith.negf %167 : vector<96x32xf32>
    %169 = math.exp %168 : vector<96x32xf32>
    %cst_78 = arith.constant 1.000000e+00 : f32
    %170 = vector.broadcast %cst_78 : f32 to vector<96x32xf32>
    %171 = arith.addf %170, %169 : vector<96x32xf32>
    %172 = arith.divf %170, %171 : vector<96x32xf32>
    %173 = arith.mulf %167, %172 : vector<96x32xf32>
    %cst_79 = arith.constant 0.000000e+00 : f32
    %174 = vector.broadcast %cst_79 : f32 to vector<64x32xf32>
    %175 = vector.extract_strided_slice %173 {offsets = [0, 0], sizes = [64, 32], strides = [1, 1]} : vector<96x32xf32> to vector<64x32xf32>
    %176 = arith.truncf %175 : vector<64x32xf32> to vector<64x32xbf16>
    %c192 = arith.constant 192 : index
    %c0_80 = arith.constant 0 : index
    %177 = vector.load %arg2[%c192, %c0_80] : memref<544x128xbf16, #tpu.memory_space<vmem>>, vector<32x32xbf16>
    %cst_81 = arith.constant dense<0.000000e+00> : vector<64x32xf32>
    %178 = tpu.matmul %176, %177, %cst_81 {dimension_numbers = #tpu.dot_dimension_numbers<[1], [0], [0], [1], [0, 0, 1, 1], [], []>} : vector<64x32xbf16>, vector<32x32xbf16>, vector<64x32xf32> -> vector<64x32xf32>
    %179 = arith.addf %174, %178 : vector<64x32xf32>
    %180 = vector.extract_strided_slice %173 {offsets = [8, 0], sizes = [64, 32], strides = [1, 1]} : vector<96x32xf32> to vector<64x32xf32>
    %181 = arith.truncf %180 : vector<64x32xf32> to vector<64x32xbf16>
    %c224 = arith.constant 224 : index
    %c0_82 = arith.constant 0 : index
    %182 = vector.load %arg2[%c224, %c0_82] : memref<544x128xbf16, #tpu.memory_space<vmem>>, vector<32x32xbf16>
    %cst_83 = arith.constant dense<0.000000e+00> : vector<64x32xf32>
    %183 = tpu.matmul %181, %182, %cst_83 {dimension_numbers = #tpu.dot_dimension_numbers<[1], [0], [0], [1], [0, 0, 1, 1], [], []>} : vector<64x32xbf16>, vector<32x32xbf16>, vector<64x32xf32> -> vector<64x32xf32>
    %184 = arith.addf %179, %183 : vector<64x32xf32>
    %185 = vector.extract_strided_slice %173 {offsets = [16, 0], sizes = [64, 32], strides = [1, 1]} : vector<96x32xf32> to vector<64x32xf32>
    %186 = arith.truncf %185 : vector<64x32xf32> to vector<64x32xbf16>
    %c256 = arith.constant 256 : index
    %c0_84 = arith.constant 0 : index
    %187 = vector.load %arg2[%c256, %c0_84] : memref<544x128xbf16, #tpu.memory_space<vmem>>, vector<32x32xbf16>
    %cst_85 = arith.constant dense<0.000000e+00> : vector<64x32xf32>
    %188 = tpu.matmul %186, %187, %cst_85 {dimension_numbers = #tpu.dot_dimension_numbers<[1], [0], [0], [1], [0, 0, 1, 1], [], []>} : vector<64x32xbf16>, vector<32x32xbf16>, vector<64x32xf32> -> vector<64x32xf32>
    %189 = arith.addf %184, %188 : vector<64x32xf32>
    %190 = vector.extract_strided_slice %173 {offsets = [24, 0], sizes = [64, 32], strides = [1, 1]} : vector<96x32xf32> to vector<64x32xf32>
    %191 = arith.truncf %190 : vector<64x32xf32> to vector<64x32xbf16>
    %c288 = arith.constant 288 : index
    %c0_86 = arith.constant 0 : index
    %192 = vector.load %arg2[%c288, %c0_86] : memref<544x128xbf16, #tpu.memory_space<vmem>>, vector<32x32xbf16>
    %cst_87 = arith.constant dense<0.000000e+00> : vector<64x32xf32>
    %193 = tpu.matmul %191, %192, %cst_87 {dimension_numbers = #tpu.dot_dimension_numbers<[1], [0], [0], [1], [0, 0, 1, 1], [], []>} : vector<64x32xbf16>, vector<32x32xbf16>, vector<64x32xf32> -> vector<64x32xf32>
    %194 = arith.addf %189, %193 : vector<64x32xf32>
    %195 = vector.extract_strided_slice %173 {offsets = [32, 0], sizes = [64, 32], strides = [1, 1]} : vector<96x32xf32> to vector<64x32xf32>
    %196 = arith.truncf %195 : vector<64x32xf32> to vector<64x32xbf16>
    %c320 = arith.constant 320 : index
    %c0_88 = arith.constant 0 : index
    %197 = vector.load %arg2[%c320, %c0_88] : memref<544x128xbf16, #tpu.memory_space<vmem>>, vector<32x32xbf16>
    %cst_89 = arith.constant dense<0.000000e+00> : vector<64x32xf32>
    %198 = tpu.matmul %196, %197, %cst_89 {dimension_numbers = #tpu.dot_dimension_numbers<[1], [0], [0], [1], [0, 0, 1, 1], [], []>} : vector<64x32xbf16>, vector<32x32xbf16>, vector<64x32xf32> -> vector<64x32xf32>
    %199 = arith.addf %194, %198 : vector<64x32xf32>
    %c3 = arith.constant 3 : index
    %c0_90 = arith.constant 0 : index
    %200 = vector.load %arg3[%c3, %c0_90] : memref<8x128xf32, #tpu.memory_space<vmem>>, vector<1x32xf32>
    %201 = vector.broadcast %200 : vector<1x32xf32> to vector<64x32xf32>
    %202 = arith.addf %199, %201 : vector<64x32xf32>
    %203 = arith.negf %202 : vector<64x32xf32>
    %204 = math.exp %203 : vector<64x32xf32>
    %cst_91 = arith.constant 1.000000e+00 : f32
    %205 = vector.broadcast %cst_91 : f32 to vector<64x32xf32>
    %206 = arith.addf %205, %204 : vector<64x32xf32>
    %207 = arith.divf %205, %206 : vector<64x32xf32>
    %208 = arith.mulf %202, %207 : vector<64x32xf32>
    %209 = arith.truncf %208 : vector<64x32xf32> to vector<64x32xbf16>
    %c352 = arith.constant 352 : index
    %c0_92 = arith.constant 0 : index
    %210 = vector.load %arg2[%c352, %c0_92] : memref<544x128xbf16, #tpu.memory_space<vmem>>, vector<32x128xbf16>
    %cst_93 = arith.constant dense<0.000000e+00> : vector<64x128xf32>
    %211 = tpu.matmul %209, %210, %cst_93 {dimension_numbers = #tpu.dot_dimension_numbers<[1], [0], [0], [1], [0, 0, 1, 1], [], []>} : vector<64x32xbf16>, vector<32x128xbf16>, vector<64x128xf32> -> vector<64x128xf32>
    %c4 = arith.constant 4 : index
    %c0_94 = arith.constant 0 : index
    %212 = vector.load %arg3[%c4, %c0_94] : memref<8x128xf32, #tpu.memory_space<vmem>>, vector<1x128xf32>
    %213 = vector.broadcast %212 : vector<1x128xf32> to vector<64x128xf32>
    %214 = arith.addf %211, %213 : vector<64x128xf32>
    %c384 = arith.constant 384 : index
    %c0_95 = arith.constant 0 : index
    %215 = vector.load %arg2[%c384, %c0_95] : memref<544x128xbf16, #tpu.memory_space<vmem>>, vector<32x128xbf16>
    %cst_96 = arith.constant 0.000000e+00 : f32
    %216 = vector.broadcast %cst_96 : f32 to vector<8x32xf32>
    %cst_97 = arith.constant 0.000000e+00 : f32
    %217 = vector.broadcast %cst_97 : f32 to vector<8x32xf32>
    %218 = vector.extract_strided_slice %214 {offsets = [0, 0], sizes = [8, 128], strides = [1, 1]} : vector<64x128xf32> to vector<8x128xf32>
    %219 = arith.truncf %216 : vector<8x32xf32> to vector<8x32xbf16>
    %cst_98 = arith.constant dense<0.000000e+00> : vector<8x128xf32>
    %220 = tpu.matmul %219, %215, %cst_98 {dimension_numbers = #tpu.dot_dimension_numbers<[1], [0], [0], [1], [0, 0, 1, 1], [], []>} : vector<8x32xbf16>, vector<32x128xbf16>, vector<8x128xf32> -> vector<8x128xf32>
    %221 = arith.addf %218, %220 : vector<8x128xf32>
    %222 = vector.extract_strided_slice %221 {offsets = [0, 0], sizes = [8, 32], strides = [1, 1]} : vector<8x128xf32> to vector<8x32xf32>
    %223 = arith.negf %222 : vector<8x32xf32>
    %224 = math.exp %223 : vector<8x32xf32>
    %cst_99 = arith.constant 1.000000e+00 : f32
    %225 = vector.broadcast %cst_99 : f32 to vector<8x32xf32>
    %226 = arith.addf %225, %224 : vector<8x32xf32>
    %227 = arith.divf %225, %226 : vector<8x32xf32>
    %228 = vector.extract_strided_slice %221 {offsets = [0, 32], sizes = [8, 32], strides = [1, 1]} : vector<8x128xf32> to vector<8x32xf32>
    %229 = arith.negf %228 : vector<8x32xf32>
    %230 = math.exp %229 : vector<8x32xf32>
    %cst_100 = arith.constant 1.000000e+00 : f32
    %231 = vector.broadcast %cst_100 : f32 to vector<8x32xf32>
    %232 = arith.addf %231, %230 : vector<8x32xf32>
    %233 = arith.divf %231, %232 : vector<8x32xf32>
    %234 = vector.extract_strided_slice %221 {offsets = [0, 64], sizes = [8, 32], strides = [1, 1]} : vector<8x128xf32> to vector<8x32xf32>
    %235 = math.tanh %234 : vector<8x32xf32>
    %236 = vector.extract_strided_slice %221 {offsets = [0, 96], sizes = [8, 32], strides = [1, 1]} : vector<8x128xf32> to vector<8x32xf32>
    %237 = arith.negf %236 : vector<8x32xf32>
    %238 = math.exp %237 : vector<8x32xf32>
    %cst_101 = arith.constant 1.000000e+00 : f32
    %239 = vector.broadcast %cst_101 : f32 to vector<8x32xf32>
    %240 = arith.addf %239, %238 : vector<8x32xf32>
    %241 = arith.divf %239, %240 : vector<8x32xf32>
    %242 = arith.mulf %233, %217 : vector<8x32xf32>
    %243 = arith.mulf %227, %235 : vector<8x32xf32>
    %244 = arith.addf %242, %243 : vector<8x32xf32>
    %245 = math.tanh %244 : vector<8x32xf32>
    %246 = arith.mulf %241, %245 : vector<8x32xf32>
    %247 = vector.extract_strided_slice %214 {offsets = [8, 0], sizes = [8, 128], strides = [1, 1]} : vector<64x128xf32> to vector<8x128xf32>
    %248 = arith.truncf %246 : vector<8x32xf32> to vector<8x32xbf16>
    %cst_102 = arith.constant dense<0.000000e+00> : vector<8x128xf32>
    %249 = tpu.matmul %248, %215, %cst_102 {dimension_numbers = #tpu.dot_dimension_numbers<[1], [0], [0], [1], [0, 0, 1, 1], [], []>} : vector<8x32xbf16>, vector<32x128xbf16>, vector<8x128xf32> -> vector<8x128xf32>
    %250 = arith.addf %247, %249 : vector<8x128xf32>
    %251 = vector.extract_strided_slice %250 {offsets = [0, 0], sizes = [8, 32], strides = [1, 1]} : vector<8x128xf32> to vector<8x32xf32>
    %252 = arith.negf %251 : vector<8x32xf32>
    %253 = math.exp %252 : vector<8x32xf32>
    %cst_103 = arith.constant 1.000000e+00 : f32
    %254 = vector.broadcast %cst_103 : f32 to vector<8x32xf32>
    %255 = arith.addf %254, %253 : vector<8x32xf32>
    %256 = arith.divf %254, %255 : vector<8x32xf32>
    %257 = vector.extract_strided_slice %250 {offsets = [0, 32], sizes = [8, 32], strides = [1, 1]} : vector<8x128xf32> to vector<8x32xf32>
    %258 = arith.negf %257 : vector<8x32xf32>
    %259 = math.exp %258 : vector<8x32xf32>
    %cst_104 = arith.constant 1.000000e+00 : f32
    %260 = vector.broadcast %cst_104 : f32 to vector<8x32xf32>
    %261 = arith.addf %260, %259 : vector<8x32xf32>
    %262 = arith.divf %260, %261 : vector<8x32xf32>
    %263 = vector.extract_strided_slice %250 {offsets = [0, 64], sizes = [8, 32], strides = [1, 1]} : vector<8x128xf32> to vector<8x32xf32>
    %264 = math.tanh %263 : vector<8x32xf32>
    %265 = vector.extract_strided_slice %250 {offsets = [0, 96], sizes = [8, 32], strides = [1, 1]} : vector<8x128xf32> to vector<8x32xf32>
    %266 = arith.negf %265 : vector<8x32xf32>
    %267 = math.exp %266 : vector<8x32xf32>
    %cst_105 = arith.constant 1.000000e+00 : f32
    %268 = vector.broadcast %cst_105 : f32 to vector<8x32xf32>
    %269 = arith.addf %268, %267 : vector<8x32xf32>
    %270 = arith.divf %268, %269 : vector<8x32xf32>
    %271 = arith.mulf %262, %244 : vector<8x32xf32>
    %272 = arith.mulf %256, %264 : vector<8x32xf32>
    %273 = arith.addf %271, %272 : vector<8x32xf32>
    %274 = math.tanh %273 : vector<8x32xf32>
    %275 = arith.mulf %270, %274 : vector<8x32xf32>
    %276 = vector.extract_strided_slice %214 {offsets = [16, 0], sizes = [8, 128], strides = [1, 1]} : vector<64x128xf32> to vector<8x128xf32>
    %277 = arith.truncf %275 : vector<8x32xf32> to vector<8x32xbf16>
    %cst_106 = arith.constant dense<0.000000e+00> : vector<8x128xf32>
    %278 = tpu.matmul %277, %215, %cst_106 {dimension_numbers = #tpu.dot_dimension_numbers<[1], [0], [0], [1], [0, 0, 1, 1], [], []>} : vector<8x32xbf16>, vector<32x128xbf16>, vector<8x128xf32> -> vector<8x128xf32>
    %279 = arith.addf %276, %278 : vector<8x128xf32>
    %280 = vector.extract_strided_slice %279 {offsets = [0, 0], sizes = [8, 32], strides = [1, 1]} : vector<8x128xf32> to vector<8x32xf32>
    %281 = arith.negf %280 : vector<8x32xf32>
    %282 = math.exp %281 : vector<8x32xf32>
    %cst_107 = arith.constant 1.000000e+00 : f32
    %283 = vector.broadcast %cst_107 : f32 to vector<8x32xf32>
    %284 = arith.addf %283, %282 : vector<8x32xf32>
    %285 = arith.divf %283, %284 : vector<8x32xf32>
    %286 = vector.extract_strided_slice %279 {offsets = [0, 32], sizes = [8, 32], strides = [1, 1]} : vector<8x128xf32> to vector<8x32xf32>
    %287 = arith.negf %286 : vector<8x32xf32>
    %288 = math.exp %287 : vector<8x32xf32>
    %cst_108 = arith.constant 1.000000e+00 : f32
    %289 = vector.broadcast %cst_108 : f32 to vector<8x32xf32>
    %290 = arith.addf %289, %288 : vector<8x32xf32>
    %291 = arith.divf %289, %290 : vector<8x32xf32>
    %292 = vector.extract_strided_slice %279 {offsets = [0, 64], sizes = [8, 32], strides = [1, 1]} : vector<8x128xf32> to vector<8x32xf32>
    %293 = math.tanh %292 : vector<8x32xf32>
    %294 = vector.extract_strided_slice %279 {offsets = [0, 96], sizes = [8, 32], strides = [1, 1]} : vector<8x128xf32> to vector<8x32xf32>
    %295 = arith.negf %294 : vector<8x32xf32>
    %296 = math.exp %295 : vector<8x32xf32>
    %cst_109 = arith.constant 1.000000e+00 : f32
    %297 = vector.broadcast %cst_109 : f32 to vector<8x32xf32>
    %298 = arith.addf %297, %296 : vector<8x32xf32>
    %299 = arith.divf %297, %298 : vector<8x32xf32>
    %300 = arith.mulf %291, %273 : vector<8x32xf32>
    %301 = arith.mulf %285, %293 : vector<8x32xf32>
    %302 = arith.addf %300, %301 : vector<8x32xf32>
    %303 = math.tanh %302 : vector<8x32xf32>
    %304 = arith.mulf %299, %303 : vector<8x32xf32>
    %305 = vector.extract_strided_slice %214 {offsets = [24, 0], sizes = [8, 128], strides = [1, 1]} : vector<64x128xf32> to vector<8x128xf32>
    %306 = arith.truncf %304 : vector<8x32xf32> to vector<8x32xbf16>
    %cst_110 = arith.constant dense<0.000000e+00> : vector<8x128xf32>
    %307 = tpu.matmul %306, %215, %cst_110 {dimension_numbers = #tpu.dot_dimension_numbers<[1], [0], [0], [1], [0, 0, 1, 1], [], []>} : vector<8x32xbf16>, vector<32x128xbf16>, vector<8x128xf32> -> vector<8x128xf32>
    %308 = arith.addf %305, %307 : vector<8x128xf32>
    %309 = vector.extract_strided_slice %308 {offsets = [0, 0], sizes = [8, 32], strides = [1, 1]} : vector<8x128xf32> to vector<8x32xf32>
    %310 = arith.negf %309 : vector<8x32xf32>
    %311 = math.exp %310 : vector<8x32xf32>
    %cst_111 = arith.constant 1.000000e+00 : f32
    %312 = vector.broadcast %cst_111 : f32 to vector<8x32xf32>
    %313 = arith.addf %312, %311 : vector<8x32xf32>
    %314 = arith.divf %312, %313 : vector<8x32xf32>
    %315 = vector.extract_strided_slice %308 {offsets = [0, 32], sizes = [8, 32], strides = [1, 1]} : vector<8x128xf32> to vector<8x32xf32>
    %316 = arith.negf %315 : vector<8x32xf32>
    %317 = math.exp %316 : vector<8x32xf32>
    %cst_112 = arith.constant 1.000000e+00 : f32
    %318 = vector.broadcast %cst_112 : f32 to vector<8x32xf32>
    %319 = arith.addf %318, %317 : vector<8x32xf32>
    %320 = arith.divf %318, %319 : vector<8x32xf32>
    %321 = vector.extract_strided_slice %308 {offsets = [0, 64], sizes = [8, 32], strides = [1, 1]} : vector<8x128xf32> to vector<8x32xf32>
    %322 = math.tanh %321 : vector<8x32xf32>
    %323 = vector.extract_strided_slice %308 {offsets = [0, 96], sizes = [8, 32], strides = [1, 1]} : vector<8x128xf32> to vector<8x32xf32>
    %324 = arith.negf %323 : vector<8x32xf32>
    %325 = math.exp %324 : vector<8x32xf32>
    %cst_113 = arith.constant 1.000000e+00 : f32
    %326 = vector.broadcast %cst_113 : f32 to vector<8x32xf32>
    %327 = arith.addf %326, %325 : vector<8x32xf32>
    %328 = arith.divf %326, %327 : vector<8x32xf32>
    %329 = arith.mulf %320, %302 : vector<8x32xf32>
    %330 = arith.mulf %314, %322 : vector<8x32xf32>
    %331 = arith.addf %329, %330 : vector<8x32xf32>
    %332 = math.tanh %331 : vector<8x32xf32>
    %333 = arith.mulf %328, %332 : vector<8x32xf32>
    %334 = vector.extract_strided_slice %214 {offsets = [32, 0], sizes = [8, 128], strides = [1, 1]} : vector<64x128xf32> to vector<8x128xf32>
    %335 = arith.truncf %333 : vector<8x32xf32> to vector<8x32xbf16>
    %cst_114 = arith.constant dense<0.000000e+00> : vector<8x128xf32>
    %336 = tpu.matmul %335, %215, %cst_114 {dimension_numbers = #tpu.dot_dimension_numbers<[1], [0], [0], [1], [0, 0, 1, 1], [], []>} : vector<8x32xbf16>, vector<32x128xbf16>, vector<8x128xf32> -> vector<8x128xf32>
    %337 = arith.addf %334, %336 : vector<8x128xf32>
    %338 = vector.extract_strided_slice %337 {offsets = [0, 0], sizes = [8, 32], strides = [1, 1]} : vector<8x128xf32> to vector<8x32xf32>
    %339 = arith.negf %338 : vector<8x32xf32>
    %340 = math.exp %339 : vector<8x32xf32>
    %cst_115 = arith.constant 1.000000e+00 : f32
    %341 = vector.broadcast %cst_115 : f32 to vector<8x32xf32>
    %342 = arith.addf %341, %340 : vector<8x32xf32>
    %343 = arith.divf %341, %342 : vector<8x32xf32>
    %344 = vector.extract_strided_slice %337 {offsets = [0, 32], sizes = [8, 32], strides = [1, 1]} : vector<8x128xf32> to vector<8x32xf32>
    %345 = arith.negf %344 : vector<8x32xf32>
    %346 = math.exp %345 : vector<8x32xf32>
    %cst_116 = arith.constant 1.000000e+00 : f32
    %347 = vector.broadcast %cst_116 : f32 to vector<8x32xf32>
    %348 = arith.addf %347, %346 : vector<8x32xf32>
    %349 = arith.divf %347, %348 : vector<8x32xf32>
    %350 = vector.extract_strided_slice %337 {offsets = [0, 64], sizes = [8, 32], strides = [1, 1]} : vector<8x128xf32> to vector<8x32xf32>
    %351 = math.tanh %350 : vector<8x32xf32>
    %352 = vector.extract_strided_slice %337 {offsets = [0, 96], sizes = [8, 32], strides = [1, 1]} : vector<8x128xf32> to vector<8x32xf32>
    %353 = arith.negf %352 : vector<8x32xf32>
    %354 = math.exp %353 : vector<8x32xf32>
    %cst_117 = arith.constant 1.000000e+00 : f32
    %355 = vector.broadcast %cst_117 : f32 to vector<8x32xf32>
    %356 = arith.addf %355, %354 : vector<8x32xf32>
    %357 = arith.divf %355, %356 : vector<8x32xf32>
    %358 = arith.mulf %349, %331 : vector<8x32xf32>
    %359 = arith.mulf %343, %351 : vector<8x32xf32>
    %360 = arith.addf %358, %359 : vector<8x32xf32>
    %361 = math.tanh %360 : vector<8x32xf32>
    %362 = arith.mulf %357, %361 : vector<8x32xf32>
    %363 = vector.extract_strided_slice %214 {offsets = [40, 0], sizes = [8, 128], strides = [1, 1]} : vector<64x128xf32> to vector<8x128xf32>
    %364 = arith.truncf %362 : vector<8x32xf32> to vector<8x32xbf16>
    %cst_118 = arith.constant dense<0.000000e+00> : vector<8x128xf32>
    %365 = tpu.matmul %364, %215, %cst_118 {dimension_numbers = #tpu.dot_dimension_numbers<[1], [0], [0], [1], [0, 0, 1, 1], [], []>} : vector<8x32xbf16>, vector<32x128xbf16>, vector<8x128xf32> -> vector<8x128xf32>
    %366 = arith.addf %363, %365 : vector<8x128xf32>
    %367 = vector.extract_strided_slice %366 {offsets = [0, 0], sizes = [8, 32], strides = [1, 1]} : vector<8x128xf32> to vector<8x32xf32>
    %368 = arith.negf %367 : vector<8x32xf32>
    %369 = math.exp %368 : vector<8x32xf32>
    %cst_119 = arith.constant 1.000000e+00 : f32
    %370 = vector.broadcast %cst_119 : f32 to vector<8x32xf32>
    %371 = arith.addf %370, %369 : vector<8x32xf32>
    %372 = arith.divf %370, %371 : vector<8x32xf32>
    %373 = vector.extract_strided_slice %366 {offsets = [0, 32], sizes = [8, 32], strides = [1, 1]} : vector<8x128xf32> to vector<8x32xf32>
    %374 = arith.negf %373 : vector<8x32xf32>
    %375 = math.exp %374 : vector<8x32xf32>
    %cst_120 = arith.constant 1.000000e+00 : f32
    %376 = vector.broadcast %cst_120 : f32 to vector<8x32xf32>
    %377 = arith.addf %376, %375 : vector<8x32xf32>
    %378 = arith.divf %376, %377 : vector<8x32xf32>
    %379 = vector.extract_strided_slice %366 {offsets = [0, 64], sizes = [8, 32], strides = [1, 1]} : vector<8x128xf32> to vector<8x32xf32>
    %380 = math.tanh %379 : vector<8x32xf32>
    %381 = vector.extract_strided_slice %366 {offsets = [0, 96], sizes = [8, 32], strides = [1, 1]} : vector<8x128xf32> to vector<8x32xf32>
    %382 = arith.negf %381 : vector<8x32xf32>
    %383 = math.exp %382 : vector<8x32xf32>
    %cst_121 = arith.constant 1.000000e+00 : f32
    %384 = vector.broadcast %cst_121 : f32 to vector<8x32xf32>
    %385 = arith.addf %384, %383 : vector<8x32xf32>
    %386 = arith.divf %384, %385 : vector<8x32xf32>
    %387 = arith.mulf %378, %360 : vector<8x32xf32>
    %388 = arith.mulf %372, %380 : vector<8x32xf32>
    %389 = arith.addf %387, %388 : vector<8x32xf32>
    %390 = math.tanh %389 : vector<8x32xf32>
    %391 = arith.mulf %386, %390 : vector<8x32xf32>
    %392 = vector.extract_strided_slice %214 {offsets = [48, 0], sizes = [8, 128], strides = [1, 1]} : vector<64x128xf32> to vector<8x128xf32>
    %393 = arith.truncf %391 : vector<8x32xf32> to vector<8x32xbf16>
    %cst_122 = arith.constant dense<0.000000e+00> : vector<8x128xf32>
    %394 = tpu.matmul %393, %215, %cst_122 {dimension_numbers = #tpu.dot_dimension_numbers<[1], [0], [0], [1], [0, 0, 1, 1], [], []>} : vector<8x32xbf16>, vector<32x128xbf16>, vector<8x128xf32> -> vector<8x128xf32>
    %395 = arith.addf %392, %394 : vector<8x128xf32>
    %396 = vector.extract_strided_slice %395 {offsets = [0, 0], sizes = [8, 32], strides = [1, 1]} : vector<8x128xf32> to vector<8x32xf32>
    %397 = arith.negf %396 : vector<8x32xf32>
    %398 = math.exp %397 : vector<8x32xf32>
    %cst_123 = arith.constant 1.000000e+00 : f32
    %399 = vector.broadcast %cst_123 : f32 to vector<8x32xf32>
    %400 = arith.addf %399, %398 : vector<8x32xf32>
    %401 = arith.divf %399, %400 : vector<8x32xf32>
    %402 = vector.extract_strided_slice %395 {offsets = [0, 32], sizes = [8, 32], strides = [1, 1]} : vector<8x128xf32> to vector<8x32xf32>
    %403 = arith.negf %402 : vector<8x32xf32>
    %404 = math.exp %403 : vector<8x32xf32>
    %cst_124 = arith.constant 1.000000e+00 : f32
    %405 = vector.broadcast %cst_124 : f32 to vector<8x32xf32>
    %406 = arith.addf %405, %404 : vector<8x32xf32>
    %407 = arith.divf %405, %406 : vector<8x32xf32>
    %408 = vector.extract_strided_slice %395 {offsets = [0, 64], sizes = [8, 32], strides = [1, 1]} : vector<8x128xf32> to vector<8x32xf32>
    %409 = math.tanh %408 : vector<8x32xf32>
    %410 = vector.extract_strided_slice %395 {offsets = [0, 96], sizes = [8, 32], strides = [1, 1]} : vector<8x128xf32> to vector<8x32xf32>
    %411 = arith.negf %410 : vector<8x32xf32>
    %412 = math.exp %411 : vector<8x32xf32>
    %cst_125 = arith.constant 1.000000e+00 : f32
    %413 = vector.broadcast %cst_125 : f32 to vector<8x32xf32>
    %414 = arith.addf %413, %412 : vector<8x32xf32>
    %415 = arith.divf %413, %414 : vector<8x32xf32>
    %416 = arith.mulf %407, %389 : vector<8x32xf32>
    %417 = arith.mulf %401, %409 : vector<8x32xf32>
    %418 = arith.addf %416, %417 : vector<8x32xf32>
    %419 = math.tanh %418 : vector<8x32xf32>
    %420 = arith.mulf %415, %419 : vector<8x32xf32>
    %421 = vector.extract_strided_slice %214 {offsets = [56, 0], sizes = [8, 128], strides = [1, 1]} : vector<64x128xf32> to vector<8x128xf32>
    %422 = arith.truncf %420 : vector<8x32xf32> to vector<8x32xbf16>
    %cst_126 = arith.constant dense<0.000000e+00> : vector<8x128xf32>
    %423 = tpu.matmul %422, %215, %cst_126 {dimension_numbers = #tpu.dot_dimension_numbers<[1], [0], [0], [1], [0, 0, 1, 1], [], []>} : vector<8x32xbf16>, vector<32x128xbf16>, vector<8x128xf32> -> vector<8x128xf32>
    %424 = arith.addf %421, %423 : vector<8x128xf32>
    %425 = vector.extract_strided_slice %424 {offsets = [0, 0], sizes = [8, 32], strides = [1, 1]} : vector<8x128xf32> to vector<8x32xf32>
    %426 = arith.negf %425 : vector<8x32xf32>
    %427 = math.exp %426 : vector<8x32xf32>
    %cst_127 = arith.constant 1.000000e+00 : f32
    %428 = vector.broadcast %cst_127 : f32 to vector<8x32xf32>
    %429 = arith.addf %428, %427 : vector<8x32xf32>
    %430 = arith.divf %428, %429 : vector<8x32xf32>
    %431 = vector.extract_strided_slice %424 {offsets = [0, 32], sizes = [8, 32], strides = [1, 1]} : vector<8x128xf32> to vector<8x32xf32>
    %432 = arith.negf %431 : vector<8x32xf32>
    %433 = math.exp %432 : vector<8x32xf32>
    %cst_128 = arith.constant 1.000000e+00 : f32
    %434 = vector.broadcast %cst_128 : f32 to vector<8x32xf32>
    %435 = arith.addf %434, %433 : vector<8x32xf32>
    %436 = arith.divf %434, %435 : vector<8x32xf32>
    %437 = vector.extract_strided_slice %424 {offsets = [0, 64], sizes = [8, 32], strides = [1, 1]} : vector<8x128xf32> to vector<8x32xf32>
    %438 = math.tanh %437 : vector<8x32xf32>
    %439 = vector.extract_strided_slice %424 {offsets = [0, 96], sizes = [8, 32], strides = [1, 1]} : vector<8x128xf32> to vector<8x32xf32>
    %440 = arith.negf %439 : vector<8x32xf32>
    %441 = math.exp %440 : vector<8x32xf32>
    %cst_129 = arith.constant 1.000000e+00 : f32
    %442 = vector.broadcast %cst_129 : f32 to vector<8x32xf32>
    %443 = arith.addf %442, %441 : vector<8x32xf32>
    %444 = arith.divf %442, %443 : vector<8x32xf32>
    %445 = arith.mulf %436, %418 : vector<8x32xf32>
    %446 = arith.mulf %430, %438 : vector<8x32xf32>
    %447 = arith.addf %445, %446 : vector<8x32xf32>
    %448 = math.tanh %447 : vector<8x32xf32>
    %449 = arith.mulf %444, %448 : vector<8x32xf32>
    %450 = arith.negf %449 : vector<8x32xf32>
    %451 = math.exp %450 : vector<8x32xf32>
    %cst_130 = arith.constant 1.000000e+00 : f32
    %452 = vector.broadcast %cst_130 : f32 to vector<8x32xf32>
    %453 = arith.addf %452, %451 : vector<8x32xf32>
    %454 = arith.divf %452, %453 : vector<8x32xf32>
    %455 = arith.mulf %449, %454 : vector<8x32xf32>
    %456 = arith.truncf %455 : vector<8x32xf32> to vector<8x32xbf16>
    %c416 = arith.constant 416 : index
    %c0_131 = arith.constant 0 : index
    %457 = vector.load %arg2[%c416, %c0_131] : memref<544x128xbf16, #tpu.memory_space<vmem>>, vector<32x96xbf16>
    %cst_132 = arith.constant dense<0.000000e+00> : vector<8x96xf32>
    %458 = tpu.matmul %456, %457, %cst_132 {dimension_numbers = #tpu.dot_dimension_numbers<[1], [0], [0], [1], [0, 0, 1, 1], [], []>} : vector<8x32xbf16>, vector<32x96xbf16>, vector<8x96xf32> -> vector<8x96xf32>
    %c5 = arith.constant 5 : index
    %c0_133 = arith.constant 0 : index
    %459 = vector.load %arg3[%c5, %c0_133] : memref<8x128xf32, #tpu.memory_space<vmem>>, vector<1x96xf32>
    %460 = vector.broadcast %459 : vector<1x96xf32> to vector<8x96xf32>
    %461 = arith.addf %458, %460 : vector<8x96xf32>
    %462 = vector.extract_strided_slice %461 {offsets = [0, 0], sizes = [8, 32], strides = [1, 1]} : vector<8x96xf32> to vector<8x32xf32>
    %463 = arith.negf %462 : vector<8x32xf32>
    %464 = math.exp %463 : vector<8x32xf32>
    %cst_134 = arith.constant 1.000000e+00 : f32
    %465 = vector.broadcast %cst_134 : f32 to vector<8x32xf32>
    %466 = arith.addf %465, %464 : vector<8x32xf32>
    %467 = arith.divf %465, %466 : vector<8x32xf32>
    %468 = vector.extract_strided_slice %461 {offsets = [0, 32], sizes = [8, 32], strides = [1, 1]} : vector<8x96xf32> to vector<8x32xf32>
    %469 = math.tanh %468 : vector<8x32xf32>
    %470 = vector.extract_strided_slice %461 {offsets = [0, 64], sizes = [8, 32], strides = [1, 1]} : vector<8x96xf32> to vector<8x32xf32>
    %471 = arith.negf %470 : vector<8x32xf32>
    %472 = math.exp %471 : vector<8x32xf32>
    %cst_135 = arith.constant 1.000000e+00 : f32
    %473 = vector.broadcast %cst_135 : f32 to vector<8x32xf32>
    %474 = arith.addf %473, %472 : vector<8x32xf32>
    %475 = arith.divf %473, %474 : vector<8x32xf32>
    %476 = arith.mulf %467, %469 : vector<8x32xf32>
    %477 = math.tanh %476 : vector<8x32xf32>
    %478 = arith.mulf %475, %477 : vector<8x32xf32>
    %479 = arith.negf %478 : vector<8x32xf32>
    %480 = math.exp %479 : vector<8x32xf32>
    %cst_136 = arith.constant 1.000000e+00 : f32
    %481 = vector.broadcast %cst_136 : f32 to vector<8x32xf32>
    %482 = arith.addf %481, %480 : vector<8x32xf32>
    %483 = arith.divf %481, %482 : vector<8x32xf32>
    %484 = arith.mulf %478, %483 : vector<8x32xf32>
    %485 = arith.truncf %484 : vector<8x32xf32> to vector<8x32xbf16>
    %c448 = arith.constant 448 : index
    %c0_137 = arith.constant 0 : index
    %486 = vector.load %arg2[%c448, %c0_137] : memref<544x128xbf16, #tpu.memory_space<vmem>>, vector<32x64xbf16>
    %cst_138 = arith.constant dense<0.000000e+00> : vector<8x64xf32>
    %487 = tpu.matmul %485, %486, %cst_138 {dimension_numbers = #tpu.dot_dimension_numbers<[1], [0], [0], [1], [0, 0, 1, 1], [], []>} : vector<8x32xbf16>, vector<32x64xbf16>, vector<8x64xf32> -> vector<8x64xf32>
    %c6 = arith.constant 6 : index
    %c0_139 = arith.constant 0 : index
    %488 = vector.load %arg3[%c6, %c0_139] : memref<8x128xf32, #tpu.memory_space<vmem>>, vector<1x64xf32>
    %489 = vector.broadcast %488 : vector<1x64xf32> to vector<8x64xf32>
    %490 = arith.addf %487, %489 : vector<8x64xf32>
    %491 = math.tanh %490 : vector<8x64xf32>
    %492 = arith.truncf %491 : vector<8x64xf32> to vector<8x64xbf16>
    %c480 = arith.constant 480 : index
    %c0_140 = arith.constant 0 : index
    %493 = vector.load %arg2[%c480, %c0_140] : memref<544x128xbf16, #tpu.memory_space<vmem>>, vector<64x8xbf16>
    %cst_141 = arith.constant dense<0.000000e+00> : vector<8x8xf32>
    %494 = tpu.matmul %492, %493, %cst_141 {dimension_numbers = #tpu.dot_dimension_numbers<[1], [0], [0], [1], [0, 0, 1, 1], [], []>} : vector<8x64xbf16>, vector<64x8xbf16>, vector<8x8xf32> -> vector<8x8xf32>
    %c7 = arith.constant 7 : index
    %c0_142 = arith.constant 0 : index
    %495 = vector.load %arg3[%c7, %c0_142] : memref<8x128xf32, #tpu.memory_space<vmem>>, vector<1x8xf32>
    %496 = vector.broadcast %495 : vector<1x8xf32> to vector<8x8xf32>
    %497 = arith.addf %494, %496 : vector<8x8xf32>
    %c0_143 = arith.constant 0 : index
    %c0_144 = arith.constant 0 : index
    %c0_145 = arith.constant 0 : index
    %498 = vector.load %arg4[%c0_143, %c0_144, %c0_145] : memref<1x8x8xf32, #tpu.memory_space<vmem>>, vector<1x8x8xf32>
    %499 = vector.shape_cast %498 : vector<1x8x8xf32> to vector<8x8xf32>
    %500 = vector.shape_cast %497 : vector<8x8xf32> to vector<1x8x8xf32>
    tpu.vector_store %arg4[%c0_143, %c0_144, %c0_145], %500 {strides = array<i32>} : memref<1x8x8xf32, #tpu.memory_space<vmem>>, vector<1x8x8xf32>,
    return
  }
  func.func @transform_0(%arg0: i32) -> (i32, i32, i32) {
    %c0_i32 = arith.constant 0 : i32
    %c0_i32_0 = arith.constant 0 : i32
    %c0_i32_1 = arith.constant 0 : i32
    return %arg0, %c0_i32, %c0_i32_0 : i32, i32, i32
  }
  func.func @transform_1(%arg0: i32) -> (i32, i32) {
    %c0_i32 = arith.constant 0 : i32
    %c0_i32_0 = arith.constant 0 : i32
    %c0_i32_1 = arith.constant 0 : i32
    return %c0_i32, %c0_i32_0 : i32, i32
  }
  func.func @transform_2(%arg0: i32) -> (i32, i32) {
    %c0_i32 = arith.constant 0 : i32
    %c0_i32_0 = arith.constant 0 : i32
    %c0_i32_1 = arith.constant 0 : i32
    return %c0_i32, %c0_i32_0 : i32, i32
  }
  func.func @transform_3(%arg0: i32) -> (i32, i32, i32) {
    %c0_i32 = arith.constant 0 : i32
    %c0_i32_0 = arith.constant 0 : i32
    %c0_i32_1 = arith.constant 0 : i32
    return %arg0, %c0_i32, %c0_i32_0 : i32, i32, i32
  }
}

</mosaic_0001>

<bundles_post_ra>
// kernel: _lambda_.1
= control target key start
LH: loop header
LB: loop body
LE: loop exit
PB: predicated region body
PF: predicated region fallthrough
CT: control target
= control target key end

     0   :  { %s5593_s12 = smov 0   ;;  %s7824_s0 = inlined_call_operand.vmem [shape: f32[2,128,8], index: 0, kind: input, shape index: {}]   ;;  %s7825_s1 = inlined_call_operand.vmem [shape: bf16[544,128], index: 1, kind: input, shape index: {}]   ;;  %s7826_s2 = inlined_call_operand.vmem [shape: f32[8,128], index: 2, kind: input, shape index: {}]   ;;  %s7827_s3 = inlined_call_operand.vmem [shape: f32[2,8,8], index: 3, kind: output, shape index: {}]  }
   0x1 LB: > { %s4684_s13 = sadd.s32 4294967295, %s5565_s12   ;;  %p4688_p0 = scmp.ge.s32.totalorder %s5565_s12, 1  ;;  %s5565_s12 = sphi %s5593_s12, %s13_s12  }
   0x2   : > { %p137_p1 = scmp.lt.s32.totalorder %s5565_s12, 3 }
   0x4   : > { %p138_p2 = pnand %p4688_p0, %p137_p1 }
   0x6   : > { %141 = sbr.rel (%p138_p2) target bundleno = 6804 (0x1a94), region = 32 }
   0xb   : > { %v194_v0 = vld [vmem:[%s7825_s1] sm:$0xf]  ;;  %vm222_vm0 = vcmask 1043456   ;;  %p160_p3 = scmp.lt.s32.totalorder %s4684_s13, 1  ;;  %vm197_vm1 = vcmask 64512   ;;  %vm651_vm2 = vcmask 1041408  }
   0xc   : > { %v224_v1 = vsel %vm222_vm0, %v194_v0, 0  ;;  %v5639_v26 = vld [vmem:[%s7826_s2] ss:$0 sm:$0xff]  ;;  %v602_v30 = vld [vmem:[%s7825_s1 + $0x8] sm:$0x3]  ;;  %vm629_vm11 = vcmask 31744  }
   0xd   : > { %233 = vmatpush.bf16.msra.mxu0 %v224_v1  ;;  %s7953_s13 = smov (!%p160_p3, %s4684_s13), 1  ;;  %v5649_v32 = vsel %vm651_vm2, %v602_v30, 0  ;;  %s5567_s24 = smov 120  }
   0xe   : > { %s5108_s16 = sshll.u32 %s7953_s13, 7  ;;  %730 = vmatpush.bf16.msra.mxu2 %v5649_v32  ;;  %s5568_s25 = smov 124  }
   0xf   : > { %s5610_s19 = scalar_lea.vmem %s7824_s0, %s5108_s16  ;;  %s5571_s20 = smov 32  }
  0x10   : > { %v170_v2 = vld [vmem:[%s5610_s19] sm:$0xff]  ;;  %v171_v3 = vld [vmem:[%s5610_s19 + $0x8] sm:$0xff]  ;;  %v172_v5 = vld [vmem:[%s5610_s19 + $0x10] sm:$0xff]  ;;  %s5572_s27 = smov 96   ;;  %s4691_s17 = sshll.u32 %s7953_s13, 3 }
  0x11   : > { %v186_v4 = vpack.c.bf16 %v171_v3, %v170_v2  ;;  %v173_v6 = vld [vmem:[%s5610_s19 + $0x18] sm:$0xff]  ;;  %v174_v8 = vld [vmem:[%s5610_s19 + $0x20] sm:$0xff]  ;;  %v175_v9 = vld [vmem:[%s5610_s19 + $0x28] sm:$0xff]  ;;  %1409 = vmatpush.bf16.msrb.mxu0 %v5649_v32  ;;  %s168_s22 = scalar_lea.vmem %s7827_s3, %s4691_s17 }
  0x12   : > { %v187_v7 = vpack.c.bf16 %v173_v6, %v172_v5  ;;  %v188_v10 = vpack.c.bf16 %v175_v9, %v174_v8  ;;  %v176_v11 = vld [vmem:[%s5610_s19 + $0x30] sm:$0xff]  ;;  %v177_v12 = vld [vmem:[%s5610_s19 + $0x38] sm:$0xff]  ;;  %v178_v14 = vld [vmem:[%s5610_s19 + $0x40] sm:$0xff] }
  0x13   : > { %4692 = vmatmul.msk.bf16.vlgmr.msra.gmra.mxu0 %vm197_vm1, %v186_v4  ;;  %v189_v13 = vpack.c.bf16 %v177_v12, %v176_v11  ;;  %v179_v15 = vld [vmem:[%s5610_s19 + $0x48] sm:$0xff]  ;;  %v180_v17 = vld [vmem:[%s5610_s19 + $0x50] sm:$0xff]  ;;  %v181_v18 = vld [vmem:[%s5610_s19 + $0x58] sm:$0xff] }
  0x14   : > { %v190_v16 = vpack.c.bf16 %v179_v15, %v178_v14  ;;  %v191_v19 = vpack.c.bf16 %v181_v18, %v180_v17  ;;  %v182_v20 = vld [vmem:[%s5610_s19 + $0x60] sm:$0xff]  ;;  %v183_v21 = vld [vmem:[%s5610_s19 + $0x68] sm:$0xff]  ;;  %v184_v23 = vld [vmem:[%s5610_s19 + $0x70] sm:$0xff] }
  0x15   : > { %v192_v22 = vpack.c.bf16 %v183_v21, %v182_v20  ;;  %v185_v24 = vld [vmem:[%s5610_s19 + $0x78] sm:$0xff]  ;;  %s5570_s19 = smov 64  }
  0x16   : > { %v193_v25 = vpack.c.bf16 %v185_v24, %v184_v23 }
  0x23   : > { %4693 = vmatmul.msk.bf16.gmra.mxu0 %vm197_vm1, %v187_v7 }
  0x33   : > { %4694 = vmatmul.msk.bf16.gmra.mxu0 %vm197_vm1, %v188_v10 }
  0x43   : > { %4695 = vmatmul.msk.bf16.gmra.mxu0 %vm197_vm1, %v189_v13 }
  0x53   : > { %4696 = vmatmul.msk.bf16.gmra.mxu0 %vm197_vm1, %v190_v16 }
  0x63   : > { %4697 = vmatmul.msk.bf16.gmra.mxu0 %vm197_vm1, %v191_v19 }
  0x73   : > { %4698 = vmatmul.msk.bf16.gmra.mxu0 %vm197_vm1, %v192_v22 }
  0x83   : > { %4699 = vmatmul.msk.bf16.gmra.mxu0 %vm197_vm1, %v193_v25 }
  0x90   : > { %v235_v27 = vpop.f32.mrf.mxu0 }
  0x91   : > { %v5642_v28 = vadd.f32 %v5639_v26, %v235_v27 }
  0x93   : > { %v4700_v29 = vmul.f32 -1.442695, %v5642_v28 }
  0x95   : > { %5162 = vpow2.f32 %v4700_v29 }
  0x98   : > { %v237_v31 = vpop.f32.mrf.mxu0 }
  0x99   : > { %v238_v33 = vadd.f32 %v5639_v26, %v237_v31 }
  0x9b   : > { %v5163_v34 = vpop.eup %5162  ;;  %v4701_v35 = vmul.f32 -1.442695, %v238_v33 }
  0x9c   : > { %v323_v36 = vadd.f32 1.0, %v5163_v34 }
  0x9d   : > { %5164 = vpow2.f32 %v4701_v35 }
  0x9e   : > { %5166 = vrcp.f32 %v323_v36  ;;  %v350_v54 = vand.u32 2147483648, %v323_v36  ;;  %vm344_vm4 = vweird.f32 %v323_v36  ;;  %v348_v55 = vand.u32 2147483647, %v323_v36 }
  0xa0   : > { %v240_v37 = vpop.f32.mrf.mxu0  ;;  %v351_v0 = vor.u32 1.1754944e-38, %v350_v54  ;;  %vm349_vm7 = vcmp.eq.f32.partialorder %v348_v55, 8.507059e+37 }
  0xa1   : > { %v5655_v38 = vadd.f32 %v5639_v26, %v240_v37 }
  0xa3   : > { %v5165_v39 = vpop.eup %5164  ;;  %v4702_v40 = vmul.f32 -1.442695, %v5655_v38 }
  0xa4   : > { %v5167_v41 = vpop.eup %5166  ;;  %v324_v42 = vadd.f32 1.0, %v5165_v39 }
  0xa5   : > { %v340_v43 = vmul.f32 %v5167_v41, %v323_v36  ;;  %5168 = vpow2.f32 %v4702_v40  ;;  %vm345_vm3 = vweird.f32 %v5167_v41 }
  0xa6   : > { %5170 = vrcp.f32 %v324_v42  ;;  %vm5662_vm5 = vmor %vm344_vm4, %vm345_vm3  ;;  %v363_v58 = vand.u32 2147483647, %v324_v42  ;;  %v365_v59 = vand.u32 2147483648, %v324_v42  ;;  %vm359_vm8 = vweird.f32 %v324_v42 }
  0xa7   : > { %v341_v44 = vsub.f32 1.0, %v340_v43 }
  0xa8   : > { %v242_v45 = vpop.f32.mrf.mxu0  ;;  %v366_v6 = vor.u32 1.1754944e-38, %v365_v59  ;;  %vm364_vm10 = vcmp.eq.f32.partialorder %v363_v58, 8.507059e+37 }
  0xa9   : > { %v342_v46 = vmul.f32 %v5167_v41, %v341_v44  ;;  %v5659_v47 = vadd.f32 %v5639_v26, %v242_v45 }
  0xab   : > { %v5169_v48 = vpop.eup %5168  ;;  %v4703_v49 = vmul.f32 -1.442695, %v5659_v47  ;;  %v343_v52 = vadd.f32 %v5167_v41, %v342_v46 }
  0xac   : > { %v5171_v50 = vpop.eup %5170  ;;  %v325_v51 = vadd.f32 1.0, %v5169_v48 }
  0xad   : > { %v355_v53 = vmul.f32 %v5171_v50, %v324_v42  ;;  %5172 = vpow2.f32 %v4703_v49  ;;  %v347_v61 = vsel %vm5662_vm5, %v5167_v41, %v343_v52  ;;  %vm360_vm6 = vweird.f32 %v5171_v50 }
  0xae   : > { %5174 = vrcp.f32 %v325_v51  ;;  %v352_v5 = vsel %vm349_vm7, %v351_v0, %v347_v61  ;;  %vm361_vm9 = vmor %vm359_vm8, %vm360_vm6  ;;  %v378_v14 = vand.u32 2147483647, %v325_v51  ;;  %v380_v15 = vand.u32 2147483648, %v325_v51 }
  0xaf   : > { %v356_v56 = vsub.f32 1.0, %v355_v53  ;;  %v579_v11 = vmul.f32 %v352_v5, %v5642_v28  ;;  %vm374_vm13 = vweird.f32 %v325_v51 }
  0xb0   : > { %v245_v60 = vpop.f32.mrf.mxu0  ;;  %v381_v24 = vor.u32 1.1754944e-38, %v380_v15  ;;  %vm379_vm15 = vcmp.eq.f32.partialorder %v378_v14, 8.507059e+37 }
  0xb1   : > { %v357_v62 = vmul.f32 %v5171_v50, %v356_v56  ;;  %v5669_v63 = vadd.f32 %v5639_v26, %v245_v60 }
  0xb3   : > { %v5173_v1 = vpop.eup %5172  ;;  %v358_v2 = vadd.f32 %v5171_v50, %v357_v62  ;;  %v4704_v3 = vmul.f32 -1.442695, %v5669_v63 }
  0xb4   : > { %v5175_v4 = vpop.eup %5174  ;;  %v326_v7 = vadd.f32 1.0, %v5173_v1 }
  0xb5   : > { %v362_v8 = vsel %vm361_vm9, %v5171_v50, %v358_v2  ;;  %v370_v9 = vmul.f32 %v5175_v4, %v325_v51  ;;  %5176 = vpow2.f32 %v4704_v3  ;;  %vm375_vm12 = vweird.f32 %v5175_v4 }
  0xb6   : > { %v367_v10 = vsel %vm364_vm10, %v366_v6, %v362_v8  ;;  %5178 = vrcp.f32 %v326_v7  ;;  %vm376_vm14 = vmor %vm374_vm13, %vm375_vm12  ;;  %v395_v34 = vand.u32 2147483648, %v326_v7  ;;  %vm389_vm3 = vweird.f32 %v326_v7 }
  0xb7   : > { %v580_v12 = vmul.f32 %v367_v10, %v238_v33  ;;  %v371_v13 = vsub.f32 1.0, %v370_v9  ;;  %v393_v33 = vand.u32 2147483647, %v326_v7 }
  0xb8   : > { %v247_v16 = vpop.f32.mrf.mxu0  ;;  %v396_v44 = vor.u32 1.1754944e-38, %v395_v34 }
  0xb9   : > { %v372_v17 = vmul.f32 %v5175_v4, %v371_v13  ;;  %v5674_v18 = vadd.f32 %v5639_v26, %v247_v16  ;;  %v595_v19 = vpack.c.bf16 %v580_v12, %v579_v11  ;;  %vm394_vm5 = vcmp.eq.f32.partialorder %v393_v33, 8.507059e+37 }
  0xbb   : > { %v5177_v20 = vpop.eup %5176  ;;  %v373_v21 = vadd.f32 %v5175_v4, %v372_v17  ;;  %v4705_v22 = vmul.f32 -1.442695, %v5674_v18  ;;  %768 = vrot.lane.b32.xlu1 %v595_v19, %s5567_s24  ;;  %611 = vrot.lane.b32.xlu0 %v595_v19, %s5568_s25 }
  0xbc   : > { %v5179_v23 = vpop.eup %5178  ;;  %v327_v25 = vadd.f32 1.0, %v5177_v20  ;;  %4723 = vmatmul.msk.bf16.vlgmr.msra.gmra.mxu2 %vm629_vm11, %v595_v19 }
  0xbd   : > { %v377_v27 = vsel %vm376_vm14, %v5175_v4, %v373_v21  ;;  %v385_v28 = vmul.f32 %v5179_v23, %v326_v7  ;;  %5180 = vpow2.f32 %v4705_v22  ;;  %vm390_vm0 = vweird.f32 %v5179_v23 }
  0xbe   : > { %v382_v29 = vsel %vm379_vm15, %v381_v24, %v377_v27  ;;  %5182 = vrcp.f32 %v327_v25  ;;  %vm391_vm4 = vmor %vm389_vm3, %vm390_vm0  ;;  %v408_v51 = vand.u32 2147483647, %v327_v25  ;;  %v410_v52 = vand.u32 2147483648, %v327_v25 }
  0xbf   : > { %v581_v30 = vmul.f32 %v382_v29, %v5655_v38  ;;  %v386_v31 = vsub.f32 1.0, %v385_v28  ;;  %vm404_vm7 = vweird.f32 %v327_v25 }
  0xc0   : > { %v250_v35 = vpop.f32.mrf.mxu0  ;;  %v411_v60 = vor.u32 1.1754944e-38, %v410_v52  ;;  %vm409_vm9 = vcmp.eq.f32.partialorder %v408_v51, 8.507059e+37 }
  0xc1   : > { %v5681_v36 = vpack.c.bf16 %v581_v30, %v580_v12  ;;  %v387_v37 = vmul.f32 %v5179_v23, %v386_v31  ;;  %v5684_v39 = vadd.f32 %v5639_v26, %v250_v35 }
  0xc3   : > { %v5181_v40 = vpop.eup %5180  ;;  %v388_v41 = vadd.f32 %v5179_v23, %v387_v37  ;;  %v4706_v42 = vmul.f32 -1.442695, %v5684_v39 }
  0xc4   : > { %v5183_v43 = vpop.eup %5182  ;;  %v328_v38 = vadd.f32 1.0, %v5181_v40 }
  0xc5   : > { %v392_v45 = vsel %vm391_vm4, %v5179_v23, %v388_v41  ;;  %v400_v46 = vmul.f32 %v5183_v43, %v327_v25  ;;  %5184 = vpow2.f32 %v4706_v42  ;;  %vm405_vm6 = vweird.f32 %v5183_v43 }
  0xc6   : > { %v397_v48 = vsel %vm394_vm5, %v396_v44, %v392_v45  ;;  %5186 = vrcp.f32 %v328_v38  ;;  %vm406_vm8 = vmor %vm404_vm7, %vm405_vm6  ;;  %v423_v4 = vand.u32 2147483647, %v328_v38  ;;  %v425_v5 = vand.u32 2147483648, %v328_v38 }
  0xc7   : > { %v582_v49 = vmul.f32 %v397_v48, %v5659_v47  ;;  %v401_v50 = vsub.f32 1.0, %v400_v46  ;;  %vm419_vm12 = vweird.f32 %v328_v38 }
  0xc8   : > { %v252_v53 = vpop.f32.mrf.mxu0  ;;  %v426_v14 = vor.u32 1.1754944e-38, %v425_v5  ;;  %vm424_vm14 = vcmp.eq.f32.partialorder %v423_v4, 8.507059e+37 }
  0xc9   : > { %v5688_v54 = vpack.c.bf16 %v582_v49, %v581_v30  ;;  %v402_v55 = vmul.f32 %v5183_v43, %v401_v50  ;;  %v5691_v56 = vadd.f32 %v5639_v26, %v252_v53 }
  0xcb   : > { %v5185_v57 = vpop.eup %5184  ;;  %v403_v58 = vadd.f32 %v5183_v43, %v402_v55  ;;  %v4707_v59 = vmul.f32 -1.442695, %v5691_v56  ;;  %770 = vrot.lane.b32.xlu2 %v5688_v54, %s5567_s24  ;;  %613 = vrot.lane.b32.xlu0 %v5688_v54, %s5568_s25 }
  0xcc   : > { %v5187_v47 = vpop.eup %5186  ;;  %v5698_v61 = vadd.f32 1.0, %v5185_v57  ;;  %4724 = vmatmul.msk.bf16.gmra.mxu2 %vm629_vm11, %v5688_v54 }
  0xcd   : > { %v407_v62 = vsel %vm406_vm8, %v5183_v43, %v403_v58  ;;  %v415_v0 = vmul.f32 %v5187_v47, %v328_v38  ;;  %5188 = vpow2.f32 %v4707_v59  ;;  %vm420_vm10 = vweird.f32 %v5187_v47 }
  0xce   : > { %v412_v1 = vsel %vm409_vm9, %v411_v60, %v407_v62  ;;  %5190 = vrcp.f32 %v5698_v61  ;;  %vm421_vm13 = vmor %vm419_vm12, %vm420_vm10  ;;  %v440_v31 = vand.u32 2147483648, %v5698_v61  ;;  %vm434_vm0 = vweird.f32 %v5698_v61 }
  0xcf   : > { %v583_v2 = vmul.f32 %v412_v1, %v5669_v63  ;;  %v416_v3 = vsub.f32 1.0, %v415_v0  ;;  %v438_v33 = vand.u32 2147483647, %v5698_v61 }
  0xd0   : > { %v255_v6 = vpop.f32.mrf.mxu0  ;;  %v441_v38 = vor.u32 1.1754944e-38, %v440_v31 }
  0xd1   : > { %v5704_v7 = vpack.c.bf16 %v583_v2, %v582_v49  ;;  %v417_v8 = vmul.f32 %v5187_v47, %v416_v3  ;;  %v5707_v9 = vadd.f32 %v5639_v26, %v255_v6  ;;  %vm439_vm5 = vcmp.eq.f32.partialorder %v438_v33, 8.507059e+37 }
  0xd3   : > { %v5189_v10 = vpop.eup %5188  ;;  %v418_v11 = vadd.f32 %v5187_v47, %v417_v8  ;;  %v4708_v12 = vmul.f32 -1.442695, %v5707_v9 }
  0xd4   : > { %v5191_v13 = vpop.eup %5190  ;;  %v330_v63 = vadd.f32 1.0, %v5189_v10 }
  0xd5   : > { %v422_v15 = vsel %vm421_vm13, %v5187_v47, %v418_v11  ;;  %v430_v16 = vmul.f32 %v5191_v13, %v5698_v61  ;;  %5192 = vpow2.f32 %v4708_v12  ;;  %vm435_vm15 = vweird.f32 %v5191_v13 }
  0xd6   : > { %v427_v17 = vsel %vm424_vm14, %v426_v14, %v422_v15  ;;  %5194 = vrcp.f32 %v330_v63  ;;  %vm5733_vm3 = vmor %vm434_vm0, %vm435_vm15  ;;  %v453_v37 = vand.u32 2147483647, %v330_v63  ;;  %v455_v40 = vand.u32 2147483648, %v330_v63 }
  0xd7   : > { %v5712_v19 = vmul.f32 %v427_v17, %v5674_v18  ;;  %v431_v20 = vsub.f32 1.0, %v430_v16  ;;  %vm449_vm6 = vweird.f32 %v330_v63 }
  0xd8   : > { %v257_v21 = vpop.f32.mrf.mxu0  ;;  %v456_v51 = vor.u32 1.1754944e-38, %v455_v40  ;;  %vm454_vm8 = vcmp.eq.f32.partialorder %v453_v37, 8.507059e+37 }
  0xd9   : > { %v5715_v22 = vpack.c.bf16 %v5712_v19, %v583_v2  ;;  %v432_v23 = vmul.f32 %v5191_v13, %v431_v20  ;;  %v5718_v24 = vadd.f32 %v5639_v26, %v257_v21 }
  0xdb   : > { %v5193_v25 = vpop.eup %5192  ;;  %v4709_v27 = vmul.f32 -1.442695, %v5718_v24  ;;  %615 = vrot.lane.b32.xlu1 %v5715_v22, %s5568_s25  ;;  %772 = vrot.lane.b32.xlu0 %v5715_v22, %s5567_s24  ;;  %v433_v29 = vadd.f32 %v5191_v13, %v432_v23 }
  0xdc   : > { %v5195_v18 = vpop.eup %5194  ;;  %v5725_v28 = vadd.f32 1.0, %v5193_v25  ;;  %4725 = vmatmul.msk.bf16.gmra.mxu2 %vm629_vm11, %v5715_v22 }
  0xdd   : > { %v445_v30 = vmul.f32 %v5195_v18, %v330_v63  ;;  %5196 = vpow2.f32 %v4709_v27  ;;  %v437_v42 = vsel %vm5733_vm3, %v5191_v13, %v433_v29  ;;  %vm450_vm4 = vweird.f32 %v5195_v18 }
  0xde   : > { %5198 = vrcp.f32 %v5725_v28  ;;  %v442_v50 = vsel %vm439_vm5, %v441_v38, %v437_v42  ;;  %vm451_vm7 = vmor %vm449_vm6, %vm450_vm4  ;;  %v470_v5 = vand.u32 2147483648, %v5725_v28  ;;  %vm464_vm10 = vweird.f32 %v5725_v28 }
  0xdf   : > { %v446_v34 = vsub.f32 1.0, %v445_v30  ;;  %v5745_v58 = vmul.f32 %v442_v50, %v5684_v39  ;;  %v468_v6 = vand.u32 2147483647, %v5725_v28 }
  0xe0   : > { %v260_v41 = vpop.f32.mrf.mxu0  ;;  %v471_v16 = vor.u32 1.1754944e-38, %v470_v5 }
  0xe1   : > { %v447_v43 = vmul.f32 %v5195_v18, %v446_v34  ;;  %v5740_v44 = vadd.f32 %v5639_v26, %v260_v41  ;;  %vm469_vm14 = vcmp.eq.f32.partialorder %v468_v6, 8.507059e+37 }
  0xe3   : > { %v5197_v45 = vpop.eup %5196  ;;  %v448_v46 = vadd.f32 %v5195_v18, %v447_v43  ;;  %v4710_v48 = vmul.f32 -1.442695, %v5740_v44 }
  0xe4   : > { %v5199_v49 = vpop.eup %5198  ;;  %v332_v52 = vadd.f32 1.0, %v5197_v45 }
  0xe5   : > { %v452_v53 = vsel %vm451_vm7, %v5195_v18, %v448_v46  ;;  %v460_v55 = vmul.f32 %v5199_v49, %v5725_v28  ;;  %5200 = vpow2.f32 %v4710_v48  ;;  %vm465_vm9 = vweird.f32 %v5199_v49 }
  0xe6   : > { %v457_v57 = vsel %vm454_vm8, %v456_v51, %v452_v53  ;;  %5202 = vrcp.f32 %v332_v52  ;;  %vm5768_vm12 = vmor %vm464_vm10, %vm465_vm9  ;;  %v483_v11 = vand.u32 2147483647, %v332_v52  ;;  %v485_v12 = vand.u32 2147483648, %v332_v52 }
  0xe7   : > { %v5748_v59 = vmul.f32 %v457_v57, %v5691_v56  ;;  %v461_v47 = vsub.f32 1.0, %v460_v55  ;;  %vm479_vm15 = vweird.f32 %v332_v52 }
  0xe8   : > { %v262_v60 = vpop.f32.mrf.mxu0  ;;  %v486_v27 = vor.u32 1.1754944e-38, %v485_v12  ;;  %vm484_vm3 = vcmp.eq.f32.partialorder %v483_v11, 8.507059e+37 }
  0xe9   : > { %v5752_v61 = vpack.c.bf16 %v5748_v59, %v5745_v58  ;;  %v462_v62 = vmul.f32 %v5199_v49, %v461_v47  ;;  %v5755_v0 = vadd.f32 %v5639_v26, %v262_v60 }
  0xeb   : > { %v5201_v1 = vpop.eup %5200  ;;  %v4711_v2 = vmul.f32 -1.442695, %v5755_v0  ;;  %617 = vrot.lane.b32.xlu2 %v5752_v61, %s5568_s25  ;;  %v463_v56 = vadd.f32 %v5199_v49, %v462_v62 }
  0xec   : > { %v5203_v39 = vpop.eup %5202  ;;  %v5760_v3 = vadd.f32 1.0, %v5201_v1  ;;  %4726 = vmatmul.msk.bf16.gmra.mxu2 %vm629_vm11, %v5752_v61 }
  0xed   : > { %v475_v4 = vmul.f32 %v5203_v39, %v332_v52  ;;  %5204 = vpow2.f32 %v4711_v2  ;;  %v467_v14 = vsel %vm5768_vm12, %v5199_v49, %v463_v56  ;;  %vm480_vm13 = vweird.f32 %v5203_v39 }
  0xee   : > { %5206 = vrcp.f32 %v5760_v3  ;;  %v472_v25 = vsel %vm469_vm14, %v471_v16, %v467_v14  ;;  %vm481_vm0 = vmor %vm479_vm15, %vm480_vm13  ;;  %v500_v46 = vand.u32 2147483648, %v5760_v3  ;;  %vm494_vm5 = vweird.f32 %v5760_v3 }
  0xef   : > { %v476_v8 = vsub.f32 1.0, %v475_v4  ;;  %v5782_v31 = vmul.f32 %v472_v25, %v5707_v9  ;;  %v498_v48 = vand.u32 2147483647, %v5760_v3 }
  0xf0   : > { %v265_v13 = vpop.f32.mrf.mxu0  ;;  %v501_v60 = vor.u32 1.1754944e-38, %v500_v46 }
  0xf1   : > { %v477_v63 = vmul.f32 %v5203_v39, %v476_v8  ;;  %v5775_v15 = vadd.f32 %v5639_v26, %v265_v13  ;;  %vm499_vm8 = vcmp.eq.f32.partialorder %v498_v48, 8.507059e+37  ;;  %v767_v8 = vld [vmem:[%s7825_s1 + $0xc] sm:$0x3] }
  0xf3   : > { %v5205_v17 = vpop.eup %5204  ;;  %v478_v20 = vadd.f32 %v5203_v39, %v477_v63  ;;  %v4712_v21 = vmul.f32 -1.442695, %v5775_v15  ;;  %774 = vrot.lane.b32.xlu2 %v5752_v61, %s5567_s24  ;;  %v5831_v63 = vsel %vm651_vm2, %v767_v8, 0 }
  0xf4   : > { %v5207_v23 = vpop.eup %5206  ;;  %v334_v18 = vadd.f32 1.0, %v5205_v17  ;;  %813 = vmatpush.bf16.msra.mxu3 %v5831_v63 }
  0xf5   : > { %v482_v28 = vsel %vm481_vm0, %v5203_v39, %v478_v20  ;;  %v490_v29 = vmul.f32 %v5207_v23, %v5760_v3  ;;  %5208 = vpow2.f32 %v4712_v21  ;;  %vm495_vm4 = vweird.f32 %v5207_v23 }
  0xf6   : > { %v487_v30 = vsel %vm484_vm3, %v486_v27, %v482_v28  ;;  %5210 = vrcp.f32 %v334_v18  ;;  %vm5805_vm6 = vmor %vm494_vm5, %vm495_vm4  ;;  %v513_v51 = vand.u32 2147483647, %v334_v18  ;;  %v515_v52 = vand.u32 2147483648, %v334_v18 }
  0xf7   : > { %v5785_v33 = vmul.f32 %v487_v30, %v5718_v24  ;;  %v491_v34 = vsub.f32 1.0, %v490_v29  ;;  %vm509_vm9 = vweird.f32 %v334_v18 }
  0xf8   : > { %v267_v35 = vpop.f32.mrf.mxu0  ;;  %v516_v56 = vor.u32 1.1754944e-38, %v515_v52  ;;  %vm514_vm12 = vcmp.eq.f32.partialorder %v513_v51, 8.507059e+37 }
  0xf9   : > { %v5789_v37 = vpack.c.bf16 %v5785_v33, %v5782_v31  ;;  %v492_v40 = vmul.f32 %v5207_v23, %v491_v34  ;;  %v5792_v41 = vadd.f32 %v5639_v26, %v267_v35  ;;  %v871_v35 = vld [vmem:[%s7825_s1 + $0xc] sm:$0xc] }
  0xfb   : > { %v5209_v42 = vpop.eup %5208  ;;  %v4713_v43 = vmul.f32 -1.442695, %v5792_v41  ;;  %619 = vrot.lane.b32.xlu1 %v5789_v37, %s5568_s25  ;;  %v493_v24 = vadd.f32 %v5207_v23, %v492_v40 }
  0xfc   : > { %v5211_v9 = vpop.eup %5210  ;;  %v5797_v38 = vadd.f32 1.0, %v5209_v42  ;;  %4727 = vmatmul.msk.bf16.gmra.mxu2 %vm629_vm11, %v5789_v37 }
  0xfd   : > { %v505_v45 = vmul.f32 %v5211_v9, %v334_v18  ;;  %5212 = vpow2.f32 %v4713_v43  ;;  %v497_v55 = vsel %vm5805_vm6, %v5207_v23, %v493_v24  ;;  %vm510_vm7 = vweird.f32 %v5211_v9 }
  0xfe   : > { %5214 = vrcp.f32 %v5797_v38  ;;  %v502_v3 = vsel %vm499_vm8, %v501_v60, %v497_v55  ;;  %vm511_vm10 = vmor %vm509_vm9, %vm510_vm7  ;;  %vm524_vm13 = vweird.f32 %v5797_v38  ;;  %v530_v23 = vand.u32 2147483648, %v5797_v38 }
  0xff   : > { %v506_v49 = vsub.f32 1.0, %v505_v45  ;;  %v5825_v11 = vmul.f32 %v502_v3, %v5740_v44  ;;  %v528_v18 = vand.u32 2147483647, %v5797_v38  ;;  %v873_v43 = vunpack.c.l.b16 %v871_v35 }
 0x100   : > { %v270_v53 = vpop.f32.mrf.mxu0  ;;  %v5884_v3 = vpack.c.bf16 %v5745_v58, %v5712_v19 }
 0x101   : > { %v507_v57 = vmul.f32 %v5211_v9, %v506_v49  ;;  %v5812_v47 = vadd.f32 %v5639_v26, %v270_v53  ;;  %v603_v26 = vld [vmem:[%s7825_s1 + $0x8] sm:$0xc]  ;;  %vm529_vm4 = vcmp.eq.f32.partialorder %v528_v18, 8.507059e+37  ;;  %v874_v45 = vpack.c.b16 %v873_v43, %v873_v43 }
 0x102   : > { %v626_v14 = vunpack.c.l.b16 %v603_v26 }
 0x103   : > { %v5213_v62 = vpop.eup %5212  ;;  %v508_v1 = vadd.f32 %v5211_v9, %v507_v57  ;;  %v4714_v2 = vmul.f32 -1.442695, %v5812_v47  ;;  %776 = vrot.lane.b32.xlu1 %v5789_v37, %s5567_s24  ;;  %v875_v49 = vrot.slane %v874_v45, 2 }
 0x104   : > { %v5215_v39 = vpop.eup %5214  ;;  %v336_v4 = vadd.f32 1.0, %v5213_v62  ;;  %v627_v20 = vpack.c.b16 %v626_v14, %v626_v14 }
 0x105   : > { %v512_v5 = vsel %vm511_vm10, %v5211_v9, %v508_v1  ;;  %v520_v6 = vmul.f32 %v5215_v39, %v5797_v38  ;;  %5216 = vpow2.f32 %v4714_v2  ;;  %vm525_vm14 = vweird.f32 %v5215_v39 }
 0x106   : > { %v517_v10 = vsel %vm514_vm12, %v516_v56, %v512_v5  ;;  %5218 = vrcp.f32 %v336_v4  ;;  %v628_v44 = vrot.slane %v627_v20, 2  ;;  %vm5848_vm15 = vmor %vm524_vm13, %vm525_vm14  ;;  %vm539_vm0 = vweird.f32 %v336_v4 }
 0x107   : > { %v5828_v12 = vmul.f32 %v517_v10, %v5755_v0  ;;  %v521_v13 = vsub.f32 1.0, %v520_v6  ;;  %v545_v34 = vand.u32 2147483648, %v336_v4  ;;  %v543_v42 = vand.u32 2147483647, %v336_v4 }
 0x108   : > { %v653_v29 = vsel %vm651_vm2, %v628_v44, 0  ;;  %v531_v9 = vor.u32 1.1754944e-38, %v530_v23  ;;  %v5862_v53 = vsel %vm651_vm2, %v875_v49, 0  ;;  %v5889_v56 = vpack.c.bf16 %v5825_v11, %v5785_v33 }
 0x109   : > { %v5835_v16 = vpack.c.bf16 %v5828_v12, %v5825_v11  ;;  %v522_v17 = vmul.f32 %v5215_v39, %v521_v13  ;;  %662 = vmatpush.bf16.msra.mxu1 %v653_v29  ;;  %1365 = vmatpush.bf16.msrb.mxu3 %v653_v29  ;;  %v546_v46 = vor.u32 1.1754944e-38, %v545_v34  ;;  %vm544_vm6 = vcmp.eq.f32.partialorder %v543_v42, 8.507059e+37  ;;  %v5994_v42 = vpop.f32.mrf.mxu0 }
 0x10a   : > { %1956 = vmatpush.bf16.msra.mxu0 %v653_v29  ;;  %v5902_v33 = vpack.c.bf16 %v5782_v31, %v5748_v59 }
 0x10b   : > { %v5217_v21 = vpop.eup %5216  ;;  %621 = vrot.lane.b32.xlu0 %v5835_v16, %s5568_s25  ;;  %v523_v27 = vadd.f32 %v5215_v39, %v522_v17 }
 0x10c   : > { %v5219_v0 = vpop.eup %5218  ;;  %v5842_v25 = vadd.f32 1.0, %v5217_v21  ;;  %4728 = vmatmul.msk.bf16.gmra.mxu2 %vm629_vm11, %v5835_v16 }
 0x10d   : > { %v535_v28 = vmul.f32 %v5219_v0, %v336_v4  ;;  %vm540_vm3 = vweird.f32 %v5219_v0  ;;  %v527_v38 = vsel %vm5848_vm15, %v5215_v39, %v523_v27  ;;  %907 = vmatpush.bf16.msrb.mxu1 %v5862_v53 }
 0x10e   : > { %5220 = vrcp.f32 %v5842_v25  ;;  %vm541_vm5 = vmor %vm539_vm0, %vm540_vm3  ;;  %v532_v51 = vsel %vm529_vm4, %v531_v9, %v527_v38  ;;  %vm554_vm7 = vweird.f32 %v5842_v25  ;;  %v560_v4 = vand.u32 2147483648, %v5842_v25 }
 0x10f   : > { %v536_v40 = vsub.f32 1.0, %v535_v28  ;;  %v591_v57 = vmul.f32 %v532_v51, %v5775_v15  ;;  %v558_v5 = vand.u32 2147483647, %v5842_v25 }
 0x110   : > { %v561_v19 = vor.u32 1.1754944e-38, %v560_v4 }
 0x111   : > { %v537_v24 = vmul.f32 %v5219_v0, %v536_v40  ;;  %vm559_vm9 = vcmp.eq.f32.partialorder %v558_v5, 8.507059e+37  ;;  %v5905_v6 = vpack.c.bf16 %v591_v57, %v5828_v12 }
 0x113   : > { %v538_v48 = vadd.f32 %v5219_v0, %v537_v24  ;;  %778 = vrot.lane.b32.xlu0 %v5835_v16, %s5567_s24 }
 0x114   : > { %v5221_v50 = vpop.eup %5220 }
 0x115   : > { %v542_v52 = vsel %vm541_vm5, %v5219_v0, %v538_v48  ;;  %v550_v62 = vmul.f32 %v5221_v50, %v5842_v25  ;;  %vm555_vm8 = vweird.f32 %v5221_v50 }
 0x116   : > { %v547_v55 = vsel %vm544_vm6, %v546_v46, %v542_v52 }
 0x117   : > { %v592_v60 = vmul.f32 %v547_v55, %v5792_v41  ;;  %v551_v2 = vsub.f32 1.0, %v550_v62  ;;  %v958_v41 = vld [vmem:[%s7825_s1 + $0x10] sm:$0x3] }
 0x118   : > { %v1002_v39 = vsel %vm651_vm2, %v958_v41, 0  ;;  %vm556_vm2 = vmor %vm554_vm7, %vm555_vm8 }
 0x119   : > { %v5868_v1 = vpack.c.bf16 %v592_v60, %v591_v57  ;;  %v552_v15 = vmul.f32 %v5221_v50, %v551_v2  ;;  %1011 = vmatpush.bf16.msrb.mxu2 %v1002_v39 }
 0x11b   : > { %623 = vrot.lane.b32.xlu2 %v5868_v1, %s5568_s25  ;;  %780 = vrot.lane.b32.xlu1 %v5868_v1, %s5567_s24  ;;  %v553_v26 = vadd.f32 %v5221_v50, %v552_v15 }
 0x11c   : > { %968 = vrot.lane.b32.xlu0 %v5704_v7, %s5568_s25  ;;  %4729 = vmatmul.msk.bf16.gmra.mxu2 %vm629_vm11, %v5868_v1 }
 0x11d   : > { %1511 = vmatpush.bf16.msra.mxu2 %v5862_v53  ;;  %v557_v58 = vsel %vm556_vm2, %v5221_v50, %v553_v26 }
 0x11e   : > { %v562_v8 = vsel %vm559_vm9, %v561_v19, %v557_v58 }
 0x11f   : > { %v5914_v10 = vmul.f32 %v562_v8, %v5812_v47 }
 0x121   : > { %v5924_v31 = vpack.c.bf16 %v5914_v10, %v592_v60 }
 0x123   : > { %966 = vrot.lane.b32.xlu2 %v5681_v36, %s5568_s25  ;;  %970 = vrot.lane.b32.xlu1 %v5884_v3, %s5568_s25 }
 0x124   : > { %974 = vrot.lane.b32.xlu0 %v5889_v56, %s5568_s25 }
 0x125   : > { %v5938_v47 = vpop.permute.xlu2 %770 }
 0x12b   : > { %972 = vrot.lane.b32.xlu2 %v5902_v33, %s5568_s25  ;;  %976 = vrot.lane.b32.xlu1 %v5905_v6, %s5568_s25 }
 0x12c   : > { %1562 = vrot.lane.b32.xlu0 %v5681_v36, %s5567_s24 }
 0x12d   : > { %v5916_v11 = vpop.permute.xlu1 %768  ;;  %v612_v59 = vpop.permute.xlu0 %611 }
 0x12e   : > { %4716 = vmatmul.msk.bf16.vlgmr.msra.gmra.mxu1 %vm629_vm11, %v612_v59  ;;  %4730 = vmatmul.msk.bf16.vlgmr.msra.gmra.mxu3 %vm629_vm11, %v5916_v11 }
 0x12f   : > { %4772 = vmatmul.msk.bf16.vlgmr.msrb.gmra.mxu0 %vm629_vm11, %v612_v59  ;;  %1453 = vmatpush.bf16.msra.mxu1 %v5831_v63 }
 0x130   : > { %1604 = vmatpush.bf16.msra.mxu3 %v1002_v39  ;;  %2164 = vmatpush.bf16.msrb.mxu0 %v1002_v39 }
 0x133   : > { %978 = vrot.lane.b32.xlu2 %v5924_v31, %s5568_s25  ;;  %1564 = vrot.lane.b32.xlu1 %v5704_v7, %s5567_s24 }
 0x134   : > { %1568 = vrot.lane.b32.xlu0 %v5902_v33, %s5567_s24 }
 0x13b   : > { %1566 = vrot.lane.b32.xlu2 %v5884_v3, %s5567_s24  ;;  %1570 = vrot.lane.b32.xlu1 %v5889_v56, %s5567_s24 }
 0x13c   : > { %1574 = vrot.lane.b32.xlu0 %v5924_v31, %s5567_s24 }
 0x13d   : > { %v614_v12 = vpop.permute.xlu0 %613 }
 0x13e   : > { %4717 = vmatmul.msk.bf16.gmra.mxu1 %vm629_vm11, %v614_v12  ;;  %4731 = vmatmul.msk.bf16.gmra.mxu3 %vm629_vm11, %v5938_v47 }
 0x13f   : > { %4773 = vmatmul.msk.bf16.gmra.mxu0 %vm629_vm11, %v614_v12  ;;  %v732_v23 = vpop.f32.mrf.mxu2 }
 0x143   : > { %1572 = vrot.lane.b32.xlu2 %v5905_v6, %s5567_s24 }
 0x145   : > { %v618_v17 = vpop.permute.xlu2 %617 }
 0x147   : > { %v734_v18 = vpop.f32.mrf.mxu2 }
 0x14d   : > { %v616_v13 = vpop.permute.xlu1 %615  ;;  %v5946_v14 = vpop.permute.xlu0 %772 }
 0x14e   : > { %4718 = vmatmul.msk.bf16.gmra.mxu1 %vm629_vm11, %v616_v13  ;;  %4732 = vmatmul.msk.bf16.gmra.mxu3 %vm629_vm11, %v5946_v14  ;;  %v5952_v20 = vpop.permute.xlu2 %774 }
 0x14f   : > { %4774 = vmatmul.msk.bf16.gmra.mxu0 %vm629_vm11, %v616_v13  ;;  %7852 = vst [vmem:[#allocation2_spill] sm:$0xff] %v5952_v20  ;;  %v737_v29 = vpop.f32.mrf.mxu2 }
 0x157   : > { %v739_v35 = vpop.f32.mrf.mxu2 }
 0x15e   : > { %4719 = vmatmul.msk.bf16.gmra.mxu1 %vm629_vm11, %v618_v17  ;;  %4733 = vmatmul.msk.bf16.gmra.mxu3 %vm629_vm11, %v5952_v20 }
 0x15f   : > { %4775 = vmatmul.msk.bf16.gmra.mxu0 %vm629_vm11, %v618_v17  ;;  %v742_v40 = vpop.f32.mrf.mxu2 }
 0x167   : > { %v744_v43 = vpop.f32.mrf.mxu2 }
 0x16d   : > { %v620_v21 = vpop.permute.xlu1 %619 }
 0x16e   : > { %4720 = vmatmul.msk.bf16.gmra.mxu1 %vm629_vm11, %v620_v21 }
 0x16f   : > { %4776 = vmatmul.msk.bf16.gmra.mxu0 %vm629_vm11, %v620_v21  ;;  %v747_v48 = vpop.f32.mrf.mxu2 }
 0x175   : > { %v624_v44 = vpop.permute.xlu2 %623  ;;  %v5960_v0 = vpop.permute.xlu1 %776 }
 0x176   : > { %7853 = vst [vmem:[#allocation3_spill] sm:$0xff] %v5960_v0  ;;  %4734 = vmatmul.msk.bf16.gmra.mxu3 %vm629_vm11, %v5960_v0 }
 0x177   : > { %v749_v60 = vpop.f32.mrf.mxu2 }
 0x17d   : > { %v5964_v25 = vpop.permute.xlu2 %966  ;;  %v622_v27 = vpop.permute.xlu0 %621 }
 0x17e   : > { %4721 = vmatmul.msk.bf16.gmra.mxu1 %vm629_vm11, %v622_v27  ;;  %4744 = vmatmul.msk.bf16.vlgmr.msrb.gmra.mxu2 %vm629_vm11, %v5964_v25 }
 0x17f   : > { %4777 = vmatmul.msk.bf16.gmra.mxu0 %vm629_vm11, %v622_v27  ;;  %2044 = vmatpush.bf16.msrb.mxu2 %v5831_v63  ;;  %v752_v26 = vpop.f32.mrf.mxu2 }
 0x185   : > { %v5971_v28 = vpop.permute.xlu0 %778  ;;  %v6001_v24 = vpop.permute.xlu2 %972 }
 0x186   : > { %7854 = vst [vmem:[#allocation4_spill] sm:$0xff] %v5971_v28  ;;  %4735 = vmatmul.msk.bf16.gmra.mxu3 %vm629_vm11, %v5971_v28 }
 0x187   : > { %v754_v13 = vpop.f32.mrf.mxu2 }
 0x18d   : > { %v5981_v34 = vpop.permute.xlu1 %780 }
 0x18e   : > { %v5975_v30 = vpop.permute.xlu0 %968  ;;  %4722 = vmatmul.msk.bf16.gmra.mxu1 %vm629_vm11, %v624_v44  ;;  %7855 = vst [vmem:[#allocation5_spill] sm:$0xff] %v5981_v34 }
 0x18f   : > { %4745 = vmatmul.msk.bf16.gmra.mxu2 %vm629_vm11, %v5975_v30  ;;  %4778 = vmatmul.msk.bf16.gmra.mxu0 %vm629_vm11, %v624_v44 }
 0x195   : > { %v5985_v63 = vpop.permute.xlu1 %970 }
 0x196   : > { %4736 = vmatmul.msk.bf16.gmra.mxu3 %vm629_vm11, %v5981_v34  ;;  %v6019_v62 = vpop.permute.xlu0 %974 }
 0x19d   : > { %v6037_v12 = vpop.permute.xlu1 %976 }
 0x19e   : > { %4737 = vmatmul.msk.bf16.vlgmr.msrb.gmra.mxu1 %vm629_vm11, %v5681_v36  ;;  %7859 = vst [vmem:[#allocation9_spill] sm:$0xff] %v6037_v12 }
 0x19f   : > { %4746 = vmatmul.msk.bf16.gmra.mxu2 %vm629_vm11, %v5985_v63  ;;  %4814 = vmatmul.msk.bf16.vlgmr.msra.gmra.mxu0 %vm629_vm11, %v5681_v36 }
 0x1a0   : > { %2000 = vmatpush.bf16.msrb.mxu1 %v5649_v32 }
 0x1a6   : > { %4765 = vmatmul.msk.bf16.vlgmr.msrb.gmra.mxu3 %vm629_vm11, %v5916_v11 }
 0x1a7   : > { %2102 = vmatpush.bf16.msrb.mxu3 %v5862_v53 }
 0x1ab   : > { %v664_v9 = vpop.f32.mrf.mxu1 }
 0x1ac   : > { %v5999_v38 = vpop.f32.mrf.mxu0  ;;  %v733_v32 = vadd.f32 %v732_v23, %v664_v9 }
 0x1ae   : > { %4738 = vmatmul.msk.bf16.gmra.mxu1 %vm629_vm11, %v5704_v7 }
 0x1af   : > { %4747 = vmatmul.msk.bf16.gmra.mxu2 %vm629_vm11, %v6001_v24  ;;  %4815 = vmatmul.msk.bf16.gmra.mxu0 %vm629_vm11, %v5704_v7 }
 0x1b1   : > { %v815_v45 = vpop.f32.mrf.mxu3 }
 0x1b2   : > { %v6009_v46 = vadd.f32 %v815_v45, %v733_v32 }
 0x1b3   : > { %v666_v49 = vpop.f32.mrf.mxu1 }
 0x1b4   : > { %v6011_v50 = vpop.f32.mrf.mxu0  ;;  %v735_v51 = vadd.f32 %v734_v18, %v666_v49  ;;  %v6055_v49 = vpop.permute.xlu2 %978 }
 0x1b6   : > { %4766 = vmatmul.msk.bf16.gmra.mxu3 %vm629_vm11, %v5938_v47 }
 0x1b9   : > { %v817_v52 = vpop.f32.mrf.mxu3 }
 0x1ba   : > { %v6015_v53 = vadd.f32 %v817_v52, %v735_v51 }
 0x1bb   : > { %v669_v55 = vpop.f32.mrf.mxu1 }
 0x1bc   : > { %v6017_v57 = vpop.f32.mrf.mxu0  ;;  %v738_v2 = vadd.f32 %v737_v29, %v669_v55 }
 0x1bd   : > { %7856 = vst [vmem:[#allocation6_spill] sm:$0xff] %v6017_v57 }
 0x1be   : > { %4739 = vmatmul.msk.bf16.gmra.mxu1 %vm629_vm11, %v5884_v3 }
 0x1bf   : > { %4748 = vmatmul.msk.bf16.gmra.mxu2 %vm629_vm11, %v6019_v62  ;;  %4816 = vmatmul.msk.bf16.gmra.mxu0 %vm629_vm11, %v5884_v3 }
 0x1c1   : > { %v820_v15 = vpop.f32.mrf.mxu3 }
 0x1c2   : > { %v6027_v41 = vadd.f32 %v820_v15, %v738_v2 }
 0x1c3   : > { %v671_v39 = vpop.f32.mrf.mxu1 }
 0x1c4   : > { %v6029_v4 = vpop.f32.mrf.mxu0  ;;  %v740_v5 = vadd.f32 %v739_v35, %v671_v39  ;;  %v757_v35 = vpop.f32.mrf.mxu2 }
 0x1c5   : > { %7857 = vst [vmem:[#allocation7_spill] sm:$0xff] %v6029_v4 }
 0x1c6   : > { %4767 = vmatmul.msk.bf16.gmra.mxu3 %vm629_vm11, %v5946_v14 }
 0x1c9   : > { %v822_v19 = vpop.f32.mrf.mxu3 }
 0x1ca   : > { %v6033_v58 = vadd.f32 %v822_v19, %v740_v5 }
 0x1cb   : > { %v674_v8 = vpop.f32.mrf.mxu1 }
 0x1cc   : > { %v6035_v59 = vpop.f32.mrf.mxu0  ;;  %v743_v17 = vadd.f32 %v742_v40, %v674_v8  ;;  %v759_v2 = vpop.f32.mrf.mxu2 }
 0x1cd   : > { %7858 = vst [vmem:[#allocation8_spill] sm:$0xff] %v6035_v59 }
 0x1ce   : > { %4740 = vmatmul.msk.bf16.gmra.mxu1 %vm629_vm11, %v5902_v33 }
 0x1cf   : > { %4749 = vmatmul.msk.bf16.gmra.mxu2 %vm629_vm11, %v6037_v12  ;;  %4817 = vmatmul.msk.bf16.gmra.mxu0 %vm629_vm11, %v5902_v33 }
 0x1d1   : > { %v825_v21 = vpop.f32.mrf.mxu3 }
 0x1d2   : > { %v6045_v44 = vadd.f32 %v825_v21, %v743_v17 }
 0x1d3   : > { %v676_v23 = vpop.f32.mrf.mxu1 }
 0x1d4   : > { %v6047_v27 = vpop.f32.mrf.mxu0  ;;  %v745_v18 = vadd.f32 %v744_v43, %v676_v23 }
 0x1d5   : > { %7860 = vst [vmem:[#allocation10_spill] sm:$0xff] %v6047_v27 }
 0x1d6   : > { %4768 = vmatmul.msk.bf16.gmra.mxu3 %vm629_vm11, %v5952_v20 }
 0x1d9   : > { %v827_v29 = vpop.f32.mrf.mxu3 }
 0x1da   : > { %v6051_v9 = vadd.f32 %v827_v29, %v745_v18 }
 0x1db   : > { %v679_v32 = vpop.f32.mrf.mxu1 }
 0x1dc   : > { %v6053_v45 = vpop.f32.mrf.mxu0  ;;  %v748_v40 = vadd.f32 %v747_v48, %v679_v32  ;;  %v762_v48 = vpop.f32.mrf.mxu2 }
 0x1dd   : > { %7861 = vst [vmem:[#allocation11_spill] sm:$0xff] %v6053_v45 }
 0x1de   : > { %4741 = vmatmul.msk.bf16.gmra.mxu1 %vm629_vm11, %v5889_v56 }
 0x1df   : > { %4750 = vmatmul.msk.bf16.gmra.mxu2 %vm629_vm11, %v6055_v49  ;;  %4818 = vmatmul.msk.bf16.gmra.mxu0 %vm629_vm11, %v5889_v56 }
 0x1e1   : > { %v830_v43 = vpop.f32.mrf.mxu3 }
 0x1e2   : > { %v6063_v51 = vadd.f32 %v830_v43, %v748_v40 }
 0x1e3   : > { %v681_v52 = vpop.f32.mrf.mxu1 }
 0x1e4   : > { %v6065_v55 = vpop.f32.mrf.mxu0  ;;  %v750_v15 = vadd.f32 %v749_v60, %v681_v52  ;;  %v764_v23 = vpop.f32.mrf.mxu2 }
 0x1e5   : > { %7862 = vst [vmem:[#allocation12_spill] sm:$0xff] %v6065_v55 }
 0x1e6   : > { %4769 = vmatmul.msk.bf16.gmra.mxu3 %vm629_vm11, %v5960_v0 }
 0x1e9   : > { %v832_v39 = vpop.f32.mrf.mxu3 }
 0x1ea   : > { %v6069_v5 = vadd.f32 %v832_v39, %v750_v15 }
 0x1eb   : > { %v684_v19 = vpop.f32.mrf.mxu1 }
 0x1ec   : > { %v6071_v8 = vpop.f32.mrf.mxu0  ;;  %v753_v60 = vadd.f32 %v752_v26, %v684_v19 }
 0x1ed   : > { %7863 = vst [vmem:[#allocation13_spill] sm:$0xff] %v6071_v8 }
 0x1ee   : > { %4742 = vmatmul.msk.bf16.gmra.mxu1 %vm629_vm11, %v5905_v6 }
 0x1ef   : > { %4786 = vmatmul.msk.bf16.vlgmr.msra.gmra.mxu2 %vm629_vm11, %v5964_v25  ;;  %4819 = vmatmul.msk.bf16.gmra.mxu0 %vm629_vm11, %v5905_v6 }
 0x1f3   : > { %v686_v17 = vpop.f32.mrf.mxu1 }
 0x1f4   : > { %v6079_v21 = vpop.f32.mrf.mxu0  ;;  %v755_v43 = vadd.f32 %v754_v13, %v686_v17 }
 0x1f5   : > { %7864 = vst [vmem:[#allocation14_spill] sm:$0xff] %v6079_v21 }
 0x1f6   : > { %4770 = vmatmul.msk.bf16.gmra.mxu3 %vm629_vm11, %v5971_v28 }
 0x1f9   : > { %v835_v18 = vpop.f32.mrf.mxu3 }
 0x1fa   : > { %v6083_v29 = vadd.f32 %v835_v18, %v753_v60 }
 0x1fb   : > { %v689_v32 = vpop.f32.mrf.mxu1 }
 0x1fc   : > { %v6085_v40 = vpop.f32.mrf.mxu0  ;;  %v758_v60 = vadd.f32 %v757_v35, %v689_v32 }
 0x1fd   : > { %7865 = vst [vmem:[#allocation15_spill] sm:$0xff] %v6085_v40 }
 0x1fe   : > { %4743 = vmatmul.msk.bf16.gmra.mxu1 %vm629_vm11, %v5924_v31 }
 0x1ff   : > { %4787 = vmatmul.msk.bf16.gmra.mxu2 %vm629_vm11, %v5975_v30  ;;  %4820 = vmatmul.msk.bf16.gmra.mxu0 %vm629_vm11, %v5924_v31 }
 0x201   : > { %v837_v52 = vpop.f32.mrf.mxu3  ;;  %v1013_v15 = vpop.f32.mrf.mxu2 }
 0x202   : > { %v6093_v26 = vadd.f32 %v837_v52, %v755_v43 }
 0x203   : > { %v691_v39 = vpop.f32.mrf.mxu1 }
 0x204   : > { %v6095_v19 = vpop.f32.mrf.mxu0  ;;  %v760_v13 = vadd.f32 %v759_v2, %v691_v39  ;;  %v6123_v39 = vld [vmem:[%s7826_s2 + $0x1] ss:$0 sm:$0xff] }
 0x205   : > { %7866 = vst [vmem:[#allocation16_spill] sm:$0xff] %v6095_v19 }
 0x206   : > { %4771 = vmatmul.msk.bf16.gmra.mxu3 %vm629_vm11, %v5981_v34 }
 0x209   : > { %v840_v18 = vpop.f32.mrf.mxu3  ;;  %v1015_v40 = vpop.f32.mrf.mxu2 }
 0x20a   : > { %v6099_v21 = vadd.f32 %v840_v18, %v758_v60  ;;  %v6111_v60 = vpop.permute.xlu0 %1562 }
 0x20b   : > { %v694_v8 = vpop.f32.mrf.mxu1 }
 0x20c   : > { %v6101_v28 = vpop.f32.mrf.mxu0  ;;  %v763_v18 = vadd.f32 %v762_v48, %v694_v8 }
 0x20d   : > { %7867 = vst [vmem:[#allocation17_spill] sm:$0xff] %v6101_v28 }
 0x20e   : > { %4779 = vmatmul.msk.bf16.vlgmr.msra.gmra.mxu1 %vm629_vm11, %v5681_v36 }
 0x20f   : > { %4788 = vmatmul.msk.bf16.gmra.mxu2 %vm629_vm11, %v5985_v63  ;;  %4842 = vmatmul.msk.bf16.vlgmr.msrb.gmra.mxu0 %vm629_vm11, %v5688_v54 }
 0x211   : > { %v842_v17 = vpop.f32.mrf.mxu3 }
 0x212   : > { %v6109_v43 = vadd.f32 %v842_v17, %v760_v13  ;;  %v1018_v35 = vpop.f32.mrf.mxu2 }
 0x213   : > { %v696_v32 = vpop.f32.mrf.mxu1 }
 0x214   : > { %v765_v52 = vadd.f32 %v764_v23, %v696_v32  ;;  %v6115_v36 = vpop.f32.mrf.mxu0  ;;  %v6142_v32 = vpop.permute.xlu1 %1564 }
 0x215   : > { %7868 = vst [vmem:[#allocation18_spill] sm:$0xff] %v6115_v36 }
 0x216   : > { %4793 = vmatmul.msk.bf16.vlgmr.msra.gmra.mxu3 %vm629_vm11, %v6111_v60 }
 0x219   : > { %v845_v28 = vpop.f32.mrf.mxu3 }
 0x21a   : > { %v6117_v19 = vadd.f32 %v845_v28, %v763_v18  ;;  %v1020_v34 = vpop.f32.mrf.mxu2 }
 0x21b   : > { %v909_v54 = vpop.f32.mrf.mxu1 }
 0x21c   : > { %v944_v2 = vadd.f32 %v909_v54, %v6009_v46  ;;  %v6135_v48 = vpop.f32.mrf.mxu0 }
 0x21d   : > { %7869 = vst [vmem:[#allocation19_spill] sm:$0xff] %v6135_v48  ;;  %v6182_v48 = vpop.permute.xlu2 %1566 }
 0x21e   : > { %v1048_v23 = vadd.f32 %v1013_v15, %v944_v2  ;;  %4780 = vmatmul.msk.bf16.gmra.mxu1 %vm629_vm11, %v5704_v7  ;;  %7871 = vst [vmem:[#allocation21_spill] sm:$0xff] %v6182_v48 }
 0x21f   : > { %4789 = vmatmul.msk.bf16.gmra.mxu2 %vm629_vm11, %v6001_v24  ;;  %4843 = vmatmul.msk.bf16.gmra.mxu0 %vm629_vm11, %v5715_v22 }
 0x220   : > { %v6132_v28 = vadd.f32 %v6123_v39, %v1048_v23 }
 0x221   : > { %v847_v8 = vpop.f32.mrf.mxu3 }
 0x222   : > { %v4751_v46 = vmul.f32 -1.442695, %v6132_v28  ;;  %v6137_v13 = vadd.f32 %v847_v8, %v765_v52  ;;  %v6139_v15 = vpop.f32.mrf.mxu2 }
 0x223   : > { %v911_v17 = vpop.f32.mrf.mxu1 }
 0x224   : > { %5222 = vpow2.f32 %v4751_v46  ;;  %v945_v7 = vadd.f32 %v911_v17, %v6015_v53  ;;  %v6156_v53 = vpop.f32.mrf.mxu0 }
 0x225   : > { %7870 = vst [vmem:[#allocation20_spill] sm:$0xff] %v6156_v53 }
 0x226   : > { %v1049_v18 = vadd.f32 %v1015_v40, %v945_v7  ;;  %4794 = vmatmul.msk.bf16.gmra.mxu3 %vm629_vm11, %v6142_v32 }
 0x228   : > { %v6147_v22 = vadd.f32 %v6123_v39, %v1049_v18 }
 0x229   : > { %v6149_v54 = vpop.f32.mrf.mxu3 }
 0x22a   : > { %v5223_v2 = vpop.eup %5222  ;;  %v4752_v52 = vmul.f32 -1.442695, %v6147_v22  ;;  %v6152_v23 = vpop.f32.mrf.mxu2 }
 0x22b   : > { %v6154_v8 = vadd.f32 1.0, %v5223_v2  ;;  %v914_v46 = vpop.f32.mrf.mxu1 }
 0x22c   : > { %5224 = vpow2.f32 %v4752_v52  ;;  %v946_v40 = vadd.f32 %v914_v46, %v6027_v41  ;;  %v5556_v41 = vld [vmem:[%s7826_s2] ss:$0 sm:$0xff] }
 0x22d   : > { %5226 = vrcp.f32 %v6154_v8  ;;  %vm1139_vm12 = vweird.f32 %v6154_v8 }
 0x22e   : > { %v1050_v17 = vadd.f32 %v1018_v35, %v946_v40  ;;  %4781 = vmatmul.msk.bf16.gmra.mxu1 %vm629_vm11, %v5884_v3  ;;  %v6175_v35 = vadd.f32 %v5556_v41, %v5994_v42  ;;  %v6185_v42 = vpop.f32.mrf.mxu0 }
 0x22f   : > { %4790 = vmatmul.msk.bf16.gmra.mxu2 %vm629_vm11, %v6019_v62  ;;  %4844 = vmatmul.msk.bf16.gmra.mxu0 %vm629_vm11, %v5752_v61  ;;  %7872 = vst [vmem:[#allocation22_spill] sm:$0xff] %v6185_v42 }
 0x230   : > { %v6167_v7 = vadd.f32 %v6123_v39, %v1050_v17  ;;  %v4715_v36 = vmul.f32 -1.442695, %v6175_v35 }
 0x231   : > { %v6169_v18 = vpop.f32.mrf.mxu3 }
 0x232   : > { %v5225_v2 = vpop.eup %5224  ;;  %v4753_v3 = vmul.f32 -1.442695, %v6167_v7  ;;  %v6178_v52 = vpop.f32.mrf.mxu2 }
 0x233   : > { %v5227_v46 = vpop.eup %5226  ;;  %v1121_v40 = vadd.f32 1.0, %v5225_v2  ;;  %v916_v61 = vpop.f32.mrf.mxu1 }
 0x234   : > { %v1135_v17 = vmul.f32 %v5227_v46, %v6154_v8  ;;  %5228 = vpow2.f32 %v4753_v3  ;;  %v947_v53 = vadd.f32 %v916_v61, %v6033_v58  ;;  %vm1140_vm10 = vweird.f32 %v5227_v46 }
 0x235   : > { %5230 = vrcp.f32 %v1121_v40  ;;  %vm6206_vm13 = vmor %vm1139_vm12, %vm1140_vm10  ;;  %vm1154_vm0 = vweird.f32 %v1121_v40 }
 0x236   : > { %v1136_v55 = vsub.f32 1.0, %v1135_v17  ;;  %v1051_v41 = vadd.f32 %v1020_v34, %v947_v53  ;;  %4795 = vmatmul.msk.bf16.gmra.mxu3 %vm629_vm11, %v6182_v48  ;;  %5232 = vpow2.f32 %v4715_v36  ;;  %v1143_v36 = vand.u32 2147483647, %v6154_v8 }
 0x238   : > { %v1137_v45 = vmul.f32 %v5227_v46, %v1136_v55  ;;  %v6190_v2 = vadd.f32 %v6123_v39, %v1051_v41  ;;  %v1145_v55 = vand.u32 2147483648, %v6154_v8  ;;  %vm1144_vm15 = vcmp.eq.f32.partialorder %v1143_v36, 8.507059e+37  ;;  %v6232_v36 = vpop.permute.xlu0 %1568 }
 0x239   : > { %v6192_v0 = vpop.f32.mrf.mxu3 }
 0x23a   : > { %v5229_v3 = vpop.eup %5228  ;;  %v4754_v58 = vmul.f32 -1.442695, %v6190_v2  ;;  %v6195_v61 = vpop.f32.mrf.mxu2  ;;  %v1138_v34 = vadd.f32 %v5227_v46, %v1137_v45  ;;  %v1158_v45 = vand.u32 2147483647, %v1121_v40 }
 0x23b   : > { %v5231_v27 = vpop.eup %5230  ;;  %v6197_v17 = vadd.f32 1.0, %v5229_v3  ;;  %v919_v42 = vpop.f32.mrf.mxu1 }
 0x23c   : > { %v1150_v53 = vmul.f32 %v5231_v27, %v1121_v40  ;;  %5234 = vpow2.f32 %v4754_v58  ;;  %v948_v59 = vadd.f32 %v919_v42, %v6045_v44  ;;  %v1160_v58 = vand.u32 2147483648, %v1121_v40  ;;  %v5233_v20 = vpop.eup %5232  ;;  %v6216_v42 = vpop.f32.mrf.mxu0 }
 0x23d   : > { %5236 = vrcp.f32 %v6197_v17  ;;  %v1142_v8 = vsel %vm6206_vm13, %v5227_v46, %v1138_v34  ;;  %vm1155_vm14 = vweird.f32 %v5231_v27  ;;  %7875 = vst [vmem:[#allocation23_spill] sm:$0xff] %v6216_v42  ;;  %v6226_v46 = vadd.f32 1.0, %v5233_v20 }
 0x23e   : > { %v1151_v41 = vsub.f32 1.0, %v1150_v53  ;;  %4782 = vmatmul.msk.bf16.gmra.mxu1 %vm629_vm11, %v5902_v33  ;;  %v1052_v33 = vadd.f32 %v6139_v15, %v948_v59  ;;  %v1146_v53 = vor.u32 1.1754944e-38, %v1145_v55  ;;  %vm1156_vm3 = vmor %vm1154_vm0, %vm1155_vm14  ;;  %vm1159_vm4 = vcmp.eq.f32.partialorder %v1158_v45, 8.507059e+37 }
 0x23f   : > { %4791 = vmatmul.msk.bf16.gmra.mxu2 %vm629_vm11, %v6037_v12  ;;  %4845 = vmatmul.msk.bf16.gmra.mxu0 %vm629_vm11, %v5789_v37  ;;  %vm1169_vm6 = vweird.f32 %v6197_v17  ;;  %vm569_vm14 = vweird.f32 %v6226_v46 }
 0x240   : > { %v1152_v44 = vmul.f32 %v5231_v27, %v1151_v41  ;;  %v6222_v12 = vadd.f32 %v6123_v39, %v1052_v33  ;;  %v1147_v34 = vsel %vm1144_vm15, %v1146_v53, %v1142_v8  ;;  %v1161_v41 = vor.u32 1.1754944e-38, %v1160_v58 }
 0x241   : > { %v6219_v4 = vpop.f32.mrf.mxu3  ;;  %v6236_v20 = vmul.f32 %v1147_v34, %v6132_v28  ;;  %v1173_v28 = vand.u32 2147483647, %v6197_v17 }
 0x242   : > { %v5235_v48 = vpop.eup %5234  ;;  %v1153_v57 = vadd.f32 %v5231_v27, %v1152_v44  ;;  %v6224_v37 = vpop.f32.mrf.mxu2  ;;  %v4755_v40 = vmul.f32 -1.442695, %v6222_v12 }
 0x243   : > { %v5237_v3 = vpop.eup %5236  ;;  %v6228_v42 = vadd.f32 1.0, %v5235_v48  ;;  %v921_v59 = vpop.f32.mrf.mxu1  ;;  %7876 = vst [vmem:[#allocation24_spill] sm:$0xff] %v6236_v20  ;;  %vm1174_vm8 = vcmp.eq.f32.partialorder %v1173_v28, 8.507059e+37 }
 0x244   : > { %v1157_v15 = vsel %vm1156_vm3, %v5231_v27, %v1153_v57  ;;  %v1165_v55 = vmul.f32 %v5237_v3, %v6197_v17  ;;  %v1175_v57 = vand.u32 2147483648, %v6197_v17  ;;  %v949_v27 = vadd.f32 %v921_v59, %v6051_v9  ;;  %v6253_v34 = vpop.f32.mrf.mxu0 }
 0x245   : > { %v1162_v44 = vsel %vm1159_vm4, %v1161_v41, %v1157_v15  ;;  %5238 = vrcp.f32 %v6228_v42  ;;  %vm1170_vm5 = vweird.f32 %v5237_v3  ;;  %7877 = vst [vmem:[#allocation25_spill] sm:$0xff] %v6253_v34  ;;  %vm1184_vm9 = vweird.f32 %v6228_v42 }
 0x246   : > { %v6239_v8 = vmul.f32 %v1162_v44, %v6147_v22  ;;  %v1166_v48 = vsub.f32 1.0, %v1165_v55  ;;  %5240 = vpow2.f32 %v4755_v40  ;;  %4796 = vmatmul.msk.bf16.gmra.mxu3 %vm629_vm11, %v6232_v36  ;;  %v1053_v22 = vadd.f32 %v6152_v23, %v949_v27  ;;  %vm1171_vm7 = vmor %vm1169_vm6, %vm1170_vm5 }
 0x247   : > { %5242 = vrcp.f32 %v6226_v46  ;;  %v1176_v9 = vor.u32 1.1754944e-38, %v1175_v57 }
 0x248   : > { %v1167_v58 = vmul.f32 %v5237_v3, %v1166_v48  ;;  %v6258_v59 = vadd.f32 %v6123_v39, %v1053_v22 }
 0x249   : > { %v6250_v33 = vpop.f32.mrf.mxu3 }
 0x24a   : > { %v1168_v53 = vadd.f32 %v5237_v3, %v1167_v58  ;;  %v6255_v41 = vpop.f32.mrf.mxu2  ;;  %v4756_v45 = vmul.f32 -1.442695, %v6258_v59 }
 0x24b   : > { %v5239_v15 = vpop.eup %5238  ;;  %v924_v55 = vpop.f32.mrf.mxu1 }
 0x24c   : > { %v5241_v40 = vpop.eup %5240  ;;  %v1172_v44 = vsel %vm1171_vm7, %v5237_v3, %v1168_v53  ;;  %v1180_v23 = vmul.f32 %v5239_v15, %v6228_v42  ;;  %v950_v48 = vadd.f32 %v924_v55, %v6063_v51  ;;  %vm1185_vm2 = vweird.f32 %v5239_v15 }
 0x24d   : > { %v6262_v27 = vpop.eup %5242  ;;  %v1177_v17 = vsel %vm1174_vm8, %v1176_v9, %v1172_v44  ;;  %v6264_v58 = vadd.f32 1.0, %v5241_v40  ;;  %v1188_v3 = vand.u32 2147483647, %v6228_v42  ;;  %v1190_v51 = vand.u32 2147483648, %v6228_v42  ;;  %vm1186_vm10 = vmor %vm1184_vm9, %vm1185_vm2 }
 0x24e   : > { %v6268_v57 = vmul.f32 %v1177_v17, %v6167_v7  ;;  %v1181_v22 = vsub.f32 1.0, %v1180_v23  ;;  %v1054_v34 = vadd.f32 %v6178_v52, %v950_v48  ;;  %4783 = vmatmul.msk.bf16.gmra.mxu1 %vm629_vm11, %v5889_v56  ;;  %v565_v28 = vmul.f32 %v6262_v27, %v6226_v46 }
 0x24f   : > { %5244 = vrcp.f32 %v6264_v58  ;;  %4792 = vmatmul.msk.bf16.gmra.mxu2 %vm629_vm11, %v6055_v49  ;;  %4846 = vmatmul.msk.bf16.gmra.mxu0 %vm629_vm11, %v5835_v16  ;;  %v1191_v16 = vor.u32 1.1754944e-38, %v1190_v51  ;;  %vm1189_vm12 = vcmp.eq.f32.partialorder %v1188_v3, 8.507059e+37  ;;  %vm570_vm15 = vweird.f32 %v6262_v27 }
 0x250   : > { %v1182_v52 = vmul.f32 %v5239_v15, %v1181_v22  ;;  %5246 = vpow2.f32 %v4756_v45  ;;  %v6283_v56 = vadd.f32 %v6123_v39, %v1054_v34  ;;  %v6294_v34 = vpop.f32.mrf.mxu0  ;;  %v566_v17 = vsub.f32 1.0, %v565_v28  ;;  %v6297_v22 = vpop.permute.xlu1 %1570  ;;  %vm6346_vm5 = vmor %vm569_vm14, %vm570_vm15 }
 0x251   : > { %v6287_v53 = vpop.f32.mrf.mxu3  ;;  %7878 = vst [vmem:[#allocation26_spill] sm:$0xff] %v6294_v34  ;;  %vm1199_vm0 = vweird.f32 %v6264_v58 }
 0x252   : > { %v1183_v9 = vadd.f32 %v5239_v15, %v1182_v52  ;;  %v4757_v55 = vmul.f32 -1.442695, %v6283_v56  ;;  %v6291_v40 = vpop.f32.mrf.mxu2 }
 0x253   : > { %v926_v44 = vpop.f32.mrf.mxu1 }
 0x254   : > { %v1187_v45 = vsel %vm1186_vm10, %v5239_v15, %v1183_v9  ;;  %5248 = vpow2.f32 %v4757_v55  ;;  %v951_v23 = vadd.f32 %v926_v44, %v6069_v5  ;;  %v1205_v9 = vand.u32 2147483648, %v6264_v58 }
 0x255   : > { %v5245_v48 = vpop.eup %5244  ;;  %v1192_v42 = vsel %vm1189_vm12, %v1191_v16, %v1187_v45 }
 0x256   : > { %v5247_v52 = vpop.eup %5246  ;;  %v6300_v7 = vmul.f32 %v1192_v42, %v6190_v2  ;;  %v1195_v20 = vmul.f32 %v5245_v48, %v6264_v58  ;;  %v1055_v51 = vadd.f32 %v6195_v61, %v951_v23  ;;  %4797 = vmatmul.msk.bf16.gmra.mxu3 %vm629_vm11, %v6297_v22  ;;  %v567_v2 = vmul.f32 %v6262_v27, %v566_v17 }
 0x257   : > { %v6306_v15 = vadd.f32 1.0, %v5247_v52  ;;  %vm1200_vm13 = vweird.f32 %v5245_v48  ;;  %v1206_v34 = vor.u32 1.1754944e-38, %v1205_v9  ;;  %v6382_v9 = vpop.permute.xlu2 %1572 }
 0x258   : > { %v1196_v3 = vsub.f32 1.0, %v1195_v20  ;;  %v6309_v5 = vadd.f32 %v6123_v39, %v1055_v51  ;;  %v6313_v28 = vpack.c.bf16 %v6300_v7, %v6268_v57  ;;  %v1203_v20 = vand.u32 2147483647, %v6264_v58  ;;  %vm1201_vm3 = vmor %vm1199_vm0, %vm1200_vm13  ;;  %v6337_v58 = vpop.f32.mrf.mxu0  ;;  %7885 = vst [vmem:[#allocation29_spill] sm:$0xff] %v6382_v9 }
 0x259   : > { %5250 = vrcp.f32 %v6306_v15  ;;  %v6318_v61 = vpop.f32.mrf.mxu3  ;;  %v573_v51 = vand.u32 2147483647, %v6226_v46  ;;  %7880 = vst [vmem:[#allocation28_spill] sm:$0xff] %v6337_v58  ;;  %vm1214_vm8 = vweird.f32 %v6306_v15 }
 0x25a   : > { %7879 = vst [vmem:[#allocation27_spill] sm:$0xff] %v6313_v28  ;;  %v5249_v55 = vpop.eup %5248  ;;  %v1197_v16 = vmul.f32 %v5245_v48, %v1196_v3  ;;  %v4758_v44 = vmul.f32 -1.442695, %v6309_v5  ;;  %v6322_v45 = vpop.f32.mrf.mxu2  ;;  %v575_v3 = vand.u32 2147483648, %v6226_v46  ;;  %v568_v28 = vadd.f32 %v6262_v27, %v567_v2 }
 0x25b   : > { %v6326_v23 = vadd.f32 1.0, %v5249_v55  ;;  %v929_v17 = vpop.f32.mrf.mxu1  ;;  %v5112_v55 = vld [vmem:[%s7825_s1 + $0x30] sm:$0xff]  ;;  %vm1204_vm4 = vcmp.eq.f32.partialorder %v1203_v20, 8.507059e+37  ;;  %vm6361_vm6 = vcmp.eq.f32.partialorder %v573_v51, 8.507059e+37 }
 0x25c   : > { %v1198_v42 = vadd.f32 %v5245_v48, %v1197_v16  ;;  %5252 = vpow2.f32 %v4758_v44  ;;  %v952_v52 = vadd.f32 %v929_v17, %v6083_v29  ;;  %2774 = vmatpush.bf16.msra.mxu0 %v5112_v55  ;;  %v1218_v55 = vand.u32 2147483647, %v6306_v15 }
 0x25d   : > { %5254 = vrcp.f32 %v6326_v23  ;;  %v1235_v46 = vand.u32 2147483648, %v6326_v23  ;;  %vm1229_vm12 = vweird.f32 %v6326_v23 }
 0x25e   : > { %v1202_v16 = vsel %vm1201_vm3, %v5245_v48, %v1198_v42  ;;  %v1056_v29 = vadd.f32 %v6224_v37, %v952_v52  ;;  %4784 = vmatmul.msk.bf16.gmra.mxu1 %vm629_vm11, %v5905_v6  ;;  %vm1219_vm9 = vcmp.eq.f32.partialorder %v1218_v55, 8.507059e+37 }
 0x25f   : > { %v5251_v44 = vpop.eup %5250  ;;  %v1207_v17 = vsel %vm1204_vm4, %v1206_v34, %v1202_v16  ;;  %4828 = vmatmul.msk.bf16.vlgmr.msrb.gmra.mxu2 %vm629_vm11, %v5964_v25  ;;  %4847 = vmatmul.msk.bf16.gmra.mxu0 %vm629_vm11, %v5868_v1  ;;  %v576_v34 = vor.u32 1.1754944e-38, %v575_v3  ;;  %v572_v1 = vsel %vm6346_vm5, %v6262_v27, %v568_v28  ;;  %v1220_v3 = vand.u32 2147483648, %v6306_v15 }
 0x260   : > { %v6355_v37 = vmul.f32 %v1207_v17, %v6222_v12  ;;  %v1210_v6 = vmul.f32 %v5251_v44, %v6306_v15  ;;  %v6359_v48 = vadd.f32 %v6123_v39, %v1056_v29  ;;  %vm1215_vm7 = vweird.f32 %v5251_v44  ;;  %v6391_v58 = vpop.f32.mrf.mxu0 }
 0x261   : > { %v6365_v2 = vpop.f32.mrf.mxu3  ;;  %v577_v28 = vsel %vm6361_vm6, %v576_v34, %v572_v1  ;;  %vm1216_vm2 = vmor %vm1214_vm8, %vm1215_vm7  ;;  %vm2531_vm8 = vcmask 130048  }
 0x262   : > { %v5253_v25 = vpop.eup %5252  ;;  %v1211_v12 = vsub.f32 1.0, %v1210_v6  ;;  %v4759_v20 = vmul.f32 -1.442695, %v6359_v48  ;;  %v6371_v42 = vpop.f32.mrf.mxu2 }
 0x263   : > { %v5255_v51 = vpop.eup %5254  ;;  %v6377_v16 = vadd.f32 1.0, %v5253_v25  ;;  %v931_v29 = vpop.f32.mrf.mxu1 }
 0x264   : > { %v1212_v17 = vmul.f32 %v5251_v44, %v1211_v12  ;;  %v1225_v27 = vmul.f32 %v5255_v51, %v6326_v23  ;;  %5256 = vpow2.f32 %v4759_v20  ;;  %v953_v25 = vadd.f32 %v931_v29, %v6093_v26 }
 0x265   : > { %5258 = vrcp.f32 %v6377_v16  ;;  %v1221_v12 = vor.u32 1.1754944e-38, %v1220_v3  ;;  %v1233_v20 = vand.u32 2147483647, %v6326_v23  ;;  %vm1230_vm10 = vweird.f32 %v5255_v51 }
 0x266   : > { %v1213_v6 = vadd.f32 %v5251_v44, %v1212_v17  ;;  %v1226_v52 = vsub.f32 1.0, %v1225_v27  ;;  %4798 = vmatmul.msk.bf16.gmra.mxu3 %vm629_vm11, %v6382_v9  ;;  %v1057_v15 = vadd.f32 %v6255_v41, %v953_v25  ;;  %v594_v17 = vmul.f32 %v577_v28, %v6175_v35  ;;  %vm1231_vm13 = vmor %vm1229_vm12, %vm1230_vm10 }
 0x267   : > { %v1236_v41 = vor.u32 1.1754944e-38, %v1235_v46  ;;  %vm1234_vm14 = vcmp.eq.f32.partialorder %v1233_v20, 8.507059e+37  ;;  %v1248_v20 = vand.u32 2147483647, %v6377_v16  ;;  %vm1244_vm0 = vweird.f32 %v6377_v16 }
 0x268   : > { %v1217_v34 = vsel %vm1216_vm2, %v5251_v44, %v1213_v6  ;;  %v1227_v1 = vmul.f32 %v5255_v51, %v1226_v52  ;;  %v6399_v55 = vadd.f32 %v6123_v39, %v1057_v15 }
 0x269   : > { %v1222_v26 = vsel %vm1219_vm9, %v1221_v12, %v1217_v34  ;;  %v6395_v29 = vpop.f32.mrf.mxu3  ;;  %v2153_v12 = vpack.c.bf16 %v594_v17, %v5914_v10  ;;  %vm1249_vm4 = vcmp.eq.f32.partialorder %v1248_v20, 8.507059e+37 }
 0x26a   : > { %v5257_v27 = vpop.eup %5256  ;;  %v1228_v9 = vadd.f32 %v5255_v51, %v1227_v1  ;;  %v6401_v3 = vpop.f32.mrf.mxu2  ;;  %v6404_v52 = vmul.f32 %v1222_v26, %v6258_v59  ;;  %v4760_v23 = vmul.f32 -1.442695, %v6399_v55 }
 0x26b   : > { %v5259_v44 = vpop.eup %5258  ;;  %v6406_v6 = vadd.f32 1.0, %v5257_v27  ;;  %v934_v35 = vpop.f32.mrf.mxu1 }
 0x26c   : > { %v1232_v28 = vsel %vm1231_vm13, %v5255_v51, %v1228_v9  ;;  %v1240_v25 = vmul.f32 %v5259_v44, %v6377_v16  ;;  %v1250_v51 = vand.u32 2147483648, %v6377_v16  ;;  %v954_v9 = vadd.f32 %v934_v35, %v6099_v21 }
 0x26d   : > { %v1237_v34 = vsel %vm1234_vm14, %v1236_v41, %v1232_v28  ;;  %5260 = vrcp.f32 %v6406_v6  ;;  %v6424_v10 = vpack.c.bf16 %v6404_v52, %v6355_v37  ;;  %vm1245_vm15 = vweird.f32 %v5259_v44 }
 0x26e   : > { %v6413_v1 = vmul.f32 %v1237_v34, %v6283_v56  ;;  %v1241_v59 = vsub.f32 1.0, %v1240_v25  ;;  %5262 = vpow2.f32 %v4760_v23  ;;  %4785 = vmatmul.msk.bf16.gmra.mxu1 %vm629_vm11, %v5924_v31  ;;  %v1058_v46 = vadd.f32 %v6291_v40, %v954_v9  ;;  %vm1246_vm3 = vmor %vm1244_vm0, %vm1245_vm15 }
 0x26f   : > { %4829 = vmatmul.msk.bf16.gmra.mxu2 %vm629_vm11, %v5975_v30  ;;  %4848 = vmatmul.msk.bf16.gmra.mxu0 %vm629_vm11, %v2153_v12  ;;  %v6433_v30 = vpop.f32.mrf.mxu0  ;;  %v1251_v27 = vor.u32 1.1754944e-38, %v1250_v51  ;;  %v6442_v12 = vpop.permute.xlu0 %1574  ;;  %vm1259_vm6 = vweird.f32 %v6406_v6 }
 0x270   : > { %v1242_v56 = vmul.f32 %v5259_v44, %v1241_v59  ;;  %v6438_v41 = vadd.f32 %v6123_v39, %v1058_v46 }
 0x271   : > { %v6430_v15 = vpop.f32.mrf.mxu3 }
 0x272   : > { %v1243_v21 = vadd.f32 %v5259_v44, %v1242_v56  ;;  %v6435_v17 = vpop.f32.mrf.mxu2  ;;  %v4761_v59 = vmul.f32 -1.442695, %v6438_v41 }
 0x273   : > { %v5261_v26 = vpop.eup %5260  ;;  %v936_v35 = vpop.f32.mrf.mxu1 }
 0x274   : > { %v5263_v28 = vpop.eup %5262  ;;  %v1247_v25 = vsel %vm1246_vm3, %v5259_v44, %v1243_v21  ;;  %v1255_v40 = vmul.f32 %v5261_v26, %v6406_v6  ;;  %v955_v23 = vadd.f32 %v936_v35, %v6109_v43  ;;  %vm1260_vm5 = vweird.f32 %v5261_v26 }
 0x275   : > { %v1252_v16 = vsel %vm1249_vm4, %v1251_v27, %v1247_v25  ;;  %v6444_v34 = vadd.f32 1.0, %v5263_v28  ;;  %v1263_v44 = vand.u32 2147483647, %v6406_v6  ;;  %v1265_v43 = vand.u32 2147483648, %v6406_v6  ;;  %vm1261_vm7 = vmor %vm1259_vm6, %vm1260_vm5 }
 0x276   : > { %v6448_v51 = vmul.f32 %v1252_v16, %v6309_v5  ;;  %v1256_v9 = vsub.f32 1.0, %v1255_v40  ;;  %v1059_v56 = vadd.f32 %v6322_v45, %v955_v23  ;;  %4799 = vmatmul.msk.bf16.gmra.mxu3 %vm629_vm11, %v6442_v12 }
 0x277   : > { %5264 = vrcp.f32 %v6444_v34  ;;  %v1266_v28 = vor.u32 1.1754944e-38, %v1265_v43  ;;  %vm1264_vm2 = vcmp.eq.f32.partialorder %v1263_v44, 8.507059e+37  ;;  %v6469_v23 = vpop.f32.mrf.mxu0  ;;  %vm1274_vm10 = vweird.f32 %v6444_v34 }
 0x278   : > { %v1257_v20 = vmul.f32 %v5261_v26, %v1256_v9  ;;  %5266 = vpow2.f32 %v4761_v59  ;;  %v6457_v46 = vadd.f32 %v6123_v39, %v1059_v56  ;;  %v6461_v5 = vpack.c.bf16 %v6448_v51, %v6413_v1  ;;  %7887 = vst [vmem:[#allocation31_spill] sm:$0xff] %v6469_v23 }
 0x279   : > { %v6463_v45 = vpop.f32.mrf.mxu3 }
 0x27a   : > { %7886 = vst [vmem:[#allocation30_spill] sm:$0xff] %v6461_v5  ;;  %v1258_v21 = vadd.f32 %v5261_v26, %v1257_v20  ;;  %v4762_v27 = vmul.f32 -1.442695, %v6457_v46  ;;  %v6467_v35 = vpop.f32.mrf.mxu2 }
 0x27b   : > { %v939_v25 = vpop.f32.mrf.mxu1 }
 0x27c   : > { %v1262_v40 = vsel %vm1261_vm7, %v5261_v26, %v1258_v21  ;;  %5268 = vpow2.f32 %v4762_v27  ;;  %v956_v16 = vadd.f32 %v939_v25, %v6117_v19  ;;  %v5110_v26 = vld [vmem:[%s7825_s1 + $0x20] sm:$0xff]  ;;  %v7888_v19 = vpack.c.bf16 %v6268_v57, %v6239_v8 }
 0x27d   : > { %v5265_v59 = vpop.eup %5264  ;;  %v1267_v9 = vsel %vm1264_vm2, %v1266_v28, %v1262_v40  ;;  %2557 = vmatpush.bf16.msra.mxu1 %v5110_v26  ;;  %v1278_v57 = vand.u32 2147483647, %v6444_v34 }
 0x27e   : > { %v5267_v56 = vpop.eup %5266  ;;  %v6473_v6 = vmul.f32 %v1267_v9, %v6359_v48  ;;  %v1270_v20 = vmul.f32 %v5265_v59, %v6444_v34  ;;  %v1060_v31 = vadd.f32 %v6371_v42, %v956_v16  ;;  %4821 = vmatmul.msk.bf16.vlgmr.msrb.gmra.mxu1 %vm629_vm11, %v5916_v11  ;;  %v1280_v42 = vand.u32 2147483648, %v6444_v34 }
 0x27f   : > { %v1130_v44 = vadd.f32 1.0, %v5267_v56  ;;  %4830 = vmatmul.msk.bf16.gmra.mxu2 %vm629_vm11, %v5985_v63  ;;  %4897 = vmatmul.msk.bf16.vlgmr.msra.gmra.mxu0 %vm2531_vm8, %v7888_v19  ;;  %vm1275_vm9 = vweird.f32 %v5265_v59  ;;  %vm1279_vm13 = vcmp.eq.f32.partialorder %v1278_v57, 8.507059e+37  ;;  %v6505_v26 = vpop.f32.mrf.mxu0 }
 0x280   : > { %v1271_v48 = vsub.f32 1.0, %v1270_v20  ;;  %v6489_v43 = vadd.f32 %v6123_v39, %v1060_v31  ;;  %vm1276_vm12 = vmor %vm1274_vm10, %vm1275_vm9  ;;  %v1281_v56 = vor.u32 1.1754944e-38, %v1280_v42  ;;  %7889 = vst [vmem:[#allocation32_spill] sm:$0xff] %v6505_v26  ;;  %v1412_v26 = vadd.f32 %v5999_v38, %v6149_v54 }
 0x281   : > { %5270 = vrcp.f32 %v1130_v44  ;;  %v6494_v21 = vpop.f32.mrf.mxu3  ;;  %vm1289_vm15 = vweird.f32 %v1130_v44 }
 0x282   : > { %v5269_v27 = vpop.eup %5268  ;;  %v1272_v63 = vmul.f32 %v5265_v59, %v1271_v48  ;;  %v4763_v28 = vmul.f32 -1.442695, %v6489_v43  ;;  %v6498_v25 = vpop.f32.mrf.mxu2 }
 0x283   : > { %v6500_v31 = vadd.f32 1.0, %v5269_v27  ;;  %v941_v40 = vpop.f32.mrf.mxu1 }
 0x284   : > { %v1273_v16 = vadd.f32 %v5265_v59, %v1272_v63  ;;  %5272 = vpow2.f32 %v4763_v28  ;;  %v957_v9 = vadd.f32 %v941_v40, %v6137_v13 }
 0x285   : > { %5274 = vrcp.f32 %v6500_v31  ;;  %vm1304_vm5 = vweird.f32 %v6500_v31 }
 0x286   : > { %v1277_v20 = vsel %vm1276_vm12, %v5265_v59, %v1273_v16  ;;  %v1061_v19 = vadd.f32 %v6401_v3, %v957_v9  ;;  %4835 = vmatmul.msk.bf16.vlgmr.msrb.gmra.mxu3 %vm629_vm11, %v6111_v60  ;;  %v1293_v16 = vand.u32 2147483647, %v1130_v44 }
 0x287   : > { %v5271_v48 = vpop.eup %5270  ;;  %v1282_v27 = vsel %vm1279_vm13, %v1281_v56, %v1277_v20 }
 0x288   : > { %v6511_v34 = vmul.f32 %v1282_v27, %v6399_v55  ;;  %v1285_v63 = vmul.f32 %v5271_v48, %v1130_v44  ;;  %v6514_v13 = vadd.f32 %v6123_v39, %v1061_v19  ;;  %v1295_v55 = vand.u32 2147483648, %v1130_v44 }
 0x289   : > { %v6516_v42 = vpop.f32.mrf.mxu3  ;;  %vm1290_vm14 = vweird.f32 %v5271_v48  ;;  %vm1294_vm3 = vcmp.eq.f32.partialorder %v1293_v16, 8.507059e+37  ;;  %v1308_v44 = vand.u32 2147483647, %v6500_v31 }
 0x28a   : > { %v5273_v59 = vpop.eup %5272  ;;  %v1286_v57 = vsub.f32 1.0, %v1285_v63  ;;  %v4764_v28 = vmul.f32 -1.442695, %v6514_v13  ;;  %v6519_v40 = vpop.f32.mrf.mxu2  ;;  %v6523_v60 = vpack.c.bf16 %v6511_v34, %v6473_v6  ;;  %vm1291_vm0 = vmor %vm1289_vm15, %vm1290_vm14  ;;  %v1296_v11 = vor.u32 1.1754944e-38, %v1295_v55 }
 0x28b   : > { %v5275_v3 = vpop.eup %5274  ;;  %v6525_v9 = vadd.f32 1.0, %v5273_v59  ;;  %v1455_v56 = vpop.f32.mrf.mxu1  ;;  %v1310_v59 = vand.u32 2147483648, %v6500_v31  ;;  %vm1309_vm7 = vcmp.eq.f32.partialorder %v1308_v44, 8.507059e+37 }
 0x28c   : > { %7890 = vst [vmem:[#allocation33_spill] sm:$0xff] %v6523_v60  ;;  %v1287_v20 = vmul.f32 %v5271_v48, %v1286_v57  ;;  %v1300_v19 = vmul.f32 %v5275_v3, %v6500_v31  ;;  %5276 = vpow2.f32 %v4764_v28  ;;  %v7891_v57 = vpack.c.bf16 %v6355_v37, %v6300_v7 }
 0x28d   : > { %5278 = vrcp.f32 %v6525_v9  ;;  %vm1305_vm4 = vweird.f32 %v5275_v3  ;;  %v1325_v31 = vand.u32 2147483648, %v6525_v9  ;;  %vm1319_vm9 = vweird.f32 %v6525_v9 }
 0x28e   : > { %v1288_v27 = vadd.f32 %v5271_v48, %v1287_v20  ;;  %v1301_v63 = vsub.f32 1.0, %v1300_v19  ;;  %4822 = vmatmul.msk.bf16.gmra.mxu1 %vm629_vm11, %v5938_v47  ;;  %v6539_v19 = vpop.f32.mrf.mxu0  ;;  %vm1306_vm6 = vmor %vm1304_vm5, %vm1305_vm4 }
 0x28f   : > { %4831 = vmatmul.msk.bf16.gmra.mxu2 %vm629_vm11, %v6001_v24  ;;  %4898 = vmatmul.msk.bf16.gmra.mxu0 %vm2531_vm8, %v7891_v57  ;;  %7892 = vst [vmem:[#allocation34_spill] sm:$0xff] %v6539_v19  ;;  %v1490_v19 = vadd.f32 %v1455_v56, %v1412_v26 }
 0x290   : > { %v1292_v28 = vsel %vm1291_vm0, %v5271_v48, %v1288_v27  ;;  %v1302_v20 = vmul.f32 %v5275_v3, %v1301_v63  ;;  %v1311_v27 = vor.u32 1.1754944e-38, %v1310_v59 }
 0x291   : > { %v1297_v47 = vsel %vm1294_vm3, %v1296_v11, %v1292_v28  ;;  %v6541_v16 = vpop.f32.mrf.mxu3  ;;  %v1548_v26 = vadd.f32 %v6435_v17, %v1490_v19 }
 0x292   : > { %v5277_v55 = vpop.eup %5276  ;;  %v1303_v24 = vadd.f32 %v5275_v3, %v1302_v20  ;;  %v6546_v7 = vpop.f32.mrf.mxu2  ;;  %v6549_v48 = vmul.f32 %v1297_v47, %v6438_v41  ;;  %v1323_v41 = vand.u32 2147483647, %v6525_v9 }
 0x293   : > { %v5279_v37 = vpop.eup %5278  ;;  %v1133_v63 = vadd.f32 1.0, %v5277_v55  ;;  %v1457_v57 = vpop.f32.mrf.mxu1 }
 0x294   : > { %v1307_v11 = vsel %vm1306_vm6, %v5275_v3, %v1303_v24  ;;  %v1315_v28 = vmul.f32 %v5279_v37, %v6525_v9  ;;  %v2739_v3 = vpack.c.bf16 %v6549_v48, %v6511_v34  ;;  %vm1320_vm2 = vweird.f32 %v5279_v37 }
 0x295   : > { %v1312_v23 = vsel %vm1309_vm7, %v1311_v27, %v1307_v11  ;;  %5280 = vrcp.f32 %v1133_v63  ;;  %vm1321_vm10 = vmor %vm1319_vm9, %vm1320_vm2  ;;  %v1326_v24 = vor.u32 1.1754944e-38, %v1325_v31  ;;  %vm1324_vm12 = vcmp.eq.f32.partialorder %v1323_v41, 8.507059e+37 }
 0x296   : > { %v6553_v38 = vmul.f32 %v1312_v23, %v6457_v46  ;;  %v1316_v54 = vsub.f32 1.0, %v1315_v28  ;;  %4836 = vmatmul.msk.bf16.gmra.mxu3 %vm629_vm11, %v6142_v32  ;;  %v1414_v46 = vadd.f32 %v6011_v50, %v6169_v18  ;;  %v6569_v20 = vpop.f32.mrf.mxu0  ;;  %v1340_v31 = vand.u32 2147483648, %v1133_v63 }
 0x297   : > { %vm1334_vm14 = vweird.f32 %v1133_v63 }
 0x298   : > { %v1317_v59 = vmul.f32 %v5279_v37, %v1316_v54  ;;  %v6564_v56 = vpack.c.bf16 %v6553_v38, %v6549_v48  ;;  %v1491_v17 = vadd.f32 %v1457_v57, %v1414_v46 }
 0x299   : > { %v1606_v23 = vpop.f32.mrf.mxu3 }
 0x29a   : > { %7893 = vst [vmem:[#allocation35_spill] sm:$0xff] %v6564_v56  ;;  %v1318_v32 = vadd.f32 %v5279_v37, %v1317_v59  ;;  %v6571_v44 = vpop.f32.mrf.mxu2  ;;  %v1641_v47 = vadd.f32 %v1606_v23, %v1548_v26  ;;  %v1338_v59 = vand.u32 2147483647, %v1133_v63  ;;  %v1549_v57 = vadd.f32 %v6467_v35, %v1491_v17 }
 0x29b   : > { %v5281_v55 = vpop.eup %5280  ;;  %v1460_v19 = vpop.f32.mrf.mxu1 }
 0x29c   : > { %v1322_v27 = vsel %vm1321_vm10, %v5279_v37, %v1318_v32  ;;  %v1330_v11 = vmul.f32 %v5281_v55, %v1133_v63  ;;  %v6574_v28 = vadd.f32 %v6123_v39, %v1641_v47  ;;  %v7895_v37 = vpack.c.bf16 %v6413_v1, %v6404_v52 }
 0x29d   : > { %v1327_v50 = vsel %vm1324_vm12, %v1326_v24, %v1322_v27  ;;  %vm1335_vm13 = vweird.f32 %v5281_v55  ;;  %v1341_v52 = vor.u32 1.1754944e-38, %v1340_v31  ;;  %vm1339_vm0 = vcmp.eq.f32.partialorder %v1338_v59, 8.507059e+37  ;;  %v7899_v59 = vld [vmem:[#allocation7_spill] sm:$0xff] }
 0x29e   : > { %v6577_v18 = vmul.f32 %v1327_v50, %v6489_v43  ;;  %v1331_v9 = vsub.f32 1.0, %v1330_v11  ;;  %v4800_v54 = vmul.f32 -1.442695, %v6574_v28  ;;  %4823 = vmatmul.msk.bf16.gmra.mxu1 %vm629_vm11, %v5946_v14  ;;  %v7896_v14 = vld [vmem:[#allocation6_spill] sm:$0xff]  ;;  %vm1336_vm15 = vmor %vm1334_vm14, %vm1335_vm13  ;;  %v6595_v35 = vpop.f32.mrf.mxu0  ;;  %v7898_v50 = vld [vmem:[#allocation21_spill] sm:$0xff] }
 0x29f   : > { %4832 = vmatmul.msk.bf16.gmra.mxu2 %vm629_vm11, %v6019_v62  ;;  %4899 = vmatmul.msk.bf16.gmra.mxu0 %vm2531_vm8, %v7895_v37  ;;  %v1417_v46 = vadd.f32 %v7896_v14, %v6192_v0 }
 0x2a0   : > { %7894 = vst [vmem:[#allocation36_spill] sm:$0xff] %v6577_v18  ;;  %v1332_v43 = vmul.f32 %v5281_v55, %v1331_v9  ;;  %5282 = vpow2.f32 %v4800_v54  ;;  %v2740_v41 = vpack.c.bf16 %v6577_v18, %v6553_v38 }
 0x2a1   : > { %v1608_v26 = vpop.f32.mrf.mxu3  ;;  %v1492_v24 = vadd.f32 %v1460_v19, %v1417_v46 }
 0x2a2   : > { %v1333_v23 = vadd.f32 %v5281_v55, %v1332_v43  ;;  %v6593_v62 = vpop.f32.mrf.mxu2  ;;  %v1642_v32 = vadd.f32 %v1608_v26, %v1549_v57 }
 0x2a3   : > { %v1462_v1 = vpop.f32.mrf.mxu1 }
 0x2a4   : > { %v1337_v47 = vsel %vm1336_vm15, %v5281_v55, %v1333_v23  ;;  %v6598_v17 = vadd.f32 %v6123_v39, %v1642_v32  ;;  %v1550_v55 = vadd.f32 %v6498_v25, %v1492_v24  ;;  %v7900_v23 = vld [vmem:[#allocation2_spill] sm:$0xff]  ;;  %v5109_v24 = vld [vmem:[%s7825_s1 + $0x18] sm:$0xff] }
 0x2a5   : > { %v1342_v27 = vsel %vm1339_vm0, %v1341_v52, %v1337_v47  ;;  %v7901_v47 = vld [vmem:[#allocation9_spill] sm:$0xff]  ;;  %2620 = vmatpush.bf16.msra.mxu2 %v5109_v24 }
 0x2a6   : > { %v5283_v11 = vpop.eup %5282  ;;  %v6601_v0 = vmul.f32 %v1342_v27, %v6514_v13  ;;  %v4801_v63 = vmul.f32 -1.442695, %v6598_v17  ;;  %4837 = vmatmul.msk.bf16.gmra.mxu3 %vm629_vm11, %v7898_v50  ;;  %v1419_v13 = vadd.f32 %v7899_v59, %v6219_v4  ;;  %v6619_v46 = vpop.f32.mrf.mxu0  ;;  %v7902_v4 = vpack.c.bf16 %v6473_v6, %v6448_v51  ;;  %v7903_v27 = vld [vmem:[#allocation8_spill] sm:$0xff] }
 0x2a7   : > { %v6606_v9 = vadd.f32 1.0, %v5283_v11  ;;  %v1422_v11 = vadd.f32 %v7903_v27, %v6250_v33 }
 0x2a8   : > { %7897 = vst [vmem:[#allocation6_spill] sm:$0xff] %v6601_v0  ;;  %5284 = vpow2.f32 %v4801_v63  ;;  %v1493_v43 = vadd.f32 %v1462_v1, %v1419_v13 }
 0x2a9   : > { %5286 = vrcp.f32 %v6606_v9  ;;  %v1611_v54 = vpop.f32.mrf.mxu3  ;;  %vm1730_vm4 = vweird.f32 %v6606_v9 }
 0x2aa   : > { %v6614_v31 = vpop.f32.mrf.mxu2  ;;  %v1643_v37 = vadd.f32 %v1611_v54, %v1550_v55  ;;  %v1551_v1 = vadd.f32 %v6519_v40, %v1493_v43  ;;  %v6642_v40 = vld [vmem:[%s7826_s2 + $0x1] ss:$0 sm:$0xff] }
 0x2ab   : > { %v1465_v57 = vpop.f32.mrf.mxu1 }
 0x2ac   : > { %v6617_v26 = vadd.f32 %v6123_v39, %v1643_v37  ;;  %v1494_v6 = vadd.f32 %v1465_v57, %v1422_v11 }
 0x2ae   : > { %v5285_v14 = vpop.eup %5284  ;;  %v4802_v25 = vmul.f32 -1.442695, %v6617_v26  ;;  %4824 = vmatmul.msk.bf16.gmra.mxu1 %vm629_vm11, %v7900_v23  ;;  %v1552_v57 = vadd.f32 %v6546_v7, %v1494_v6 }
 0x2af   : > { %v5287_v32 = vpop.eup %5286  ;;  %v1712_v52 = vadd.f32 1.0, %v5285_v14  ;;  %4833 = vmatmul.msk.bf16.gmra.mxu2 %vm629_vm11, %v7901_v47  ;;  %4900 = vmatmul.msk.bf16.gmra.mxu0 %vm2531_vm8, %v7902_v4  ;;  %v7904_v4 = vld [vmem:[#allocation10_spill] sm:$0xff] }
 0x2b0   : > { %v1726_v39 = vmul.f32 %v5287_v32, %v6606_v9  ;;  %5288 = vpow2.f32 %v4802_v25  ;;  %v6653_v25 = vpop.f32.mrf.mxu0  ;;  %vm1731_vm3 = vweird.f32 %v5287_v32 }
 0x2b1   : > { %5290 = vrcp.f32 %v1712_v52  ;;  %v1613_v63 = vpop.f32.mrf.mxu3  ;;  %vm6663_vm5 = vmor %vm1730_vm4, %vm1731_vm3  ;;  %vm1745_vm2 = vweird.f32 %v1712_v52 }
 0x2b2   : > { %v1727_v50 = vsub.f32 1.0, %v1726_v39  ;;  %v6637_v55 = vpop.f32.mrf.mxu2  ;;  %v1644_v51 = vadd.f32 %v1613_v63, %v1551_v1  ;;  %v1424_v39 = vadd.f32 %v7904_v4, %v6287_v53  ;;  %v1736_v1 = vand.u32 2147483648, %v6606_v9 }
 0x2b3   : > { %v1467_v54 = vpop.f32.mrf.mxu1 }
 0x2b4   : > { %v1728_v59 = vmul.f32 %v5287_v32, %v1727_v50  ;;  %v6645_v13 = vadd.f32 %v6642_v40, %v1644_v51  ;;  %v1749_v50 = vand.u32 2147483647, %v1712_v52  ;;  %v1751_v51 = vand.u32 2147483648, %v1712_v52 }
 0x2b5   : > { %v1495_v53 = vadd.f32 %v1467_v54, %v1424_v39 }
 0x2b6   : > { %v5289_v37 = vpop.eup %5288  ;;  %v4803_v33 = vmul.f32 -1.442695, %v6645_v13  ;;  %4838 = vmatmul.msk.bf16.gmra.mxu3 %vm629_vm11, %v6232_v36  ;;  %v1729_v23 = vadd.f32 %v5287_v32, %v1728_v59  ;;  %v1734_v36 = vand.u32 2147483647, %v6606_v9  ;;  %v1737_v9 = vor.u32 1.1754944e-38, %v1736_v1 }
 0x2b7   : > { %v5291_v43 = vpop.eup %5290  ;;  %v6650_v14 = vadd.f32 1.0, %v5289_v37  ;;  %vm1750_vm10 = vcmp.eq.f32.partialorder %v1749_v50, 8.507059e+37 }
 0x2b8   : > { %v1741_v47 = vmul.f32 %v5291_v43, %v1712_v52  ;;  %5292 = vpow2.f32 %v4803_v33  ;;  %v1733_v59 = vsel %vm6663_vm5, %v5287_v32, %v1729_v23  ;;  %vm1746_vm6 = vweird.f32 %v5291_v43  ;;  %v6694_v48 = vpop.f32.mrf.mxu0 }
 0x2b9   : > { %5294 = vrcp.f32 %v6650_v14  ;;  %v1616_v24 = vpop.f32.mrf.mxu3  ;;  %vm1735_vm7 = vcmp.eq.f32.partialorder %v1734_v36, 8.507059e+37  ;;  %vm1747_vm9 = vmor %vm1745_vm2, %vm1746_vm6  ;;  %v1752_v32 = vor.u32 1.1754944e-38, %v1751_v51  ;;  %v1553_v36 = vadd.f32 %v6571_v44, %v1495_v53 }
 0x2ba   : > { %v1742_v27 = vsub.f32 1.0, %v1741_v47  ;;  %v6661_v7 = vpop.f32.mrf.mxu2  ;;  %v1645_v11 = vadd.f32 %v1616_v24, %v1552_v57  ;;  %v7907_v24 = vld [vmem:[#allocation3_spill] sm:$0xff]  ;;  %v1738_v39 = vsel %vm1735_vm7, %v1737_v9, %v1733_v59  ;;  %v1764_v53 = vand.u32 2147483647, %v6650_v14 }
 0x2bb   : > { %v1470_v6 = vpop.f32.mrf.mxu1  ;;  %v6692_v34 = vmul.f32 %v1738_v39, %v6574_v28  ;;  %vm1760_vm13 = vweird.f32 %v6650_v14 }
 0x2bc   : > { %v1743_v37 = vmul.f32 %v5291_v43, %v1742_v27  ;;  %v6670_v33 = vadd.f32 %v6642_v40, %v1645_v11  ;;  %v5116_v27 = vld [vmem:[%s7825_s1 + $0x50] sm:$0xff]  ;;  %v7908_v11 = vld [vmem:[#allocation11_spill] sm:$0xff]  ;;  %vm1765_vm15 = vcmp.eq.f32.partialorder %v1764_v53, 8.507059e+37 }
 0x2bd   : > { %v1427_v63 = vadd.f32 %v7908_v11, %v6318_v61  ;;  %3066 = vmatpush.bf16.msrb.mxu0 %v5116_v27  ;;  %v1766_v61 = vand.u32 2147483648, %v6650_v14 }
 0x2be   : > { %v5293_v47 = vpop.eup %5292  ;;  %v1744_v57 = vadd.f32 %v5291_v43, %v1743_v37  ;;  %v4804_v4 = vmul.f32 -1.442695, %v6670_v33  ;;  %4825 = vmatmul.msk.bf16.gmra.mxu1 %vm629_vm11, %v7907_v24 }
 0x2bf   : > { %v5295_v54 = vpop.eup %5294  ;;  %v6675_v23 = vadd.f32 1.0, %v5293_v47  ;;  %4834 = vmatmul.msk.bf16.gmra.mxu2 %vm629_vm11, %v6055_v49  ;;  %4901 = vmatmul.msk.bf16.gmra.mxu0 %vm2531_vm8, %v2739_v3  ;;  %v1496_v59 = vadd.f32 %v1470_v6, %v1427_v63  ;;  %v1767_v6 = vor.u32 1.1754944e-38, %v1766_v61 }
 0x2c0   : > { %v1748_v52 = vsel %vm1747_vm9, %v5291_v43, %v1744_v57  ;;  %v1756_v1 = vmul.f32 %v5295_v54, %v6650_v14  ;;  %5296 = vpow2.f32 %v4804_v4  ;;  %vm1761_vm12 = vweird.f32 %v5295_v54  ;;  %v6726_v53 = vpop.f32.mrf.mxu0 }
 0x2c1   : > { %v1753_v50 = vsel %vm1750_vm10, %v1752_v32, %v1748_v52  ;;  %5298 = vrcp.f32 %v6675_v23  ;;  %v1618_v49 = vpop.f32.mrf.mxu3  ;;  %vm1762_vm14 = vmor %vm1760_vm13, %vm1761_vm12  ;;  %vm1775_vm3 = vweird.f32 %v6675_v23 }
 0x2c2   : > { %v6697_v3 = vmul.f32 %v1753_v50, %v6598_v17  ;;  %v1757_v44 = vsub.f32 1.0, %v1756_v1  ;;  %v6699_v43 = vpop.f32.mrf.mxu2  ;;  %v1646_v51 = vadd.f32 %v1618_v49, %v1553_v36  ;;  %v1554_v1 = vadd.f32 %v6593_v62, %v1496_v59  ;;  %v7909_v36 = vld [vmem:[#allocation12_spill] sm:$0xff] }
 0x2c3   : > { %v1472_v37 = vpop.f32.mrf.mxu1  ;;  %v1429_v14 = vadd.f32 %v7909_v36, %v6365_v2 }
 0x2c4   : > { %v2517_v28 = vpack.c.bf16 %v6697_v3, %v6692_v34  ;;  %v1758_v9 = vmul.f32 %v5295_v54, %v1757_v44  ;;  %v6706_v47 = vadd.f32 %v6642_v40, %v1646_v51  ;;  %v1781_v44 = vand.u32 2147483648, %v6675_v23 }
 0x2c5   : > { %v1497_v51 = vadd.f32 %v1472_v37, %v1429_v14  ;;  %v7913_v14 = vld [vmem:[#allocation13_spill] sm:$0xff] }
 0x2c6   : > { %v5297_v17 = vpop.eup %5296  ;;  %v1759_v57 = vadd.f32 %v5295_v54, %v1758_v9  ;;  %v4805_v4 = vmul.f32 -1.442695, %v6706_v47  ;;  %4839 = vmatmul.msk.bf16.gmra.mxu3 %vm629_vm11, %v6297_v22 }
 0x2c7   : > { %v5299_v24 = vpop.eup %5298  ;;  %v6712_v39 = vadd.f32 1.0, %v5297_v17  ;;  %v1555_v36 = vadd.f32 %v6614_v31, %v1497_v51 }
 0x2c8   : > { %v1763_v32 = vsel %vm1762_vm14, %v5295_v54, %v1759_v57  ;;  %v1771_v52 = vmul.f32 %v5299_v24, %v6675_v23  ;;  %5300 = vpow2.f32 %v4805_v4  ;;  %v1779_v54 = vand.u32 2147483647, %v6675_v23  ;;  %v7910_v57 = vld [vmem:[#allocation4_spill] sm:$0xff] }
 0x2c9   : > { %v1768_v27 = vsel %vm1765_vm15, %v1767_v6, %v1763_v32  ;;  %5302 = vrcp.f32 %v6712_v39  ;;  %v1621_v11 = vpop.f32.mrf.mxu3  ;;  %vm1776_vm0 = vweird.f32 %v5299_v24  ;;  %v1782_v4 = vor.u32 1.1754944e-38, %v1781_v44  ;;  %v7911_v32 = vld [vmem:[#allocation24_spill] sm:$0xff] }
 0x2ca   : > { %v6720_v22 = vmul.f32 %v1768_v27, %v6617_v26  ;;  %v1772_v63 = vsub.f32 1.0, %v1771_v52  ;;  %v6722_v50 = vpop.f32.mrf.mxu2  ;;  %v1647_v49 = vadd.f32 %v1621_v11, %v1554_v1  ;;  %vm1777_vm4 = vmor %vm1775_vm3, %vm1776_vm0  ;;  %vm1780_vm5 = vcmp.eq.f32.partialorder %v1779_v54, 8.507059e+37 }
 0x2cb   : > { %v1475_v62 = vpop.f32.mrf.mxu1  ;;  %v7912_v52 = vpack.c.bf16 %v6239_v8, %v7911_v32  ;;  %v1432_v27 = vadd.f32 %v7913_v14, %v6395_v29  ;;  %v1794_v31 = vand.u32 2147483647, %v6712_v39  ;;  %v1796_v54 = vand.u32 2147483648, %v6712_v39  ;;  %v7915_v14 = vld [vmem:[#allocation14_spill] sm:$0xff] }
 0x2cc   : > { %v1773_v61 = vmul.f32 %v5299_v24, %v1772_v63  ;;  %v6731_v26 = vadd.f32 %v6642_v40, %v1647_v49  ;;  %vm1790_vm7 = vweird.f32 %v6712_v39 }
 0x2cd   : > { %v1498_v29 = vadd.f32 %v1475_v62, %v1432_v27  ;;  %v7914_v62 = vld [vmem:[#allocation29_spill] sm:$0xff]  ;;  %vm1795_vm9 = vcmp.eq.f32.partialorder %v1794_v31, 8.507059e+37  ;;  %v1797_v32 = vor.u32 1.1754944e-38, %v1796_v54  ;;  %v1434_v27 = vadd.f32 %v7915_v14, %v6430_v15 }
 0x2ce   : > { %v5301_v59 = vpop.eup %5300  ;;  %v1774_v9 = vadd.f32 %v5299_v24, %v1773_v61  ;;  %v4806_v17 = vmul.f32 -1.442695, %v6731_v26  ;;  %4826 = vmatmul.msk.bf16.gmra.mxu1 %vm629_vm11, %v7910_v57 }
 0x2cf   : > { %v5303_v37 = vpop.eup %5302  ;;  %v6737_v6 = vadd.f32 1.0, %v5301_v59  ;;  %4877 = vmatmul.msk.bf16.vlgmr.msra.gmra.mxu2 %vm2531_vm8, %v7912_v52  ;;  %4902 = vmatmul.msk.bf16.gmra.mxu0 %vm2531_vm8, %v2740_v41 }
 0x2d0   : > { %v1778_v23 = vsel %vm1777_vm4, %v5299_v24, %v1774_v9  ;;  %v1786_v1 = vmul.f32 %v5303_v37, %v6712_v39  ;;  %5304 = vpow2.f32 %v4806_v17  ;;  %v5111_v24 = vld [vmem:[%s7825_s1 + $0x28] sm:$0xff]  ;;  %vm1791_vm6 = vweird.f32 %v5303_v37  ;;  %v6769_v9 = vpop.f32.mrf.mxu0 }
 0x2d1   : > { %v1783_v11 = vsel %vm1780_vm5, %v1782_v4, %v1778_v23  ;;  %5306 = vrcp.f32 %v6737_v6  ;;  %v1623_v8 = vpop.f32.mrf.mxu3  ;;  %2691 = vmatpush.bf16.msra.mxu3 %v5111_v24  ;;  %vm1792_vm2 = vmor %vm1790_vm7, %vm1791_vm6  ;;  %v1811_v31 = vand.u32 2147483648, %v6737_v6  ;;  %vm1805_vm12 = vweird.f32 %v6737_v6 }
 0x2d2   : > { %v6753_v63 = vmul.f32 %v1783_v11, %v6645_v13  ;;  %v1787_v49 = vsub.f32 1.0, %v1786_v1  ;;  %v6755_v38 = vpop.f32.mrf.mxu2  ;;  %v1648_v41 = vadd.f32 %v1623_v8, %v1555_v36  ;;  %v1556_v36 = vadd.f32 %v6637_v55, %v1498_v29 }
 0x2d3   : > { %v1477_v44 = vpop.f32.mrf.mxu1 }
 0x2d4   : > { %v6764_v51 = vpack.c.bf16 %v6753_v63, %v6720_v22  ;;  %v1788_v13 = vmul.f32 %v5303_v37, %v1787_v49  ;;  %v6767_v61 = vadd.f32 %v6642_v40, %v1648_v41  ;;  %v1499_v54 = vadd.f32 %v1477_v44, %v1434_v27 }
 0x2d5   : > { %v1812_v44 = vor.u32 1.1754944e-38, %v1811_v31 }
 0x2d6   : > { %v5305_v59 = vpop.eup %5304  ;;  %v1789_v17 = vadd.f32 %v5303_v37, %v1788_v13  ;;  %v4807_v57 = vmul.f32 -1.442695, %v6767_v61  ;;  %4840 = vmatmul.msk.bf16.gmra.mxu3 %vm629_vm11, %v7914_v62  ;;  %v1557_v14 = vadd.f32 %v6661_v7, %v1499_v54 }
 0x2d7   : > { %v5307_v4 = vpop.eup %5306  ;;  %v1717_v52 = vadd.f32 1.0, %v5305_v59 }
 0x2d8   : > { %v1793_v23 = vsel %vm1792_vm2, %v5303_v37, %v1789_v17  ;;  %v1801_v1 = vmul.f32 %v5307_v4, %v6737_v6  ;;  %5308 = vpow2.f32 %v4807_v57  ;;  %v1809_v37 = vand.u32 2147483647, %v6737_v6  ;;  %v7916_v57 = vld [vmem:[#allocation5_spill] sm:$0xff] }
 0x2d9   : > { %v1798_v39 = vsel %vm1795_vm9, %v1797_v32, %v1793_v23  ;;  %5310 = vrcp.f32 %v1717_v52  ;;  %v1626_v11 = vpop.f32.mrf.mxu3  ;;  %vm1806_vm10 = vweird.f32 %v5307_v4  ;;  %v7917_v23 = vld [vmem:[#allocation27_spill] sm:$0xff]  ;;  %vm1820_vm0 = vweird.f32 %v1717_v52 }
 0x2da   : > { %v6780_v8 = vmul.f32 %v1798_v39, %v6670_v33  ;;  %v1802_v49 = vsub.f32 1.0, %v1801_v1  ;;  %v6782_v41 = vpop.f32.mrf.mxu2  ;;  %v1649_v24 = vadd.f32 %v1626_v11, %v1556_v36  ;;  %vm1807_vm13 = vmor %vm1805_vm12, %vm1806_vm10  ;;  %vm1810_vm14 = vcmp.eq.f32.partialorder %v1809_v37, 8.507059e+37  ;;  %v6801_v1 = vpop.f32.mrf.mxu0  ;;  %v7918_v11 = vld [vmem:[#allocation15_spill] sm:$0xff] }
 0x2db   : > { %v1480_v13 = vpop.f32.mrf.mxu1 }
 0x2dc   : > { %v1803_v15 = vmul.f32 %v5307_v4, %v1802_v49  ;;  %v6789_v29 = vadd.f32 %v6642_v40, %v1649_v24  ;;  %v1437_v49 = vadd.f32 %v7918_v11, %v6463_v45  ;;  %v7919_v11 = vld [vmem:[#allocation16_spill] sm:$0xff] }
 0x2de   : > { %v5309_v33 = vpop.eup %5308  ;;  %v1804_v59 = vadd.f32 %v5307_v4, %v1803_v15  ;;  %v4808_v17 = vmul.f32 -1.442695, %v6789_v29  ;;  %4827 = vmatmul.msk.bf16.gmra.mxu1 %vm629_vm11, %v7916_v57  ;;  %v1500_v7 = vadd.f32 %v1480_v13, %v1437_v49 }
 0x2df   : > { %v5311_v62 = vpop.eup %5310  ;;  %v6795_v32 = vadd.f32 1.0, %v5309_v33  ;;  %4878 = vmatmul.msk.bf16.gmra.mxu2 %vm2531_vm8, %v7917_v23  ;;  %4937 = vmatmul.msk.bf16.vlgmr.msrb.gmra.mxu0 %vm2531_vm8, %v6764_v51  ;;  %v1824_v33 = vand.u32 2147483647, %v1717_v52 }
 0x2e0   : > { %v1808_v6 = vsel %vm1807_vm13, %v5307_v4, %v1804_v59  ;;  %v1816_v36 = vmul.f32 %v5311_v62, %v1717_v52  ;;  %5312 = vpow2.f32 %v4808_v17  ;;  %v1826_v4 = vand.u32 2147483648, %v1717_v52 }
 0x2e1   : > { %v1813_v27 = vsel %vm1810_vm14, %v1812_v44, %v1808_v6  ;;  %5314 = vrcp.f32 %v6795_v32  ;;  %v1628_v39 = vpop.f32.mrf.mxu3  ;;  %vm1821_vm15 = vweird.f32 %v5311_v62  ;;  %vm1825_vm4 = vcmp.eq.f32.partialorder %v1824_v33, 8.507059e+37 }
 0x2e2   : > { %v6808_v24 = vmul.f32 %v1813_v27, %v6706_v47  ;;  %v1817_v37 = vsub.f32 1.0, %v1816_v36  ;;  %v1650_v31 = vadd.f32 %v1628_v39, %v1557_v14  ;;  %v6810_v15 = vpop.f32.mrf.mxu2  ;;  %vm1822_vm3 = vmor %vm1820_vm0, %vm1821_vm15  ;;  %v1827_v36 = vor.u32 1.1754944e-38, %v1826_v4 }
 0x2e3   : > { %v1482_v59 = vpop.f32.mrf.mxu1  ;;  %v1558_v39 = vadd.f32 %v6699_v43, %v1500_v7  ;;  %v1439_v52 = vadd.f32 %v7919_v11, %v6494_v21  ;;  %v1841_v43 = vand.u32 2147483648, %v6795_v32  ;;  %vm1835_vm5 = vweird.f32 %v6795_v32 }
 0x2e4   : > { %v1818_v17 = vmul.f32 %v5311_v62, %v1817_v37  ;;  %v6813_v54 = vadd.f32 %v6642_v40, %v1650_v31  ;;  %v6817_v57 = vpack.c.bf16 %v6808_v24, %v6780_v8 }
 0x2e5   : > { %v1501_v7 = vadd.f32 %v1482_v59, %v1439_v52 }
 0x2e6   : > { %v5313_v45 = vpop.eup %5312  ;;  %v1819_v47 = vadd.f32 %v5311_v62, %v1818_v17  ;;  %v4809_v44 = vmul.f32 -1.442695, %v6813_v54  ;;  %4841 = vmatmul.msk.bf16.gmra.mxu3 %vm629_vm11, %v6442_v12  ;;  %v6829_v12 = vpop.f32.mrf.mxu0  ;;  %v1839_v17 = vand.u32 2147483647, %v6795_v32 }
 0x2e7   : > { %v5315_v6 = vpop.eup %5314  ;;  %v6822_v13 = vadd.f32 1.0, %v5313_v45  ;;  %v1559_v34 = vadd.f32 %v6722_v50, %v1501_v7 }
 0x2e8   : > { %v1823_v14 = vsel %vm1822_vm3, %v5311_v62, %v1819_v47  ;;  %v1831_v27 = vmul.f32 %v5315_v6, %v6795_v32  ;;  %5316 = vpow2.f32 %v4809_v44  ;;  %vm1836_vm11 = vweird.f32 %v5315_v6 }
 0x2e9   : > { %v1828_v49 = vsel %vm1825_vm4, %v1827_v36, %v1823_v14  ;;  %5318 = vrcp.f32 %v6822_v13  ;;  %v1631_v37 = vpop.f32.mrf.mxu3  ;;  %vm1837_vm6 = vmor %vm1835_vm5, %vm1836_vm11  ;;  %vm1840_vm7 = vcmp.eq.f32.partialorder %v1839_v17, 8.507059e+37  ;;  %vm1850_vm9 = vweird.f32 %v6822_v13 }
 0x2ea   : > { %v6832_v31 = vmul.f32 %v1828_v49, %v6731_v26  ;;  %v1832_v33 = vsub.f32 1.0, %v1831_v27  ;;  %v1651_v4 = vadd.f32 %v1631_v37, %v1558_v39  ;;  %v6834_v62 = vpop.f32.mrf.mxu2  ;;  %v5113_v26 = vld [vmem:[%s7825_s1 + $0x38] sm:$0xff]  ;;  %v1842_v39 = vor.u32 1.1754944e-38, %v1841_v43 }
 0x2eb   : > { %v1485_v45 = vpop.f32.mrf.mxu1  ;;  %2857 = vmatpush.bf16.msrb.mxu1 %v5113_v26  ;;  %v7920_v37 = vld [vmem:[#allocation17_spill] sm:$0xff]  ;;  %v1856_v26 = vand.u32 2147483648, %v6822_v13 }
 0x2ec   : > { %v1833_v47 = vmul.f32 %v5315_v6, %v1832_v33  ;;  %v6841_v44 = vadd.f32 %v6642_v40, %v1651_v4  ;;  %v1442_v33 = vadd.f32 %v7920_v37, %v6516_v42 }
 0x2ee   : > { %v5317_v36 = vpop.eup %5316  ;;  %v1834_v14 = vadd.f32 %v5315_v6, %v1833_v47  ;;  %v4810_v27 = vmul.f32 -1.442695, %v6841_v44  ;;  %4867 = vmatmul.msk.bf16.vlgmr.msra.gmra.mxu1 %vm2531_vm8, %v2517_v28  ;;  %v1854_v47 = vand.u32 2147483647, %v6822_v13  ;;  %v6870_v50 = vpop.f32.mrf.mxu0 }
 0x2ef   : > { %v5319_v59 = vpop.eup %5318  ;;  %v6852_v11 = vadd.f32 1.0, %v5317_v36  ;;  %4879 = vmatmul.msk.bf16.gmra.mxu2 %vm2531_vm8, %v6424_v10  ;;  %4938 = vmatmul.msk.bf16.gmra.mxu0 %vm2531_vm8, %v6817_v57 }
 0x2f0   : > { %v1838_v52 = vsel %vm1837_vm6, %v5315_v6, %v1834_v14  ;;  %v1846_v32 = vmul.f32 %v5319_v59, %v6822_v13  ;;  %5320 = vpow2.f32 %v4810_v27  ;;  %vm1851_vm2 = vweird.f32 %v5319_v59 }
 0x2f1   : > { %v1843_v28 = vsel %vm1840_vm7, %v1842_v39, %v1838_v52  ;;  %5322 = vrcp.f32 %v6852_v11  ;;  %v1633_v49 = vpop.f32.mrf.mxu3  ;;  %v1502_v14 = vadd.f32 %v1485_v45, %v1442_v33  ;;  %vm1852_vm10 = vmor %vm1850_vm9, %vm1851_vm2  ;;  %vm1855_vm12 = vcmp.eq.f32.partialorder %v1854_v47, 8.507059e+37  ;;  %v7921_v33 = vld [vmem:[#allocation18_spill] sm:$0xff] }
 0x2f2   : > { %v6864_v4 = vmul.f32 %v1843_v28, %v6767_v61  ;;  %v1847_v17 = vsub.f32 1.0, %v1846_v32  ;;  %v1652_v6 = vadd.f32 %v1633_v49, %v1559_v34  ;;  %v6866_v43 = vpop.f32.mrf.mxu2  ;;  %v1857_v34 = vor.u32 1.1754944e-38, %v1856_v26 }
 0x2f3   : > { %v1487_v36 = vpop.f32.mrf.mxu1  ;;  %v1560_v37 = vadd.f32 %v6755_v38, %v1502_v14  ;;  %v1871_v26 = vand.u32 2147483648, %v6852_v11  ;;  %vm1865_vm14 = vweird.f32 %v6852_v11 }
 0x2f4   : > { %v1848_v7 = vmul.f32 %v5319_v59, %v1847_v17  ;;  %v6873_v27 = vadd.f32 %v6642_v40, %v1652_v6  ;;  %v6877_v42 = vpack.c.bf16 %v6864_v4, %v6832_v31  ;;  %v1444_v17 = vadd.f32 %v7921_v33, %v6541_v16 }
 0x2f6   : > { %v5321_v61 = vpop.eup %5320  ;;  %v1849_v39 = vadd.f32 %v5319_v59, %v1848_v7  ;;  %v4811_v52 = vmul.f32 -1.442695, %v6873_v27 }
 0x2f7   : > { %v5323_v32 = vpop.eup %5322  ;;  %v1721_v28 = vadd.f32 1.0, %v5321_v61  ;;  %v1503_v61 = vadd.f32 %v1487_v36, %v1444_v17 }
 0x2f8   : > { %v1853_v49 = vsel %vm1852_vm10, %v5319_v59, %v1849_v39  ;;  %v1861_v45 = vmul.f32 %v5323_v32, %v6852_v11  ;;  %5324 = vpow2.f32 %v4811_v52  ;;  %v1869_v59 = vand.u32 2147483647, %v6852_v11  ;;  %v6897_v52 = vpop.f32.mrf.mxu0 }
 0x2f9   : > { %v1858_v6 = vsel %vm1855_vm12, %v1857_v34, %v1853_v49  ;;  %5326 = vrcp.f32 %v1721_v28  ;;  %v1636_v7 = vpop.f32.mrf.mxu3  ;;  %vm1866_vm13 = vweird.f32 %v5323_v32  ;;  %v1561_v11 = vadd.f32 %v6782_v41, %v1503_v61 }
 0x2fa   : > { %v6886_v13 = vmul.f32 %v1858_v6, %v6789_v29  ;;  %v1862_v19 = vsub.f32 1.0, %v1861_v45  ;;  %v1653_v21 = vadd.f32 %v1636_v7, %v1560_v37  ;;  %v6888_v47 = vpop.f32.mrf.mxu2  ;;  %vm1867_vm15 = vmor %vm1865_vm14, %vm1866_vm13  ;;  %vm1870_vm0 = vcmp.eq.f32.partialorder %v1869_v59, 8.507059e+37 }
 0x2fb   : > { %v2002_v39 = vpop.f32.mrf.mxu1  ;;  %v1872_v45 = vor.u32 1.1754944e-38, %v1871_v26  ;;  %v1884_v26 = vand.u32 2147483647, %v1721_v28  ;;  %vm1880_vm4 = vweird.f32 %v1721_v28 }
 0x2fc   : > { %v1863_v16 = vmul.f32 %v5323_v32, %v1862_v19  ;;  %v6895_v14 = vadd.f32 %v6642_v40, %v1653_v21 }
 0x2fd   : > { %vm1885_vm5 = vcmp.eq.f32.partialorder %v1884_v26, 8.507059e+37 }
 0x2fe   : > { %v5325_v29 = vpop.eup %5324  ;;  %v1864_v34 = vadd.f32 %v5323_v32, %v1863_v16  ;;  %v4812_v49 = vmul.f32 -1.442695, %v6895_v14  ;;  %4868 = vmatmul.msk.bf16.gmra.mxu1 %vm2531_vm8, %v6764_v51 }
 0x2ff   : > { %v5327_v36 = vpop.eup %5326  ;;  %v6903_v19 = vadd.f32 1.0, %v5325_v29  ;;  %4880 = vmatmul.msk.bf16.gmra.mxu2 %vm2531_vm8, %v6461_v5  ;;  %4939 = vmatmul.msk.bf16.gmra.mxu0 %vm2531_vm8, %v6877_v42 }
 0x300   : > { %v1868_v21 = vsel %vm1867_vm15, %v5323_v32, %v1864_v34  ;;  %v1876_v37 = vmul.f32 %v5327_v36, %v1721_v28  ;;  %5328 = vpow2.f32 %v4812_v49  ;;  %v1886_v32 = vand.u32 2147483648, %v1721_v28  ;;  %v7922_v34 = vld [vmem:[#allocation19_spill] sm:$0xff] }
 0x301   : > { %v1873_v33 = vsel %vm1870_vm0, %v1872_v45, %v1868_v21  ;;  %5330 = vrcp.f32 %v6903_v19  ;;  %v1638_v51 = vpop.f32.mrf.mxu3  ;;  %vm1881_vm3 = vweird.f32 %v5327_v36  ;;  %v2003_v49 = vadd.f32 %v2002_v39, %v7922_v34 }
 0x302   : > { %v6912_v17 = vmul.f32 %v1873_v33, %v6813_v54  ;;  %v1877_v6 = vsub.f32 1.0, %v1876_v37  ;;  %v1654_v7 = vadd.f32 %v1638_v51, %v1561_v11  ;;  %v6914_v59 = vpop.f32.mrf.mxu2  ;;  %vm1882_vm11 = vmor %vm1880_vm4, %vm1881_vm3  ;;  %v1887_v11 = vor.u32 1.1754944e-38, %v1886_v32  ;;  %v6927_v51 = vpop.f32.mrf.mxu0 }
 0x303   : > { %v2004_v16 = vpop.f32.mrf.mxu1  ;;  %vm1895_vm7 = vweird.f32 %v6903_v19 }
 0x304   : > { %v1878_v29 = vmul.f32 %v5327_v36, %v1877_v6  ;;  %v6918_v41 = vadd.f32 %v6642_v40, %v1654_v7  ;;  %v6922_v61 = vpack.c.bf16 %v6912_v17, %v6886_v13  ;;  %v2081_v7 = vadd.f32 %v6810_v15, %v2003_v49 }
 0x306   : > { %v5329_v54 = vpop.eup %5328  ;;  %v1879_v45 = vadd.f32 %v5327_v36, %v1878_v29  ;;  %v4813_v21 = vmul.f32 -1.442695, %v6918_v41 }
 0x307   : > { %v5331_v37 = vpop.eup %5330  ;;  %v6925_v33 = vadd.f32 1.0, %v5329_v54  ;;  %v1899_v54 = vand.u32 2147483647, %v6903_v19 }
 0x308   : > { %v1883_v39 = vsel %vm1882_vm11, %v5327_v36, %v1879_v45  ;;  %v1891_v6 = vmul.f32 %v5331_v37, %v6903_v19  ;;  %5332 = vpow2.f32 %v4813_v21  ;;  %v1901_v36 = vand.u32 2147483648, %v6903_v19 }
 0x309   : > { %v1888_v34 = vsel %vm1885_vm5, %v1887_v11, %v1883_v39  ;;  %5334 = vrcp.f32 %v6925_v33  ;;  %v2104_v28 = vpop.f32.mrf.mxu3  ;;  %vm1896_vm6 = vweird.f32 %v5331_v37  ;;  %v7923_v11 = vld [vmem:[#allocation20_spill] sm:$0xff]  ;;  %vm1900_vm9 = vcmp.eq.f32.partialorder %v1899_v54, 8.507059e+37 }
 0x30a   : > { %v6933_v29 = vmul.f32 %v1888_v34, %v6841_v44  ;;  %v1892_v38 = vsub.f32 1.0, %v1891_v6  ;;  %v6935_v26 = vpop.f32.mrf.mxu2  ;;  %v2139_v32 = vadd.f32 %v2104_v28, %v2081_v7  ;;  %v2005_v39 = vadd.f32 %v2004_v16, %v7923_v11  ;;  %vm1897_vm2 = vmor %vm1895_vm7, %vm1896_vm6 }
 0x30b   : > { %v2007_v45 = vpop.f32.mrf.mxu1  ;;  %v1902_v28 = vor.u32 1.1754944e-38, %v1901_v36  ;;  %v6959_v36 = vpop.f32.mrf.mxu0  ;;  %v1916_v11 = vand.u32 2147483648, %v6925_v33  ;;  %vm1910_vm12 = vweird.f32 %v6925_v33 }
 0x30c   : > { %v1893_v15 = vmul.f32 %v5331_v37, %v1892_v38  ;;  %v2201_v49 = vadd.f32 %v6619_v46, %v2139_v32 }
 0x30e   : > { %v5333_v44 = vpop.eup %5332  ;;  %v1894_v34 = vadd.f32 %v5331_v37, %v1893_v15  ;;  %v6945_v6 = vadd.f32 %v6642_v40, %v2201_v49  ;;  %4869 = vmatmul.msk.bf16.gmra.mxu1 %vm2531_vm8, %v6817_v57  ;;  %v2082_v57 = vadd.f32 %v6834_v62, %v2005_v39  ;;  %v1914_v49 = vand.u32 2147483647, %v6925_v33 }
 0x30f   : > { %v5335_v7 = vpop.eup %5334  ;;  %v6949_v21 = vadd.f32 1.0, %v5333_v44  ;;  %4881 = vmatmul.msk.bf16.gmra.mxu2 %vm2531_vm8, %v6523_v60  ;;  %4940 = vmatmul.msk.bf16.gmra.mxu0 %vm2531_vm8, %v6922_v61 }
 0x310   : > { %v1898_v46 = vsel %vm1897_vm2, %v5331_v37, %v1894_v34  ;;  %v1906_v38 = vmul.f32 %v5335_v7, %v6925_v33  ;;  %v4849_v19 = vmul.f32 -1.442695, %v6945_v6  ;;  %vm1911_vm10 = vweird.f32 %v5335_v7 }
 0x311   : > { %v1903_v16 = vsel %vm1900_vm9, %v1902_v28, %v1898_v46  ;;  %5336 = vrcp.f32 %v6949_v21  ;;  %v2106_v32 = vpop.f32.mrf.mxu3  ;;  %v7924_v46 = vld [vmem:[#allocation22_spill] sm:$0xff]  ;;  %vm1912_vm13 = vmor %vm1910_vm12, %vm1911_vm10  ;;  %vm1915_vm14 = vcmp.eq.f32.partialorder %v1914_v49, 8.507059e+37  ;;  %v1931_v49 = vand.u32 2147483648, %v6949_v21 }
 0x312   : > { %v6962_v15 = vmul.f32 %v1903_v16, %v6873_v27  ;;  %v1907_v37 = vsub.f32 1.0, %v1906_v38  ;;  %5338 = vpow2.f32 %v4849_v19  ;;  %v6964_v54 = vpop.f32.mrf.mxu2  ;;  %v2140_v44 = vadd.f32 %v2106_v32, %v2082_v57 }
 0x313   : > { %v2009_v34 = vpop.f32.mrf.mxu1  ;;  %v2008_v62 = vadd.f32 %v2007_v45, %v7924_v46  ;;  %v1917_v16 = vor.u32 1.1754944e-38, %v1916_v11  ;;  %vm1925_vm0 = vweird.f32 %v6949_v21 }
 0x314   : > { %v1908_v28 = vmul.f32 %v5335_v7, %v1907_v37  ;;  %v6971_v39 = vpack.c.bf16 %v6962_v15, %v6933_v29  ;;  %v2202_v27 = vadd.f32 %v6653_v25, %v2140_v44 }
 0x315   : > { %v2083_v37 = vadd.f32 %v6866_v43, %v2008_v62  ;;  %v6991_v62 = vpop.f32.mrf.mxu0 }
 0x316   : > { %v1909_v38 = vadd.f32 %v5335_v7, %v1908_v28  ;;  %v6976_v55 = vadd.f32 %v6642_v40, %v2202_v27 }
 0x317   : > { %v5337_v19 = vpop.eup %5336 }
 0x318   : > { %v5339_v57 = vpop.eup %5338  ;;  %v1913_v32 = vsel %vm1912_vm13, %v5335_v7, %v1909_v38  ;;  %v1921_v45 = vmul.f32 %v5337_v19, %v6949_v21  ;;  %v4850_v25 = vmul.f32 -1.442695, %v6976_v55  ;;  %vm1926_vm15 = vweird.f32 %v5337_v19 }
 0x319   : > { %v1918_v46 = vsel %vm1915_vm14, %v1917_v16, %v1913_v32  ;;  %v6980_v2 = vadd.f32 1.0, %v5339_v57  ;;  %v2109_v44 = vpop.f32.mrf.mxu3  ;;  %v1929_v7 = vand.u32 2147483647, %v6949_v21  ;;  %v7925_v57 = vld [vmem:[#allocation23_spill] sm:$0xff]  ;;  %vm1927_vm3 = vmor %vm1925_vm0, %vm1926_vm15 }
 0x31a   : > { %v6984_v33 = vmul.f32 %v1918_v46, %v6895_v14  ;;  %v1922_v11 = vsub.f32 1.0, %v1921_v45  ;;  %v6986_v28 = vpop.f32.mrf.mxu2  ;;  %v2141_v27 = vadd.f32 %v2109_v44, %v2083_v37  ;;  %v2010_v32 = vadd.f32 %v2009_v34, %v7925_v57 }
 0x31b   : > { %5340 = vrcp.f32 %v6980_v2  ;;  %v2012_v43 = vpop.f32.mrf.mxu1  ;;  %v1932_v46 = vor.u32 1.1754944e-38, %v1931_v49  ;;  %vm1930_vm4 = vcmp.eq.f32.partialorder %v1929_v7, 8.507059e+37  ;;  %vm2290_vm5 = vweird.f32 %v6980_v2 }
 0x31c   : > { %v1923_v16 = vmul.f32 %v5337_v19, %v1922_v11  ;;  %5342 = vpow2.f32 %v4850_v25  ;;  %v2203_v14 = vadd.f32 %v6694_v48, %v2141_v27  ;;  %v2084_v44 = vadd.f32 %v6888_v47, %v2010_v32 }
 0x31e   : > { %v1924_v45 = vadd.f32 %v5337_v19, %v1923_v16  ;;  %v6999_v37 = vadd.f32 %v6642_v40, %v2203_v14  ;;  %4870 = vmatmul.msk.bf16.gmra.mxu1 %vm2531_vm8, %v6877_v42 }
 0x31f   : > { %4882 = vmatmul.msk.bf16.gmra.mxu2 %vm2531_vm8, %v6564_v56  ;;  %4941 = vmatmul.msk.bf16.gmra.mxu0 %vm2531_vm8, %v6971_v39 }
 0x320   : > { %v1928_v25 = vsel %vm1927_vm3, %v5337_v19, %v1924_v45  ;;  %v4851_v48 = vmul.f32 -1.442695, %v6999_v37  ;;  %v5114_v19 = vld [vmem:[%s7825_s1 + $0x40] sm:$0xff] }
 0x321   : > { %v5341_v21 = vpop.eup %5340  ;;  %v1933_v34 = vsel %vm1930_vm4, %v1932_v46, %v1928_v25  ;;  %v2111_v11 = vpop.f32.mrf.mxu3  ;;  %v7926_v46 = vld [vmem:[#allocation25_spill] sm:$0xff]  ;;  %2940 = vmatpush.bf16.msrb.mxu2 %v5114_v19 }
 0x322   : > { %v5343_v27 = vpop.eup %5342  ;;  %v1948_v42 = vmul.f32 %v1933_v34, %v6918_v41  ;;  %v2286_v49 = vmul.f32 %v5341_v21, %v6980_v2  ;;  %5344 = vpow2.f32 %v4851_v48  ;;  %v7012_v16 = vpop.f32.mrf.mxu2  ;;  %v2142_v14 = vadd.f32 %v2111_v11, %v2084_v44 }
 0x323   : > { %v2272_v7 = vadd.f32 1.0, %v5343_v27  ;;  %v2014_v57 = vpop.f32.mrf.mxu1  ;;  %v2013_v25 = vadd.f32 %v2012_v43, %v7926_v46  ;;  %v7019_v41 = vpop.f32.mrf.mxu0  ;;  %vm2291_vm11 = vweird.f32 %v5341_v21 }
 0x324   : > { %v2287_v45 = vsub.f32 1.0, %v2286_v49  ;;  %v3047_v47 = vpack.c.bf16 %v1948_v42, %v6984_v33  ;;  %v2204_v32 = vadd.f32 %v6726_v53, %v2142_v14  ;;  %v2296_v14 = vand.u32 2147483648, %v6980_v2  ;;  %vm7037_vm6 = vmor %vm2290_vm5, %vm2291_vm11 }
 0x325   : > { %5346 = vrcp.f32 %v2272_v7  ;;  %v2085_v27 = vadd.f32 %v6914_v59, %v2013_v25  ;;  %v2294_v59 = vand.u32 2147483647, %v6980_v2  ;;  %vm2305_vm9 = vweird.f32 %v2272_v7 }
 0x326   : > { %v2288_v48 = vmul.f32 %v5341_v21, %v2287_v45  ;;  %v7023_v38 = vadd.f32 %v6642_v40, %v2204_v32  ;;  %v7927_v32 = vld [vmem:[#allocation26_spill] sm:$0xff] }
 0x327   : > { %v2015_v18 = vadd.f32 %v2014_v57, %v7927_v32  ;;  %v2311_v57 = vand.u32 2147483648, %v2272_v7  ;;  %vm2295_vm2 = vcmp.eq.f32.partialorder %v2294_v59, 8.507059e+37 }
 0x328   : > { %v5345_v34 = vpop.eup %5344  ;;  %v4852_v43 = vmul.f32 -1.442695, %v7023_v38  ;;  %v2289_v46 = vadd.f32 %v5341_v21, %v2288_v48 }
 0x329   : > { %v7026_v44 = vadd.f32 1.0, %v5345_v34  ;;  %v2114_v11 = vpop.f32.mrf.mxu3 }
 0x32a   : > { %v7029_v49 = vpop.f32.mrf.mxu2  ;;  %v2143_v42 = vadd.f32 %v2114_v11, %v2085_v27  ;;  %v2293_v27 = vsel %vm7037_vm6, %v5341_v21, %v2289_v46  ;;  %v2309_v11 = vand.u32 2147483647, %v2272_v7 }
 0x32b   : > { %v5347_v19 = vpop.eup %5346  ;;  %5348 = vrcp.f32 %v7026_v44  ;;  %v2017_v53 = vpop.f32.mrf.mxu1  ;;  %v2324_v5 = vand.u32 2147483647, %v7026_v44  ;;  %vm2320_vm14 = vweird.f32 %v7026_v44 }
 0x32c   : > { %v2301_v45 = vmul.f32 %v5347_v19, %v2272_v7  ;;  %5350 = vpow2.f32 %v4852_v43  ;;  %v2205_v25 = vadd.f32 %v6769_v9, %v2143_v42  ;;  %v7048_v2 = vpop.f32.mrf.mxu0  ;;  %v2297_v43 = vor.u32 1.1754944e-38, %v2296_v14 }
 0x32d   : > { %vm2306_vm7 = vweird.f32 %v5347_v19  ;;  %v2086_v42 = vadd.f32 %v6935_v26, %v2015_v18  ;;  %vm2310_vm12 = vcmp.eq.f32.partialorder %v2309_v11, 8.507059e+37  ;;  %vm2325_vm0 = vcmp.eq.f32.partialorder %v2324_v5, 8.507059e+37 }
 0x32e   : > { %v2302_v48 = vsub.f32 1.0, %v2301_v45  ;;  %4871 = vmatmul.msk.bf16.gmra.mxu1 %vm2531_vm8, %v6922_v61  ;;  %v7046_v32 = vadd.f32 %v6642_v40, %v2205_v25  ;;  %v2298_v46 = vsel %vm2295_vm2, %v2297_v43, %v2293_v27  ;;  %vm2307_vm10 = vmor %vm2305_vm9, %vm2306_vm7 }
 0x32f   : > { %4942 = vmatmul.msk.bf16.gmra.mxu0 %vm2531_vm8, %v3047_v47  ;;  %v7930_v47 = vld [vmem:[#allocation28_spill] sm:$0xff]  ;;  %v2495_v43 = vmul.f32 %v2298_v46, %v6945_v6 }
 0x330   : > { %v2303_v9 = vmul.f32 %v5347_v19, %v2302_v48  ;;  %v4853_v61 = vmul.f32 -1.442695, %v7046_v32  ;;  %v2312_v48 = vor.u32 1.1754944e-38, %v2311_v57  ;;  %v2018_v18 = vadd.f32 %v2017_v53, %v7930_v47 }
 0x331   : > { %v5349_v45 = vpop.eup %5348  ;;  %v2116_v21 = vpop.f32.mrf.mxu3 }
 0x332   : > { %v2304_v34 = vadd.f32 %v5347_v19, %v2303_v9  ;;  %v2316_v25 = vmul.f32 %v5349_v45, %v7026_v44  ;;  %v7054_v0 = vpop.f32.mrf.mxu2  ;;  %v2144_v56 = vadd.f32 %v2116_v21, %v2086_v42  ;;  %v5351_v14 = vpop.eup %5350  ;;  %5352 = vpow2.f32 %v4853_v61 }
 0x333   : > { %v2019_v26 = vpop.f32.mrf.mxu1  ;;  %v7057_v60 = vadd.f32 1.0, %v5351_v14  ;;  %v2326_v42 = vand.u32 2147483648, %v7026_v44  ;;  %vm2321_vm13 = vweird.f32 %v5349_v45 }
 0x334   : > { %v2308_v59 = vsel %vm2307_vm10, %v5347_v19, %v2304_v34  ;;  %v2317_v7 = vsub.f32 1.0, %v2316_v25  ;;  %v2206_v27 = vadd.f32 %v6801_v1, %v2144_v56  ;;  %v2087_v56 = vadd.f32 %v6964_v54, %v2018_v18  ;;  %vm2322_vm15 = vmor %vm2320_vm14, %vm2321_vm13 }
 0x335   : > { %v2313_v9 = vsel %vm2310_vm12, %v2312_v48, %v2308_v59  ;;  %5354 = vrcp.f32 %v7057_v60  ;;  %v2327_v6 = vor.u32 1.1754944e-38, %v2326_v42  ;;  %v2020_v47 = vadd.f32 %v2019_v26, %v6391_v58 }
 0x336   : > { %v2496_v11 = vmul.f32 %v2313_v9, %v6976_v55  ;;  %v2318_v57 = vmul.f32 %v5349_v45, %v2317_v7  ;;  %v7066_v19 = vadd.f32 %v6642_v40, %v2206_v27  ;;  %v7086_v7 = vld [vmem:[%s7826_s2 + $0x1] ss:$0 sm:$0xff]  ;;  %v2341_v27 = vand.u32 2147483648, %v7057_v60 }
 0x337   : > { %v2088_v58 = vadd.f32 %v6986_v28, %v2020_v47  ;;  %vm2335_vm4 = vweird.f32 %v7057_v60 }
 0x338   : > { %v2652_v53 = vpack.c.bf16 %v2496_v11, %v2495_v43  ;;  %v2319_v61 = vadd.f32 %v5349_v45, %v2318_v57  ;;  %v5353_v1 = vpop.eup %5352  ;;  %v4854_v21 = vmul.f32 -1.442695, %v7066_v19 }
 0x339   : > { %v2119_v46 = vpop.f32.mrf.mxu3  ;;  %v7071_v34 = vadd.f32 1.0, %v5353_v1  ;;  %v2342_v1 = vor.u32 1.1754944e-38, %v2341_v27 }
 0x33a   : > { %v2323_v55 = vsel %vm2322_vm15, %v5349_v45, %v2319_v61  ;;  %4887 = vmatmul.msk.bf16.vlgmr.msra.gmra.mxu3 %vm2531_vm8, %v2652_v53  ;;  %v7074_v40 = vpop.f32.mrf.mxu2  ;;  %v2145_v25 = vadd.f32 %v2119_v46, %v2087_v56  ;;  %5356 = vpow2.f32 %v4854_v21 }
 0x33b   : > { %v2328_v14 = vsel %vm2325_vm0, %v2327_v6, %v2323_v55  ;;  %v2022_v44 = vpop.f32.mrf.mxu1  ;;  %v5355_v48 = vpop.eup %5354  ;;  %5358 = vrcp.f32 %v7071_v34  ;;  %v2356_v47 = vand.u32 2147483648, %v7071_v34  ;;  %vm2350_vm7 = vweird.f32 %v7071_v34 }
 0x33c   : > { %v2497_v54 = vmul.f32 %v2328_v14, %v6999_v37  ;;  %v2331_v45 = vmul.f32 %v5355_v48, %v7057_v60  ;;  %v2207_v5 = vadd.f32 %v6829_v12, %v2145_v25  ;;  %vm2336_vm3 = vweird.f32 %v5355_v48 }
 0x33d   : > { %vm2337_vm11 = vmor %vm2335_vm4, %vm2336_vm3  ;;  %v2023_v6 = vadd.f32 %v2022_v44, %v6433_v30  ;;  %v2354_v14 = vand.u32 2147483647, %v7071_v34 }
 0x33e   : > { %v2901_v18 = vpack.c.bf16 %v2497_v54, %v2496_v11  ;;  %4872 = vmatmul.msk.bf16.gmra.mxu1 %vm2531_vm8, %v6971_v39  ;;  %v2332_v59 = vsub.f32 1.0, %v2331_v45  ;;  %v7089_v37 = vadd.f32 %v7086_v7, %v2207_v5  ;;  %v2339_v39 = vand.u32 2147483647, %v7057_v60  ;;  %v5115_v60 = vld [vmem:[%s7825_s1 + $0x48] sm:$0xff] }
 0x33f   : > { %3003 = vmatpush.bf16.msrb.mxu3 %v5115_v60  ;;  %v2089_v44 = vadd.f32 %v7012_v16, %v2023_v6  ;;  %vm2355_vm9 = vcmp.eq.f32.partialorder %v2354_v14, 8.507059e+37 }
 0x340   : > { %4917 = vmatmul.msk.bf16.vlgmr.msrb.gmra.mxu2 %vm2531_vm8, %v2901_v18  ;;  %v5357_v12 = vpop.eup %5356  ;;  %v2333_v26 = vmul.f32 %v5355_v48, %v2332_v59  ;;  %v4855_v43 = vmul.f32 -1.442695, %v7089_v37  ;;  %vm2340_vm5 = vcmp.eq.f32.partialorder %v2339_v39, 8.507059e+37 }
 0x341   : > { %v2121_v9 = vpop.f32.mrf.mxu3  ;;  %v5359_v42 = vpop.eup %5358  ;;  %v7096_v11 = vadd.f32 1.0, %v5357_v12 }
 0x342   : > { %v2146_v57 = vadd.f32 %v2121_v9, %v2088_v58  ;;  %v2334_v53 = vadd.f32 %v5355_v48, %v2333_v26  ;;  %v2346_v61 = vmul.f32 %v5359_v42, %v7071_v34  ;;  %5360 = vpow2.f32 %v4855_v43  ;;  %v7100_v56 = vpop.f32.mrf.mxu2 }
 0x343   : > { %v2024_v28 = vpop.f32.mrf.mxu1  ;;  %5362 = vrcp.f32 %v7096_v11  ;;  %vm2351_vm6 = vweird.f32 %v5359_v42  ;;  %v2369_v6 = vand.u32 2147483647, %v7096_v11  ;;  %vm2365_vm12 = vweird.f32 %v7096_v11 }
 0x344   : > { %v2338_v21 = vsel %vm2337_vm11, %v5355_v48, %v2334_v53  ;;  %v2347_v46 = vsub.f32 1.0, %v2346_v61  ;;  %v2208_v55 = vadd.f32 %v6870_v50, %v2146_v57  ;;  %vm2352_vm2 = vmor %vm2350_vm7, %vm2351_vm6 }
 0x345   : > { %v2343_v25 = vsel %vm2340_vm5, %v2342_v1, %v2338_v21  ;;  %v5117_v1 = vld [vmem:[%s7825_s1 + $0x58] sm:$0xff]  ;;  %v2371_v21 = vand.u32 2147483648, %v7096_v11  ;;  %vm2370_vm14 = vcmp.eq.f32.partialorder %v2369_v6, 8.507059e+37 }
 0x346   : > { %v2498_v45 = vmul.f32 %v2343_v25, %v7023_v38  ;;  %v2348_v5 = vmul.f32 %v5359_v42, %v2347_v46  ;;  %v7112_v30 = vadd.f32 %v7086_v7, %v2208_v55  ;;  %v2357_v38 = vor.u32 1.1754944e-38, %v2356_v47  ;;  %3129 = vmatpush.bf16.msra.mxu1 %v5117_v1 }
 0x347   : > { %v7932_v46 = vpack.c.bf16 %v6720_v22, %v6697_v3  ;;  %v2372_v47 = vor.u32 1.1754944e-38, %v2371_v21 }
 0x348   : > { %v5361_v50 = vpop.eup %5360  ;;  %v2349_v48 = vadd.f32 %v5359_v42, %v2348_v5  ;;  %v4856_v18 = vmul.f32 -1.442695, %v7112_v30  ;;  %v7117_v59 = vpack.c.bf16 %v2498_v45, %v2497_v54  ;;  %v7931_v54 = vld [vmem:[#allocation31_spill] sm:$0xff] }
 0x349   : > { %v2124_v27 = vpop.f32.mrf.mxu3  ;;  %v5363_v58 = vpop.eup %5362  ;;  %v7119_v12 = vadd.f32 1.0, %v5361_v50  ;;  %v2025_v9 = vadd.f32 %v2024_v28, %v7931_v54 }
 0x34a   : > { %v2147_v26 = vadd.f32 %v2124_v27, %v2089_v44  ;;  %v2353_v39 = vsel %vm2352_vm2, %v5359_v42, %v2349_v48  ;;  %v2361_v43 = vmul.f32 %v5363_v58, %v7096_v11  ;;  %5364 = vpow2.f32 %v4856_v18  ;;  %4888 = vmatmul.msk.bf16.gmra.mxu3 %vm2531_vm8, %v7117_v59  ;;  %v7127_v61 = vpop.f32.mrf.mxu2  ;;  %v7933_v11 = vld [vmem:[#allocation32_spill] sm:$0xff] }
 0x34b   : > { %v2027_v16 = vpop.f32.mrf.mxu1  ;;  %v2358_v34 = vsel %vm2355_vm9, %v2357_v38, %v2353_v39  ;;  %5366 = vrcp.f32 %v7119_v12  ;;  %vm2366_vm10 = vweird.f32 %v5363_v58  ;;  %v2090_v55 = vadd.f32 %v7029_v49, %v2025_v9 }
 0x34c   : > { %v2499_v57 = vmul.f32 %v2358_v34, %v7046_v32  ;;  %v2362_v53 = vsub.f32 1.0, %v2361_v43  ;;  %v2209_v42 = vadd.f32 %v6897_v52, %v2147_v26  ;;  %vm2367_vm13 = vmor %vm2365_vm12, %vm2366_vm10  ;;  %v2028_v18 = vadd.f32 %v2027_v16, %v7933_v11 }
 0x34d   : > { %v2384_v39 = vand.u32 2147483647, %v7119_v12  ;;  %v2386_v43 = vand.u32 2147483648, %v7119_v12  ;;  %vm2380_vm0 = vweird.f32 %v7119_v12 }
 0x34e   : > { %4907 = vmatmul.msk.bf16.vlgmr.msrb.gmra.mxu1 %vm2531_vm8, %v7932_v46  ;;  %v2363_v28 = vmul.f32 %v5363_v58, %v2362_v53  ;;  %v7140_v32 = vadd.f32 %v7086_v7, %v2209_v42  ;;  %v2902_v52 = vpack.c.bf16 %v2499_v57, %v2498_v45  ;;  %v2091_v16 = vadd.f32 %v7054_v0, %v2028_v18 }
 0x34f   : > { %v2387_v6 = vor.u32 1.1754944e-38, %v2386_v43  ;;  %vm2385_vm4 = vcmp.eq.f32.partialorder %v2384_v39, 8.507059e+37 }
 0x350   : > { %v5365_v60 = vpop.eup %5364  ;;  %v2364_v25 = vadd.f32 %v5363_v58, %v2363_v28  ;;  %v4857_v14 = vmul.f32 -1.442695, %v7140_v32  ;;  %4918 = vmatmul.msk.bf16.gmra.mxu2 %vm2531_vm8, %v2902_v52 }
 0x351   : > { %v2126_v3 = vpop.f32.mrf.mxu3  ;;  %v5367_v22 = vpop.eup %5366  ;;  %v7146_v5 = vadd.f32 1.0, %v5365_v60 }
 0x352   : > { %v2148_v44 = vadd.f32 %v2126_v3, %v2090_v55  ;;  %v2368_v50 = vsel %vm2367_vm13, %v5363_v58, %v2364_v25  ;;  %v2376_v45 = vmul.f32 %v5367_v22, %v7119_v12  ;;  %5368 = vpow2.f32 %v4857_v14  ;;  %v7158_v54 = vpop.f32.mrf.mxu2  ;;  %v7934_v12 = vld [vmem:[#allocation34_spill] sm:$0xff] }
 0x353   : > { %v2029_v49 = vpop.f32.mrf.mxu1  ;;  %v2373_v48 = vsel %vm2370_vm14, %v2372_v47, %v2368_v50  ;;  %5370 = vrcp.f32 %v7146_v5  ;;  %vm2381_vm15 = vweird.f32 %v5367_v22  ;;  %v2399_v3 = vand.u32 2147483647, %v7146_v5 }
 0x354   : > { %v2500_v27 = vmul.f32 %v2373_v48, %v7066_v19  ;;  %v2377_v38 = vsub.f32 1.0, %v2376_v45  ;;  %v2210_v26 = vadd.f32 %v6927_v51, %v2148_v44  ;;  %vm2382_vm3 = vmor %vm2380_vm0, %vm2381_vm15  ;;  %v2030_v55 = vadd.f32 %v2029_v49, %v7934_v12 }
 0x355   : > { %v7935_v47 = vpack.c.bf16 %v6780_v8, %v6753_v63  ;;  %vm2395_vm5 = vweird.f32 %v7146_v5  ;;  %vm2400_vm7 = vcmp.eq.f32.partialorder %v2399_v3, 8.507059e+37 }
 0x356   : > { %v2378_v58 = vmul.f32 %v5367_v22, %v2377_v38  ;;  %v7156_v34 = vadd.f32 %v7086_v7, %v2210_v26  ;;  %v7160_v9 = vpack.c.bf16 %v2500_v27, %v2499_v57 }
 0x358   : > { %v5369_v53 = vpop.eup %5368  ;;  %v2379_v19 = vadd.f32 %v5367_v22, %v2378_v58  ;;  %v4858_v51 = vmul.f32 -1.442695, %v7156_v34 }
 0x359   : > { %v2129_v42 = vpop.f32.mrf.mxu3  ;;  %v5371_v1 = vpop.eup %5370  ;;  %v7165_v21 = vadd.f32 1.0, %v5369_v53 }
 0x35a   : > { %v2149_v46 = vadd.f32 %v2129_v42, %v2091_v16  ;;  %v2383_v28 = vsel %vm2382_vm3, %v5367_v22, %v2379_v19  ;;  %v2391_v57 = vmul.f32 %v5371_v1, %v7146_v5  ;;  %5372 = vpow2.f32 %v4858_v51  ;;  %4889 = vmatmul.msk.bf16.gmra.mxu3 %vm2531_vm8, %v7160_v9  ;;  %v7186_v11 = vpop.f32.mrf.mxu2 }
 0x35b   : > { %v2032_v0 = vpop.f32.mrf.mxu1  ;;  %v2388_v52 = vsel %vm2385_vm4, %v2387_v6, %v2383_v28  ;;  %5374 = vrcp.f32 %v7165_v21  ;;  %v2401_v22 = vand.u32 2147483648, %v7146_v5  ;;  %vm2396_vm11 = vweird.f32 %v5371_v1 }
 0x35c   : > { %v2501_v60 = vmul.f32 %v2388_v52, %v7089_v37  ;;  %v2392_v25 = vsub.f32 1.0, %v2391_v57  ;;  %v2211_v14 = vadd.f32 %v6959_v36, %v2149_v46  ;;  %v2092_v37 = vadd.f32 %v7074_v40, %v2030_v55  ;;  %vm2397_vm6 = vmor %vm2395_vm5, %vm2396_vm11 }
 0x35d   : > { %v2402_v18 = vor.u32 1.1754944e-38, %v2401_v22  ;;  %v2033_v43 = vadd.f32 %v2032_v0, %v6569_v20  ;;  %v2414_v19 = vand.u32 2147483647, %v7165_v21  ;;  %v2416_v51 = vand.u32 2147483648, %v7165_v21 }
 0x35e   : > { %4908 = vmatmul.msk.bf16.gmra.mxu1 %vm2531_vm8, %v7935_v47  ;;  %v2393_v44 = vmul.f32 %v5371_v1, %v2392_v25  ;;  %v7181_v50 = vadd.f32 %v7086_v7, %v2211_v14  ;;  %v2903_v45 = vpack.c.bf16 %v2501_v60, %v2500_v27  ;;  %vm2410_vm9 = vweird.f32 %v7165_v21 }
 0x35f   : > { %v2093_v20 = vadd.f32 %v7100_v56, %v2033_v43  ;;  %vm2415_vm12 = vcmp.eq.f32.partialorder %v2414_v19, 8.507059e+37 }
 0x360   : > { %v5373_v49 = vpop.eup %5372  ;;  %v2394_v48 = vadd.f32 %v5371_v1, %v2393_v44  ;;  %v4859_v36 = vmul.f32 -1.442695, %v7181_v50  ;;  %4919 = vmatmul.msk.bf16.gmra.mxu2 %vm2531_vm8, %v2903_v45 }
 0x361   : > { %v2131_v63 = vpop.f32.mrf.mxu3  ;;  %v5375_v8 = vpop.eup %5374  ;;  %v7189_v38 = vadd.f32 1.0, %v5373_v49 }
 0x362   : > { %v2150_v26 = vadd.f32 %v2131_v63, %v2092_v37  ;;  %v2398_v27 = vsel %vm2397_vm6, %v5371_v1, %v2394_v48  ;;  %v2406_v40 = vmul.f32 %v5375_v8, %v7165_v21  ;;  %5376 = vpow2.f32 %v4859_v36  ;;  %v2627_v56 = vpop.f32.mrf.mxu2 }
 0x363   : > { %v2034_v39 = vpop.f32.mrf.mxu1  ;;  %v2403_v5 = vsel %vm2400_vm7, %v2402_v18, %v2398_v27  ;;  %5378 = vrcp.f32 %v7189_v38  ;;  %vm2411_vm2 = vweird.f32 %v5375_v8  ;;  %v2429_v47 = vand.u32 2147483647, %v7189_v38 }
 0x364   : > { %v2502_v58 = vmul.f32 %v2403_v5, %v7112_v30  ;;  %v2407_v16 = vsub.f32 1.0, %v2406_v40  ;;  %v2212_v53 = vadd.f32 %v6991_v62, %v2150_v26  ;;  %v2035_v42 = vadd.f32 %v2034_v39, %v6595_v35  ;;  %vm2412_vm10 = vmor %vm2410_vm9, %vm2411_vm2 }
 0x365   : > { %v2417_v35 = vor.u32 1.1754944e-38, %v2416_v51  ;;  %v2431_v44 = vand.u32 2147483648, %v7189_v38  ;;  %v7936_v37 = vpack.c.bf16 %v6832_v31, %v6808_v24  ;;  %vm2425_vm14 = vweird.f32 %v7189_v38 }
 0x366   : > { %v2408_v1 = vmul.f32 %v5375_v8, %v2407_v16  ;;  %v7200_v6 = vadd.f32 %v7086_v7, %v2212_v53  ;;  %v7202_v46 = vpack.c.bf16 %v2502_v58, %v2501_v60  ;;  %v2094_v30 = vadd.f32 %v7127_v61, %v2035_v42 }
 0x367   : > { %v2432_v24 = vor.u32 1.1754944e-38, %v2431_v44  ;;  %vm2430_vm0 = vcmp.eq.f32.partialorder %v2429_v47, 8.507059e+37 }
 0x368   : > { %v5377_v28 = vpop.eup %5376  ;;  %v2409_v57 = vadd.f32 %v5375_v8, %v2408_v1  ;;  %v4860_v62 = vmul.f32 -1.442695, %v7200_v6 }
 0x369   : > { %v2134_v0 = vpop.f32.mrf.mxu3  ;;  %v5379_v52 = vpop.eup %5378  ;;  %v2281_v12 = vadd.f32 1.0, %v5377_v28 }
 0x36a   : > { %v2151_v55 = vadd.f32 %v2134_v0, %v2093_v20  ;;  %v2413_v25 = vsel %vm2412_vm10, %v5375_v8, %v2409_v57  ;;  %v2421_v60 = vmul.f32 %v5379_v52, %v7189_v38  ;;  %5380 = vpow2.f32 %v4860_v62  ;;  %4890 = vmatmul.msk.bf16.gmra.mxu3 %vm2531_vm8, %v7202_v46  ;;  %v7231_v43 = vpop.f32.mrf.mxu2 }
 0x36b   : > { %v2559_v61 = vpop.f32.mrf.mxu1  ;;  %v2418_v14 = vsel %vm2415_vm12, %v2417_v35, %v2413_v25  ;;  %5382 = vrcp.f32 %v2281_v12  ;;  %vm2426_vm13 = vweird.f32 %v5379_v52  ;;  %v2444_v16 = vand.u32 2147483647, %v2281_v12 }
 0x36c   : > { %v2503_v21 = vmul.f32 %v2418_v14, %v7140_v32  ;;  %v2422_v3 = vsub.f32 1.0, %v2421_v60  ;;  %v2213_v22 = vadd.f32 %v7019_v41, %v2151_v55  ;;  %v7216_v45 = vadd.f32 %v7158_v54, %v2559_v61  ;;  %vm2427_vm15 = vmor %vm2425_vm14, %vm2426_vm13 }
 0x36d   : > { %v2446_v53 = vand.u32 2147483648, %v2281_v12  ;;  %vm2440_vm4 = vweird.f32 %v2281_v12  ;;  %vm2445_vm5 = vcmp.eq.f32.partialorder %v2444_v16, 8.507059e+37  ;;  %v7937_v25 = vpack.c.bf16 %v6886_v13, %v6864_v4 }
 0x36e   : > { %4909 = vmatmul.msk.bf16.gmra.mxu1 %vm2531_vm8, %v7936_v37  ;;  %v2423_v49 = vmul.f32 %v5379_v52, %v2422_v3  ;;  %v7223_v48 = vadd.f32 %v7086_v7, %v2213_v22  ;;  %v2904_v32 = vpack.c.bf16 %v2503_v21, %v2502_v58 }
 0x36f   : > { %v2447_v28 = vor.u32 1.1754944e-38, %v2446_v53  ;;  %v7938_v53 = vpack.c.bf16 %v6933_v29, %v6912_v17 }
 0x370   : > { %v5381_v36 = vpop.eup %5380  ;;  %v2424_v41 = vadd.f32 %v5379_v52, %v2423_v49  ;;  %v4861_v63 = vmul.f32 -1.442695, %v7223_v48  ;;  %4920 = vmatmul.msk.bf16.gmra.mxu2 %vm2531_vm8, %v2904_v32 }
 0x371   : > { %v2136_v54 = vpop.f32.mrf.mxu3  ;;  %v5383_v8 = vpop.eup %5382  ;;  %v2282_v31 = vadd.f32 1.0, %v5381_v36 }
 0x372   : > { %v2152_v18 = vadd.f32 %v2136_v54, %v2094_v30  ;;  %v2428_v26 = vsel %vm2427_vm15, %v5379_v52, %v2424_v41  ;;  %v2436_v27 = vmul.f32 %v5383_v8, %v2281_v12  ;;  %5384 = vpow2.f32 %v4861_v63  ;;  %v2632_v14 = vpop.f32.mrf.mxu2 }
 0x373   : > { %v7228_v40 = vpop.f32.mrf.mxu1  ;;  %v2433_v39 = vsel %vm2430_vm0, %v2432_v24, %v2428_v26  ;;  %5386 = vrcp.f32 %v2282_v31  ;;  %vm2441_vm3 = vweird.f32 %v5383_v8  ;;  %v2461_v55 = vand.u32 2147483648, %v2282_v31 }
 0x374   : > { %v2504_v38 = vmul.f32 %v2433_v39, %v7156_v34  ;;  %v2437_v5 = vsub.f32 1.0, %v2436_v27  ;;  %v2214_v58 = vadd.f32 %v7048_v2, %v2152_v18  ;;  %vm2442_vm11 = vmor %vm2440_vm4, %vm2441_vm3  ;;  %v2459_v61 = vand.u32 2147483647, %v2282_v31 }
 0x375   : > { %vm2455_vm7 = vweird.f32 %v2282_v31 }
 0x376   : > { %v2438_v19 = vmul.f32 %v5383_v8, %v2437_v5  ;;  %v7235_v51 = vadd.f32 %v7086_v7, %v2214_v58  ;;  %v7237_v42 = vpack.c.bf16 %v2504_v38, %v2503_v21  ;;  %vm2460_vm9 = vcmp.eq.f32.partialorder %v2459_v61, 8.507059e+37 }
 0x378   : > { %v5385_v1 = vpop.eup %5384  ;;  %v2439_v20 = vadd.f32 %v5383_v8, %v2438_v19  ;;  %v4862_v30 = vmul.f32 -1.442695, %v7235_v51 }
 0x379   : > { %v5387_v34 = vpop.eup %5386  ;;  %v2283_v57 = vadd.f32 1.0, %v5385_v1 }
 0x37a   : > { %v2443_v62 = vsel %vm2442_vm11, %v5383_v8, %v2439_v20  ;;  %v2451_v2 = vmul.f32 %v5387_v34, %v2282_v31  ;;  %5388 = vpow2.f32 %v4862_v30  ;;  %4891 = vmatmul.msk.bf16.gmra.mxu3 %vm2531_vm8, %v7237_v42  ;;  %vm2456_vm6 = vweird.f32 %v5387_v34  ;;  %v7255_v24 = vpop.f32.mrf.mxu2 }
 0x37b   : > { %v2564_v7 = vpop.f32.mrf.mxu1  ;;  %v2448_v0 = vsel %vm2445_vm5, %v2447_v28, %v2443_v62  ;;  %5390 = vrcp.f32 %v2283_v57  ;;  %vm2457_vm2 = vmor %vm2455_vm7, %vm2456_vm6  ;;  %v2476_v36 = vand.u32 2147483648, %v2283_v57  ;;  %v2474_v63 = vand.u32 2147483647, %v2283_v57 }
 0x37c   : > { %v2505_v52 = vmul.f32 %v2448_v0, %v7181_v50  ;;  %v2452_v35 = vsub.f32 1.0, %v2451_v2  ;;  %v7243_v12 = vadd.f32 %v2627_v56, %v2564_v7  ;;  %v2462_v56 = vor.u32 1.1754944e-38, %v2461_v55  ;;  %v2776_v2 = vpop.f32.mrf.mxu0 }
 0x37d   : > { %vm2470_vm12 = vweird.f32 %v2283_v57  ;;  %v2477_v18 = vor.u32 1.1754944e-38, %v2476_v36  ;;  %vm2475_vm14 = vcmp.eq.f32.partialorder %v2474_v63, 8.507059e+37 }
 0x37e   : > { %4910 = vmatmul.msk.bf16.gmra.mxu1 %vm2531_vm8, %v7937_v25  ;;  %v2453_v60 = vmul.f32 %v5387_v34, %v2452_v35  ;;  %v2905_v21 = vpack.c.bf16 %v2505_v52, %v2504_v38  ;;  %v7939_v35 = vpack.c.bf16 %v6984_v33, %v6962_v15 }
 0x380   : > { %v5389_v3 = vpop.eup %5388  ;;  %v2454_v22 = vadd.f32 %v5387_v34, %v2453_v60  ;;  %4921 = vmatmul.msk.bf16.gmra.mxu2 %vm2531_vm8, %v2905_v21 }
 0x381   : > { %v5391_v50 = vpop.eup %5390  ;;  %v2284_v47 = vadd.f32 1.0, %v5389_v3  ;;  %v7940_v3 = vld [vmem:[#allocation30_spill] sm:$0xff] }
 0x382   : > { %v2458_v44 = vsel %vm2457_vm2, %v5387_v34, %v2454_v22  ;;  %v2466_v37 = vmul.f32 %v5391_v50, %v2283_v57  ;;  %vm2471_vm10 = vweird.f32 %v5391_v50  ;;  %v2637_v28 = vpop.f32.mrf.mxu2 }
 0x383   : > { %v7250_v4 = vpop.f32.mrf.mxu1  ;;  %v2463_v13 = vsel %vm2460_vm9, %v2462_v56, %v2458_v44  ;;  %5392 = vrcp.f32 %v2284_v47  ;;  %vm2472_vm13 = vmor %vm2470_vm12, %vm2471_vm10  ;;  %v2491_v16 = vand.u32 2147483648, %v2284_v47  ;;  %v2489_v1 = vand.u32 2147483647, %v2284_v47 }
 0x384   : > { %v2506_v49 = vmul.f32 %v2463_v13, %v7200_v6  ;;  %v2467_v32 = vsub.f32 1.0, %v2466_v37  ;;  %vm2485_vm0 = vweird.f32 %v2284_v47  ;;  %v7941_v13 = vld [vmem:[#allocation33_spill] sm:$0xff]  ;;  %vm3455_vm12 = vcmask 261120  }
 0x385   : > { %v2492_v34 = vor.u32 1.1754944e-38, %v2491_v16  ;;  %vm2490_vm4 = vcmp.eq.f32.partialorder %v2489_v1, 8.507059e+37  ;;  %v7943_v1 = vld [vmem:[#allocation6_spill] sm:$0xff] }
 0x386   : > { %v2468_v41 = vmul.f32 %v5391_v50, %v2467_v32  ;;  %v7253_v54 = vpack.c.bf16 %v2506_v49, %v2505_v52 }
 0x388   : > { %v2469_v8 = vadd.f32 %v5391_v50, %v2468_v41 }
 0x389   : > { %v5393_v31 = vpop.eup %5392 }
 0x38a   : > { %v2473_v26 = vsel %vm2472_vm13, %v5391_v50, %v2469_v8  ;;  %v2481_v27 = vmul.f32 %v5393_v31, %v2284_v47  ;;  %4892 = vmatmul.msk.bf16.gmra.mxu3 %vm2531_vm8, %v7253_v54  ;;  %vm2486_vm15 = vweird.f32 %v5393_v31  ;;  %v7279_v52 = vpop.f32.mrf.mxu2 }
 0x38b   : > { %v2569_v6 = vpop.f32.mrf.mxu1  ;;  %v2478_v39 = vsel %vm2475_vm14, %v2477_v18, %v2473_v26  ;;  %vm2487_vm3 = vmor %vm2485_vm0, %vm2486_vm15  ;;  %v7942_v18 = vld [vmem:[#allocation35_spill] sm:$0xff] }
 0x38c   : > { %v7259_v38 = vadd.f32 %v2632_v14, %v2569_v6  ;;  %v7262_v5 = vmul.f32 %v2478_v39, %v7223_v48  ;;  %v2482_v58 = vsub.f32 1.0, %v2481_v27  ;;  %v5119_v39 = vld [vmem:[%s7825_s1 + $0x68] sm:$0xff] }
 0x38d   : > { %3527 = vmatpush.bf16.msra.mxu3 %v5119_v39 }
 0x38e   : > { %4911 = vmatmul.msk.bf16.gmra.mxu1 %vm2531_vm8, %v7938_v53  ;;  %v2483_v19 = vmul.f32 %v5393_v31, %v2482_v58  ;;  %v2906_v20 = vpack.c.bf16 %v7262_v5, %v2506_v49 }
 0x390   : > { %v2484_v30 = vadd.f32 %v5393_v31, %v2483_v19  ;;  %4922 = vmatmul.msk.bf16.gmra.mxu2 %vm2531_vm8, %v2906_v20 }
 0x392   : > { %v2488_v48 = vsel %vm2487_vm3, %v5393_v31, %v2484_v30  ;;  %v2642_v25 = vpop.f32.mrf.mxu2 }
 0x393   : > { %v7270_v57 = vpop.f32.mrf.mxu1  ;;  %v2493_v62 = vsel %vm2490_vm4, %v2492_v34, %v2488_v48 }
 0x394   : > { %v7273_v17 = vmul.f32 %v2493_v62, %v7235_v51  ;;  %v7287_v51 = vpop.f32.mrf.mxu0 }
 0x396   : > { %v3110_v29 = vpack.c.bf16 %v7273_v17, %v7262_v5 }
 0x39a   : > { %4927 = vmatmul.msk.bf16.vlgmr.msrb.gmra.mxu3 %vm2531_vm8, %v7917_v23  ;;  %v7293_v14 = vpop.f32.mrf.mxu2 }
 0x39b   : > { %v2574_v7 = vpop.f32.mrf.mxu1 }
 0x39c   : > { %v2638_v0 = vadd.f32 %v2637_v28, %v2574_v7  ;;  %v2781_v23 = vpop.f32.mrf.mxu0 }
 0x39e   : > { %4912 = vmatmul.msk.bf16.gmra.mxu1 %vm2531_vm8, %v7939_v35 }
 0x3a2   : > { %v2647_v33 = vpop.f32.mrf.mxu2 }
 0x3a3   : > { %v7285_v55 = vpop.f32.mrf.mxu1 }
 0x3a4   : > { %v7297_v15 = vpop.f32.mrf.mxu0 }
 0x3aa   : > { %4928 = vmatmul.msk.bf16.gmra.mxu3 %vm2531_vm8, %v6424_v10 }
 0x3ab   : > { %v2579_v60 = vpop.f32.mrf.mxu1 }
 0x3ac   : > { %v2643_v61 = vadd.f32 %v2642_v25, %v2579_v60 }
 0x3ae   : > { %4947 = vmatmul.msk.bf16.vlgmr.msra.gmra.mxu1 %vm2531_vm8, %v7117_v59  ;;  %v2786_v59 = vpop.f32.mrf.mxu0 }
 0x3b3   : > { %v7295_v21 = vpop.f32.mrf.mxu1 }
 0x3b6   : > { %v7310_v36 = vpop.f32.mrf.mxu0 }
 0x3ba   : > { %4929 = vmatmul.msk.bf16.gmra.mxu3 %vm2531_vm8, %v7940_v3 }
 0x3bb   : > { %v2584_v22 = vpop.f32.mrf.mxu1 }
 0x3bc   : > { %v2648_v50 = vadd.f32 %v2647_v33, %v2584_v22 }
 0x3bd   : > { %v2693_v56 = vpop.f32.mrf.mxu3 }
 0x3be   : > { %v2723_v10 = vadd.f32 %v2693_v56, %v7216_v45  ;;  %4948 = vmatmul.msk.bf16.gmra.mxu1 %vm2531_vm8, %v7160_v9  ;;  %v2791_v8 = vpop.f32.mrf.mxu0 }
 0x3c0   : > { %v2806_v37 = vadd.f32 %v2776_v2, %v2723_v10 }
 0x3c3   : > { %v2586_v47 = vpop.f32.mrf.mxu1 }
 0x3c5   : > { %v7304_v44 = vpop.f32.mrf.mxu3 }
 0x3c6   : > { %v7332_v58 = vpop.f32.mrf.mxu0 }
 0x3ca   : > { %4930 = vmatmul.msk.bf16.gmra.mxu3 %vm2531_vm8, %v7941_v13 }
 0x3cb   : > { %v2859_v49 = vpop.f32.mrf.mxu1 }
 0x3cc   : > { %v7308_v32 = vadd.f32 %v2859_v49, %v2806_v37 }
 0x3cd   : > { %v2698_v41 = vpop.f32.mrf.mxu3 }
 0x3ce   : > { %4949 = vmatmul.msk.bf16.gmra.mxu1 %vm2531_vm8, %v7202_v46  ;;  %v2725_v45 = vadd.f32 %v2698_v41, %v7243_v12  ;;  %v5121_v12 = vld [vmem:[%s7825_s1 + $0x78] sm:$0xff] }
 0x3cf   : > { %3474 = vmatpush.bf16.msra.mxu2 %v5121_v12  ;;  %v2625_v12 = vadd.f32 %v7186_v11, %v7228_v40  ;;  %v7379_v11 = vld [vmem:[%s7826_s2 + $0x2] ss:$0 sm:$0xff] }
 0x3d0   : > { %v2808_v31 = vadd.f32 %v2781_v23, %v2725_v45 }
 0x3d3   : > { %v7315_v9 = vpop.f32.mrf.mxu1 }
 0x3d5   : > { %v7317_v63 = vpop.f32.mrf.mxu3 }
 0x3da   : > { %4931 = vmatmul.msk.bf16.gmra.mxu3 %vm2531_vm8, %v7942_v18 }
 0x3db   : > { %v2864_v26 = vpop.f32.mrf.mxu1 }
 0x3dc   : > { %v7321_v27 = vadd.f32 %v2864_v26, %v2808_v31 }
 0x3dd   : > { %v2703_v6 = vpop.f32.mrf.mxu3 }
 0x3de   : > { %4950 = vmatmul.msk.bf16.gmra.mxu1 %vm2531_vm8, %v7237_v42  ;;  %v2727_v46 = vadd.f32 %v2703_v6, %v7259_v38  ;;  %v2796_v42 = vpop.f32.mrf.mxu0  ;;  %v7944_v38 = vld [vmem:[#allocation36_spill] sm:$0xff] }
 0x3df   : > { %v7945_v20 = vpack.c.bf16 %v7943_v1, %v7944_v38 }
 0x3e0   : > { %v2810_v19 = vadd.f32 %v2786_v59, %v2727_v46 }
 0x3e3   : > { %v7334_v16 = vpop.f32.mrf.mxu1 }
 0x3e5   : > { %v7336_v53 = vpop.f32.mrf.mxu3 }
 0x3e6   : > { %v7348_v2 = vpop.f32.mrf.mxu0 }
 0x3ea   : > { %4932 = vmatmul.msk.bf16.gmra.mxu3 %vm2531_vm8, %v7945_v20 }
 0x3eb   : > { %v2869_v30 = vpop.f32.mrf.mxu1 }
 0x3ec   : > { %v7342_v34 = vadd.f32 %v2869_v30, %v2810_v19  ;;  %v2724_v19 = vadd.f32 %v7304_v44, %v2625_v12 }
 0x3ed   : > { %v2708_v48 = vpop.f32.mrf.mxu3 }
 0x3ee   : > { %4951 = vmatmul.msk.bf16.gmra.mxu1 %vm2531_vm8, %v7253_v54  ;;  %v2729_v28 = vadd.f32 %v2708_v48, %v2638_v0  ;;  %v2801_v33 = vpop.f32.mrf.mxu0  ;;  %v2649_v0 = vpop.f32.mrf.mxu2  ;;  %v2807_v20 = vadd.f32 %v7287_v51, %v2724_v19  ;;  %v5118_v51 = vld [vmem:[%s7825_s1 + $0x60] sm:$0xff] }
 0x3ef   : > { %v2650_v31 = vadd.f32 %v2649_v0, %v2586_v47  ;;  %3528 = vmatpush.bf16.msra.mxu3 %v5118_v51  ;;  %v2630_v0 = vadd.f32 %v7231_v43, %v7250_v4 }
 0x3f0   : > { %v2812_v35 = vadd.f32 %v2791_v8, %v2729_v28  ;;  %v2890_v28 = vadd.f32 %v7315_v9, %v2807_v20 }
 0x3f3   : > { %v7346_v62 = vpop.f32.mrf.mxu1 }
 0x3f5   : > { %v7350_v7 = vpop.f32.mrf.mxu3 }
 0x3f6   : > { %v2803_v56 = vpop.f32.mrf.mxu0  ;;  %v2942_v37 = vpop.f32.mrf.mxu2 }
 0x3f7   : > { %v2972_v1 = vadd.f32 %v2942_v37, %v7308_v32  ;;  %v5120_v32 = vld [vmem:[%s7825_s1 + $0x70] sm:$0xff] }
 0x3f8   : > { %3475 = vmatpush.bf16.msra.mxu2 %v5120_v32 }
 0x3fb   : > { %v2874_v25 = vpop.f32.mrf.mxu1 }
 0x3fc   : > { %v7352_v60 = vadd.f32 %v2874_v25, %v2812_v35 }
 0x3fd   : > { %v2713_v23 = vpop.f32.mrf.mxu3 }
 0x3fe   : > { %4952 = vmatmul.msk.bf16.gmra.mxu1 %vm2531_vm8, %v3110_v29  ;;  %v2731_v3 = vadd.f32 %v2713_v23, %v2643_v61  ;;  %v3068_v45 = vpop.f32.mrf.mxu0  ;;  %v2944_v5 = vpop.f32.mrf.mxu2 }
 0x3ff   : > { %v2973_v44 = vadd.f32 %v2944_v5, %v2890_v28 }
 0x400   : > { %v2814_v10 = vadd.f32 %v2796_v42, %v2731_v3 }
 0x403   : > { %v7358_v54 = vpop.f32.mrf.mxu1 }
 0x405   : > { %v7360_v22 = vpop.f32.mrf.mxu3 }
 0x406   : > { %v3070_v26 = vpop.f32.mrf.mxu0  ;;  %v2947_v39 = vpop.f32.mrf.mxu2 }
 0x40b   : > { %v2879_v59 = vpop.f32.mrf.mxu1 }
 0x40c   : > { %v7362_v13 = vadd.f32 %v2879_v59, %v2814_v10  ;;  %v2726_v59 = vadd.f32 %v7317_v63, %v2630_v0 }
 0x40d   : > { %v2718_v49 = vpop.f32.mrf.mxu3 }
 0x40e   : > { %v2733_v41 = vadd.f32 %v2718_v49, %v2648_v50  ;;  %v3073_v48 = vpop.f32.mrf.mxu0  ;;  %v2949_v35 = vpop.f32.mrf.mxu2 }
 0x410   : > { %v2816_v29 = vadd.f32 %v2801_v33, %v2733_v41 }
 0x413   : > { %v7364_v8 = vpop.f32.mrf.mxu1 }
 0x415   : > { %v2720_v17 = vpop.f32.mrf.mxu3 }
 0x416   : > { %v2734_v6 = vadd.f32 %v2720_v17, %v2650_v31  ;;  %v3075_v10 = vpop.f32.mrf.mxu0  ;;  %v2952_v41 = vpop.f32.mrf.mxu2  ;;  %v2809_v17 = vadd.f32 %v7297_v15, %v2726_v59 }
 0x418   : > { %v2817_v50 = vadd.f32 %v2803_v56, %v2734_v6  ;;  %v2892_v4 = vadd.f32 %v7334_v16, %v2809_v17  ;;  %v2635_v16 = vadd.f32 %v7255_v24, %v7270_v57 }
 0x41a   : > { %v2975_v12 = vadd.f32 %v2949_v35, %v2892_v4  ;;  %v2640_v4 = vadd.f32 %v7279_v52, %v7285_v55 }
 0x41b   : > { %v2884_v61 = vpop.f32.mrf.mxu1 }
 0x41c   : > { %v7366_v18 = vadd.f32 %v2884_v61, %v2816_v29 }
 0x41d   : > { %v3005_v46 = vpop.f32.mrf.mxu3 }
 0x41e   : > { %v3035_v47 = vadd.f32 %v3005_v46, %v2972_v1  ;;  %v3078_v46 = vpop.f32.mrf.mxu0 }
 0x420   : > { %v3098_v25 = vadd.f32 %v3068_v45, %v3035_v47  ;;  %v2974_v45 = vadd.f32 %v2947_v39, %v7321_v27  ;;  %v2954_v39 = vpop.f32.mrf.mxu2 }
 0x423   : > { %v2886_v42 = vpop.f32.mrf.mxu1 }
 0x424   : > { %v7372_v38 = vadd.f32 %v2886_v42, %v2817_v50 }
 0x425   : > { %v3007_v30 = vpop.f32.mrf.mxu3 }
 0x426   : > { %v3036_v33 = vadd.f32 %v3007_v30, %v2973_v44  ;;  %v2728_v30 = vadd.f32 %v7336_v53, %v2635_v16  ;;  %v3080_v32 = vpop.f32.mrf.mxu0  ;;  %v5123_v53 = vld [vmem:[%s7825_s1 + $0x88] sm:$0xff] }
 0x427   : > { %3576 = vmatpush.bf16.msra.mxu0 %v5123_v53 }
 0x428   : > { %v3099_v37 = vadd.f32 %v3070_v26, %v3036_v33  ;;  %v2811_v24 = vadd.f32 %v7310_v36, %v2728_v30 }
 0x42a   : > { %v2894_v0 = vadd.f32 %v7346_v62, %v2811_v24 }
 0x42b   : > { %v3131_v40 = vpop.f32.mrf.mxu1 }
 0x42c   : > { %v3161_v23 = vadd.f32 %v3131_v40, %v3098_v25  ;;  %v2976_v25 = vadd.f32 %v2952_v41, %v7342_v34  ;;  %v2957_v34 = vpop.f32.mrf.mxu2  ;;  %v2977_v62 = vadd.f32 %v2954_v39, %v2894_v0 }
 0x42d   : > { %v3010_v9 = vpop.f32.mrf.mxu3 }
 0x42e   : > { %v7388_v3 = vadd.f32 %v7379_v11, %v3161_v23  ;;  %v3037_v29 = vadd.f32 %v3010_v9, %v2974_v45  ;;  %v5122_v45 = vld [vmem:[%s7825_s1 + $0x80] sm:$0xff] }
 0x42f   : > { %3577 = vmatpush.bf16.msra.mxu0 %v5122_v45 }
 0x430   : > { %v4953_v56 = vmul.f32 -1.442695, %v7388_v3  ;;  %v3100_v26 = vadd.f32 %v3073_v48, %v3037_v29 }
 0x432   : > { %5394 = vpow2.f32 %v4953_v56 }
 0x433   : > { %v3133_v49 = vpop.f32.mrf.mxu1 }
 0x434   : > { %v3162_v5 = vadd.f32 %v3133_v49, %v3099_v37 }
 0x435   : > { %v3012_v61 = vpop.f32.mrf.mxu3 }
 0x436   : > { %v7397_v31 = vadd.f32 %v7379_v11, %v3162_v5  ;;  %v3038_v19 = vadd.f32 %v3012_v61, %v2975_v12 }
 0x438   : > { %v5395_v43 = vpop.eup %5394  ;;  %v4954_v6 = vmul.f32 -1.442695, %v7397_v31  ;;  %v3101_v35 = vadd.f32 %v3075_v10, %v3038_v19  ;;  %v3083_v19 = vpop.f32.mrf.mxu0 }
 0x439   : > { %v7401_v63 = vadd.f32 1.0, %v5395_v43 }
 0x43a   : > { %5396 = vpow2.f32 %v4954_v6 }
 0x43b   : > { %5398 = vrcp.f32 %v7401_v63  ;;  %v3136_v27 = vpop.f32.mrf.mxu1  ;;  %v3246_v5 = vand.u32 2147483648, %v7401_v63  ;;  %vm3240_vm11 = vweird.f32 %v7401_v63  ;;  %v3244_v29 = vand.u32 2147483647, %v7401_v63 }
 0x43c   : > { %v3163_v15 = vadd.f32 %v3136_v27, %v3100_v26 }
 0x43d   : > { %v3015_v50 = vpop.f32.mrf.mxu3  ;;  %v3247_v52 = vor.u32 1.1754944e-38, %v3246_v5  ;;  %vm3245_vm7 = vcmp.eq.f32.partialorder %v3244_v29, 8.507059e+37 }
 0x43e   : > { %v7405_v42 = vadd.f32 %v7379_v11, %v3163_v15  ;;  %v3039_v57 = vadd.f32 %v3015_v50, %v2976_v25  ;;  %v2730_v50 = vadd.f32 %v7350_v7, %v2640_v4 }
 0x440   : > { %v5397_v1 = vpop.eup %5396  ;;  %v4955_v20 = vmul.f32 -1.442695, %v7405_v42  ;;  %v3102_v36 = vadd.f32 %v3078_v46, %v3039_v57 }
 0x441   : > { %v5399_v47 = vpop.eup %5398  ;;  %v3224_v48 = vadd.f32 1.0, %v5397_v1 }
 0x442   : > { %v3236_v28 = vmul.f32 %v5399_v47, %v7401_v63  ;;  %5400 = vpow2.f32 %v4955_v20  ;;  %vm3241_vm8 = vweird.f32 %v5399_v47 }
 0x443   : > { %5402 = vrcp.f32 %v3224_v48  ;;  %v3138_v40 = vpop.f32.mrf.mxu1  ;;  %vm7433_vm5 = vmor %vm3240_vm11, %vm3241_vm8  ;;  %v3259_v26 = vand.u32 2147483647, %v3224_v48  ;;  %v3261_v46 = vand.u32 2147483648, %v3224_v48  ;;  %vm3255_vm2 = vweird.f32 %v3224_v48 }
 0x444   : > { %v3237_v44 = vsub.f32 1.0, %v3236_v28  ;;  %v3164_v23 = vadd.f32 %v3138_v40, %v3101_v35  ;;  %v2959_v35 = vpop.f32.mrf.mxu2 }
 0x445   : > { %v3017_v33 = vpop.f32.mrf.mxu3  ;;  %vm3260_vm10 = vcmp.eq.f32.partialorder %v3259_v26, 8.507059e+37 }
 0x446   : > { %v3238_v51 = vmul.f32 %v5399_v47, %v3237_v44  ;;  %v7415_v9 = vadd.f32 %v7379_v11, %v3164_v23  ;;  %v3040_v27 = vadd.f32 %v3017_v33, %v2977_v62  ;;  %v2813_v44 = vadd.f32 %v7332_v58, %v2730_v50 }
 0x448   : > { %v5401_v56 = vpop.eup %5400  ;;  %v4956_v10 = vmul.f32 -1.442695, %v7415_v9  ;;  %v3239_v49 = vadd.f32 %v5399_v47, %v3238_v51  ;;  %v3103_v7 = vadd.f32 %v3080_v32, %v3040_v27 }
 0x449   : > { %v5403_v59 = vpop.eup %5402  ;;  %v7422_v37 = vadd.f32 1.0, %v5401_v56 }
 0x44a   : > { %v3251_v41 = vmul.f32 %v5403_v59, %v3224_v48  ;;  %5404 = vpow2.f32 %v4956_v10  ;;  %v3243_v12 = vsel %vm7433_vm5, %v5399_v47, %v3239_v49  ;;  %vm3256_vm6 = vweird.f32 %v5403_v59 }
 0x44b   : > { %5406 = vrcp.f32 %v7422_v37  ;;  %v3141_v17 = vpop.f32.mrf.mxu1  ;;  %v3248_v30 = vsel %vm3245_vm7, %v3247_v52, %v3243_v12  ;;  %vm3257_vm9 = vmor %vm3255_vm2, %vm3256_vm6  ;;  %v3262_v47 = vor.u32 1.1754944e-38, %v3261_v46  ;;  %v2978_v48 = vadd.f32 %v2957_v34, %v7352_v60  ;;  %v5125_v52 = vld [vmem:[%s7825_s1 + $0x98] sm:$0xff] }
 0x44c   : > { %v3252_v61 = vsub.f32 1.0, %v3251_v41  ;;  %v3165_v43 = vadd.f32 %v3141_v17, %v3102_v36  ;;  %v3415_v57 = vmul.f32 %v3248_v30, %v7388_v3  ;;  %v3274_v0 = vand.u32 2147483647, %v7422_v37  ;;  %v3085_v41 = vpop.f32.mrf.mxu0  ;;  %3633 = vmatpush.bf16.msrb.mxu2 %v5125_v52 }
 0x44d   : > { %v3020_v39 = vpop.f32.mrf.mxu3  ;;  %v3276_v56 = vand.u32 2147483648, %v7422_v37  ;;  %v2896_v60 = vadd.f32 %v7358_v54, %v2813_v44  ;;  %vm3270_vm14 = vweird.f32 %v7422_v37 }
 0x44e   : > { %v3253_v15 = vmul.f32 %v5403_v59, %v3252_v61  ;;  %v7440_v63 = vadd.f32 %v7379_v11, %v3165_v43  ;;  %v3041_v10 = vadd.f32 %v3020_v39, %v2978_v48  ;;  %vm3275_vm0 = vcmp.eq.f32.partialorder %v3274_v0, 8.507059e+37  ;;  %v2962_v43 = vpop.f32.mrf.mxu2 }
 0x44f   : > { %v3277_v45 = vor.u32 1.1754944e-38, %v3276_v56  ;;  %v2980_v44 = vadd.f32 %v2962_v43, %v7362_v13 }
 0x450   : > { %v5405_v55 = vpop.eup %5404  ;;  %v3254_v16 = vadd.f32 %v5403_v59, %v3253_v15  ;;  %v4957_v1 = vmul.f32 -1.442695, %v7440_v63  ;;  %v3104_v54 = vadd.f32 %v3083_v19, %v3041_v10 }
 0x451   : > { %v5407_v20 = vpop.eup %5406  ;;  %v7444_v28 = vadd.f32 1.0, %v5405_v55  ;;  %v2645_v55 = vadd.f32 %v7293_v14, %v7295_v21 }
 0x452   : > { %v3258_v25 = vsel %vm3257_vm9, %v5403_v59, %v3254_v16  ;;  %v3266_v40 = vmul.f32 %v5407_v20, %v7422_v37  ;;  %5408 = vpow2.f32 %v4957_v1  ;;  %vm3271_vm13 = vweird.f32 %v5407_v20 }
 0x453   : > { %v3263_v23 = vsel %vm3260_vm10, %v3262_v47, %v3258_v25  ;;  %5410 = vrcp.f32 %v7444_v28  ;;  %v3143_v24 = vpop.f32.mrf.mxu1  ;;  %vm3272_vm15 = vmor %vm3270_vm14, %vm3271_vm13  ;;  %v2979_v37 = vadd.f32 %v2959_v35, %v2896_v60  ;;  %v3289_v46 = vand.u32 2147483647, %v7444_v28 }
 0x454   : > { %v3416_v51 = vmul.f32 %v3263_v23, %v7397_v31  ;;  %v3267_v33 = vsub.f32 1.0, %v3266_v40  ;;  %v3166_v53 = vadd.f32 %v3143_v24, %v3103_v7  ;;  %v3291_v27 = vand.u32 2147483648, %v7444_v28 }
 0x455   : > { %v3022_v59 = vpop.f32.mrf.mxu3  ;;  %vm3285_vm4 = vweird.f32 %v7444_v28  ;;  %v2732_v47 = vadd.f32 %v7360_v22, %v2645_v55  ;;  %vm3290_vm11 = vcmp.eq.f32.partialorder %v3289_v46, 8.507059e+37 }
 0x456   : > { %v3427_v32 = vpack.c.bf16 %v3416_v51, %v3415_v57  ;;  %v3268_v58 = vmul.f32 %v5407_v20, %v3267_v33  ;;  %v7455_v36 = vadd.f32 %v7379_v11, %v3166_v53  ;;  %v3042_v12 = vadd.f32 %v3022_v59, %v2979_v37  ;;  %v2964_v0 = vpop.f32.mrf.mxu2 }
 0x457   : > { %v3292_v35 = vor.u32 1.1754944e-38, %v3291_v27  ;;  %v2815_v57 = vadd.f32 %v7348_v2, %v2732_v47 }
 0x458   : > { %v5409_v3 = vpop.eup %5408  ;;  %v3269_v34 = vadd.f32 %v5407_v20, %v3268_v58  ;;  %v4958_v31 = vmul.f32 -1.442695, %v7455_v36  ;;  %4985 = vmatmul.msk.bf16.vlgmr.msra.gmra.mxu3 %vm3455_vm12, %v3427_v32  ;;  %v3105_v21 = vadd.f32 %v3085_v41, %v3042_v12 }
 0x459   : > { %v5411_v49 = vpop.eup %5410  ;;  %v7461_v5 = vadd.f32 1.0, %v5409_v3  ;;  %v2898_v13 = vadd.f32 %v7364_v8, %v2815_v57 }
 0x45a   : > { %v3273_v62 = vsel %vm3272_vm15, %v5407_v20, %v3269_v34  ;;  %v3281_v17 = vmul.f32 %v5411_v49, %v7444_v28  ;;  %5412 = vpow2.f32 %v4958_v31  ;;  %vm3286_vm3 = vweird.f32 %v5411_v49  ;;  %v3088_v28 = vpop.f32.mrf.mxu0 }
 0x45b   : > { %v3278_v29 = vsel %vm3275_vm0, %v3277_v45, %v3273_v62  ;;  %5414 = vrcp.f32 %v7461_v5  ;;  %v3146_v61 = vpop.f32.mrf.mxu1  ;;  %vm3287_vm8 = vmor %vm3285_vm4, %vm3286_vm3  ;;  %v3306_v33 = vand.u32 2147483648, %v7461_v5  ;;  %vm3300_vm6 = vweird.f32 %v7461_v5 }
 0x45c   : > { %v3417_v4 = vmul.f32 %v3278_v29, %v7405_v42  ;;  %v3282_v6 = vsub.f32 1.0, %v3281_v17  ;;  %v3167_v26 = vadd.f32 %v3146_v61, %v3104_v54  ;;  %v5127_v42 = vld [vmem:[%s7825_s1 + $0xa8] sm:$0xff]  ;;  %v2981_v45 = vadd.f32 %v2964_v0, %v2898_v13 }
 0x45d   : > { %v3025_v50 = vpop.f32.mrf.mxu3  ;;  %3690 = vmatpush.bf16.msrb.mxu3 %v5127_v42  ;;  %v3307_v3 = vor.u32 1.1754944e-38, %v3306_v33 }
 0x45e   : > { %v3435_v15 = vpack.c.bf16 %v3417_v4, %v3416_v51  ;;  %v3283_v39 = vmul.f32 %v5411_v49, %v3282_v6  ;;  %v7469_v19 = vadd.f32 %v7379_v11, %v3167_v26  ;;  %v3304_v51 = vand.u32 2147483647, %v7461_v5  ;;  %v2967_v27 = vpop.f32.mrf.mxu2 }
 0x45f   : > { %v3043_v53 = vadd.f32 %v3025_v50, %v2980_v44 }
 0x460   : > { %v5413_v16 = vpop.eup %5412  ;;  %v3284_v1 = vadd.f32 %v5411_v49, %v3283_v39  ;;  %v4959_v20 = vmul.f32 -1.442695, %v7469_v19  ;;  %4973 = vmatmul.msk.bf16.vlgmr.msra.gmra.mxu2 %vm3455_vm12, %v3435_v15  ;;  %vm3305_vm2 = vcmp.eq.f32.partialorder %v3304_v51, 8.507059e+37 }
 0x461   : > { %v5415_v30 = vpop.eup %5414  ;;  %v7483_v25 = vadd.f32 1.0, %v5413_v16  ;;  %v3106_v8 = vadd.f32 %v3088_v28, %v3043_v53 }
 0x462   : > { %v3288_v40 = vsel %vm3287_vm8, %v5411_v49, %v3284_v1  ;;  %v3296_v14 = vmul.f32 %v5415_v30, %v7461_v5  ;;  %5416 = vpow2.f32 %v4959_v20  ;;  %vm3301_vm5 = vweird.f32 %v5415_v30  ;;  %v3090_v29 = vpop.f32.mrf.mxu0 }
 0x463   : > { %v3293_v7 = vsel %vm3290_vm11, %v3292_v35, %v3288_v40  ;;  %5418 = vrcp.f32 %v7483_v25  ;;  %v3148_v23 = vpop.f32.mrf.mxu1  ;;  %vm3302_vm7 = vmor %vm3300_vm6, %vm3301_vm5  ;;  %v3319_v37 = vand.u32 2147483647, %v7483_v25  ;;  %v3321_v61 = vand.u32 2147483648, %v7483_v25 }
 0x464   : > { %v3418_v22 = vmul.f32 %v3293_v7, %v7415_v9  ;;  %v3297_v48 = vsub.f32 1.0, %v3296_v14  ;;  %v3168_v24 = vadd.f32 %v3148_v23, %v3105_v21  ;;  %vm3315_vm10 = vweird.f32 %v7483_v25 }
 0x465   : > { %v3027_v32 = vpop.f32.mrf.mxu3  ;;  %vm3320_vm14 = vcmp.eq.f32.partialorder %v3319_v37, 8.507059e+37  ;;  %v3322_v50 = vor.u32 1.1754944e-38, %v3321_v61  ;;  %v2982_v20 = vadd.f32 %v2967_v27, %v7366_v18 }
 0x466   : > { %v3428_v56 = vpack.c.bf16 %v3418_v22, %v3417_v4  ;;  %v3298_v10 = vmul.f32 %v5415_v30, %v3297_v48  ;;  %v7493_v58 = vadd.f32 %v7379_v11, %v3168_v24  ;;  %v3044_v43 = vadd.f32 %v3027_v32, %v2981_v45  ;;  %v2969_v51 = vpop.f32.mrf.mxu2 }
 0x467   : > { %v2983_v13 = vadd.f32 %v2969_v51, %v7372_v38  ;;  %v5124_v38 = vld [vmem:[%s7825_s1 + $0x90] sm:$0xff] }
 0x468   : > { %v5417_v9 = vpop.eup %5416  ;;  %v3299_v59 = vadd.f32 %v5415_v30, %v3298_v10  ;;  %v4960_v2 = vmul.f32 -1.442695, %v7493_v58  ;;  %4986 = vmatmul.msk.bf16.gmra.mxu3 %vm3455_vm12, %v3428_v56  ;;  %4997 = vmatmul.msk.bf16.vlgmr.msra.gmra.mxu0 %vm3455_vm12, %v3428_v56  ;;  %v3107_v16 = vadd.f32 %v3090_v29, %v3044_v43  ;;  %v5126_v10 = vld [vmem:[%s7825_s1 + $0xa0] sm:$0xff] }
 0x469   : > { %v5419_v60 = vpop.eup %5418  ;;  %v3229_v34 = vadd.f32 1.0, %v5417_v9  ;;  %3691 = vmatpush.bf16.msrb.mxu3 %v5126_v10  ;;  %3634 = vmatpush.bf16.msrb.mxu2 %v5124_v38 }
 0x46a   : > { %v3303_v31 = vsel %vm3302_vm7, %v5415_v30, %v3299_v59  ;;  %v3311_v49 = vmul.f32 %v5419_v60, %v7483_v25  ;;  %5420 = vpow2.f32 %v4960_v2  ;;  %vm3316_vm9 = vweird.f32 %v5419_v60  ;;  %v3093_v23 = vpop.f32.mrf.mxu0 }
 0x46b   : > { %v3308_v41 = vsel %vm3305_vm2, %v3307_v3, %v3303_v31  ;;  %5422 = vrcp.f32 %v3229_v34  ;;  %v3151_v5 = vpop.f32.mrf.mxu1  ;;  %vm3317_vm13 = vmor %vm3315_vm10, %vm3316_vm9  ;;  %v3334_v40 = vand.u32 2147483647, %v3229_v34  ;;  %v3336_v14 = vand.u32 2147483648, %v3229_v34 }
 0x46c   : > { %v3419_v62 = vmul.f32 %v3308_v41, %v7440_v63  ;;  %v3312_v17 = vsub.f32 1.0, %v3311_v49  ;;  %v3169_v54 = vadd.f32 %v3151_v5, %v3106_v8  ;;  %vm3330_vm0 = vweird.f32 %v3229_v34 }
 0x46d   : > { %v3030_v63 = vpop.f32.mrf.mxu3  ;;  %vm3335_vm4 = vcmp.eq.f32.partialorder %v3334_v40, 8.507059e+37  ;;  %v3337_v24 = vor.u32 1.1754944e-38, %v3336_v14 }
 0x46e   : > { %v7504_v4 = vpack.c.bf16 %v3419_v62, %v3418_v22  ;;  %v3313_v6 = vmul.f32 %v5419_v60, %v3312_v17  ;;  %v7507_v26 = vadd.f32 %v7379_v11, %v3169_v54  ;;  %v3045_v21 = vadd.f32 %v3030_v63, %v2982_v20 }
 0x470   : > { %v5421_v46 = vpop.eup %5420  ;;  %v3314_v12 = vadd.f32 %v5419_v60, %v3313_v6  ;;  %v4961_v15 = vmul.f32 -1.442695, %v7507_v26  ;;  %4974 = vmatmul.msk.bf16.gmra.mxu2 %vm3455_vm12, %v7504_v4  ;;  %v3108_v56 = vadd.f32 %v3093_v23, %v3045_v21 }
 0x471   : > { %v5423_v39 = vpop.eup %5422  ;;  %v7513_v52 = vadd.f32 1.0, %v5421_v46 }
 0x472   : > { %v3318_v42 = vsel %vm3317_vm13, %v5419_v60, %v3314_v12  ;;  %v3326_v55 = vmul.f32 %v5423_v39, %v3229_v34  ;;  %5424 = vpow2.f32 %v4961_v15  ;;  %vm3331_vm15 = vweird.f32 %v5423_v39  ;;  %v3095_v17 = vpop.f32.mrf.mxu0 }
 0x473   : > { %v3323_v1 = vsel %vm3320_vm14, %v3322_v50, %v3318_v42  ;;  %5426 = vrcp.f32 %v7513_v52  ;;  %v3153_v30 = vpop.f32.mrf.mxu1  ;;  %vm3332_vm3 = vmor %vm3330_vm0, %vm3331_vm15  ;;  %v3349_v3 = vand.u32 2147483647, %v7513_v52  ;;  %v3351_v34 = vand.u32 2147483648, %v7513_v52 }
 0x474   : > { %v3420_v47 = vmul.f32 %v3323_v1, %v7455_v36  ;;  %v3327_v35 = vsub.f32 1.0, %v3326_v55  ;;  %v3170_v25 = vadd.f32 %v3153_v30, %v3107_v16  ;;  %vm3345_vm11 = vweird.f32 %v7513_v52 }
 0x475   : > { %v3032_v0 = vpop.f32.mrf.mxu3  ;;  %vm3350_vm6 = vcmp.eq.f32.partialorder %v3349_v3, 8.507059e+37  ;;  %v3352_v54 = vor.u32 1.1754944e-38, %v3351_v34 }
 0x476   : > { %v7518_v28 = vpack.c.bf16 %v3420_v47, %v3419_v62  ;;  %v3328_v7 = vmul.f32 %v5423_v39, %v3327_v35  ;;  %v7521_v44 = vadd.f32 %v7379_v11, %v3170_v25  ;;  %v3046_v31 = vadd.f32 %v3032_v0, %v2983_v13 }
 0x478   : > { %v5425_v22 = vpop.eup %5424  ;;  %v3329_v48 = vadd.f32 %v5423_v39, %v3328_v7  ;;  %v4962_v18 = vmul.f32 -1.442695, %v7521_v44  ;;  %4987 = vmatmul.msk.bf16.gmra.mxu3 %vm3455_vm12, %v7518_v28  ;;  %4998 = vmatmul.msk.bf16.gmra.mxu0 %vm3455_vm12, %v7518_v28  ;;  %v3109_v43 = vadd.f32 %v3095_v17, %v3046_v31 }
 0x479   : > { %v5427_v36 = vpop.eup %5426  ;;  %v7528_v57 = vadd.f32 1.0, %v5425_v22 }
 0x47a   : > { %v3333_v33 = vsel %vm3332_vm3, %v5423_v39, %v3329_v48  ;;  %v3341_v53 = vmul.f32 %v5427_v36, %v7513_v52  ;;  %5428 = vpow2.f32 %v4962_v18  ;;  %vm3346_vm8 = vweird.f32 %v5427_v36 }
 0x47b   : > { %v3338_v32 = vsel %vm3335_vm4, %v3337_v24, %v3333_v33  ;;  %5430 = vrcp.f32 %v7528_v57  ;;  %v3156_v9 = vpop.f32.mrf.mxu1  ;;  %vm3347_vm5 = vmor %vm3345_vm11, %vm3346_vm8  ;;  %v3364_v15 = vand.u32 2147483647, %v7528_v57  ;;  %v3366_v39 = vand.u32 2147483648, %v7528_v57 }
 0x47c   : > { %v3421_v59 = vmul.f32 %v3338_v32, %v7469_v19  ;;  %v3342_v2 = vsub.f32 1.0, %v3341_v53  ;;  %v3171_v60 = vadd.f32 %v3156_v9, %v3108_v56  ;;  %vm3360_vm2 = vweird.f32 %v7528_v57 }
 0x47d   : > { %v3367_v20 = vor.u32 1.1754944e-38, %v3366_v39  ;;  %vm3365_vm10 = vcmp.eq.f32.partialorder %v3364_v15, 8.507059e+37 }
 0x47e   : > { %v7539_v49 = vpack.c.bf16 %v3421_v59, %v3420_v47  ;;  %v3343_v8 = vmul.f32 %v5427_v36, %v3342_v2  ;;  %v7542_v41 = vadd.f32 %v7379_v11, %v3171_v60 }
 0x480   : > { %v5429_v19 = vpop.eup %5428  ;;  %v3344_v45 = vadd.f32 %v5427_v36, %v3343_v8  ;;  %v4963_v5 = vmul.f32 -1.442695, %v7542_v41  ;;  %4975 = vmatmul.msk.bf16.gmra.mxu2 %vm3455_vm12, %v7539_v49 }
 0x481   : > { %v5431_v62 = vpop.eup %5430  ;;  %v3232_v29 = vadd.f32 1.0, %v5429_v19 }
 0x482   : > { %v3348_v37 = vsel %vm3347_vm5, %v5427_v36, %v3344_v45  ;;  %v3356_v61 = vmul.f32 %v5431_v62, %v7528_v57  ;;  %5432 = vpow2.f32 %v4963_v5  ;;  %vm3361_vm7 = vweird.f32 %v5431_v62 }
 0x483   : > { %v3353_v6 = vsel %vm3350_vm6, %v3352_v54, %v3348_v37  ;;  %5434 = vrcp.f32 %v3232_v29  ;;  %v3158_v46 = vpop.f32.mrf.mxu1  ;;  %vm3362_vm9 = vmor %vm3360_vm2, %vm3361_vm7  ;;  %v3381_v14 = vand.u32 2147483648, %v3232_v29  ;;  %v3379_v23 = vand.u32 2147483647, %v3232_v29 }
 0x484   : > { %v3422_v27 = vmul.f32 %v3353_v6, %v7493_v58  ;;  %v3357_v12 = vsub.f32 1.0, %v3356_v61  ;;  %v3172_v63 = vadd.f32 %v3158_v46, %v3109_v43  ;;  %vm3375_vm14 = vweird.f32 %v3232_v29  ;;  %v5129_v6 = vld [vmem:[%s7825_s1 + $0xb8] sm:$0xff] }
 0x485   : > { %v3382_v36 = vor.u32 1.1754944e-38, %v3381_v14  ;;  %vm3380_vm0 = vcmp.eq.f32.partialorder %v3379_v23, 8.507059e+37  ;;  %3931 = vmatpush.bf16.msrb.mxu0 %v5129_v6 }
 0x486   : > { %v7555_v50 = vpack.c.bf16 %v3422_v27, %v3421_v59  ;;  %v3358_v52 = vmul.f32 %v5431_v62, %v3357_v12  ;;  %v7558_v42 = vadd.f32 %v7379_v11, %v3172_v63 }
 0x488   : > { %v5433_v55 = vpop.eup %5432  ;;  %v3359_v16 = vadd.f32 %v5431_v62, %v3358_v52  ;;  %v4964_v1 = vmul.f32 -1.442695, %v7558_v42  ;;  %4988 = vmatmul.msk.bf16.gmra.mxu3 %vm3455_vm12, %v7555_v50  ;;  %4999 = vmatmul.msk.bf16.gmra.mxu0 %vm3455_vm12, %v7555_v50 }
 0x489   : > { %v5435_v58 = vpop.eup %5434  ;;  %v3233_v30 = vadd.f32 1.0, %v5433_v55 }
 0x48a   : > { %v3363_v47 = vsel %vm3362_vm9, %v5431_v62, %v3359_v16  ;;  %v3371_v11 = vmul.f32 %v5435_v58, %v3232_v29  ;;  %5436 = vpow2.f32 %v4964_v1  ;;  %vm3376_vm13 = vweird.f32 %v5435_v58 }
 0x48b   : > { %v3368_v35 = vsel %vm3365_vm10, %v3367_v20, %v3363_v47  ;;  %5438 = vrcp.f32 %v3233_v30  ;;  %vm3377_vm15 = vmor %vm3375_vm14, %vm3376_vm13  ;;  %v3396_v0 = vand.u32 2147483648, %v3233_v30  ;;  %v3394_v32 = vand.u32 2147483647, %v3233_v30 }
 0x48c   : > { %v3423_v25 = vmul.f32 %v3368_v35, %v7507_v26  ;;  %v3372_v40 = vsub.f32 1.0, %v3371_v11  ;;  %vm3390_vm4 = vweird.f32 %v3233_v30 }
 0x48d   : > { %v3397_v59 = vor.u32 1.1754944e-38, %v3396_v0  ;;  %vm3395_vm11 = vcmp.eq.f32.partialorder %v3394_v32, 8.507059e+37 }
 0x48e   : > { %v3438_v21 = vpack.c.bf16 %v3423_v25, %v3422_v27  ;;  %v3373_v7 = vmul.f32 %v5435_v58, %v3372_v40 }
 0x490   : > { %v5437_v22 = vpop.eup %5436  ;;  %v3374_v48 = vadd.f32 %v5435_v58, %v3373_v7  ;;  %4976 = vmatmul.msk.bf16.gmra.mxu2 %vm3455_vm12, %v3438_v21  ;;  %v7610_v7 = vld [vmem:[%s7826_s2 + $0x3] ss:$0 sm:$0xff] }
 0x491   : > { %v5439_v18 = vpop.eup %5438  ;;  %v3234_v24 = vadd.f32 1.0, %v5437_v22 }
 0x492   : > { %v3378_v57 = vsel %vm3377_vm15, %v5435_v58, %v3374_v48  ;;  %v3386_v51 = vmul.f32 %v5439_v18, %v3233_v30  ;;  %vm3391_vm3 = vweird.f32 %v5439_v18  ;;  %v7615_v48 = vld [vmem:[%s7825_s1 + $0xc0] sm:$0xff] }
 0x493   : > { %v3383_v33 = vsel %vm3380_vm0, %v3382_v36, %v3378_v57  ;;  %5440 = vrcp.f32 %v3234_v24  ;;  %vm3392_vm8 = vmor %vm3390_vm4, %vm3391_vm3  ;;  %v3411_v31 = vand.u32 2147483648, %v3234_v24  ;;  %v3409_v19 = vand.u32 2147483647, %v3234_v24 }
 0x494   : > { %v3424_v26 = vmul.f32 %v3383_v33, %v7521_v44  ;;  %v3387_v53 = vsub.f32 1.0, %v3386_v51  ;;  %vm3405_vm6 = vweird.f32 %v3234_v24 }
 0x495   : > { %vm3410_vm2 = vcmp.eq.f32.partialorder %v3409_v19, 8.507059e+37 }
 0x496   : > { %v3550_v56 = vpack.c.bf16 %v3424_v26, %v3423_v25  ;;  %v3388_v10 = vmul.f32 %v5439_v18, %v3387_v53 }
 0x498   : > { %v3389_v13 = vadd.f32 %v5439_v18, %v3388_v10  ;;  %5000 = vmatmul.msk.bf16.gmra.mxu0 %vm3455_vm12, %v3550_v56  ;;  %5021 = vmatmul.msk.bf16.vlgmr.msrb.gmra.mxu3 %vm3455_vm12, %v7518_v28  ;;  %v3412_v28 = vor.u32 1.1754944e-38, %v3411_v31 }
 0x499   : > { %v5441_v9 = vpop.eup %5440 }
 0x49a   : > { %v3393_v2 = vsel %vm3392_vm8, %v5439_v18, %v3389_v13  ;;  %v3401_v60 = vmul.f32 %v5441_v9, %v3234_v24  ;;  %vm3406_vm5 = vweird.f32 %v5441_v9 }
 0x49b   : > { %v3398_v44 = vsel %vm3395_vm11, %v3397_v59, %v3393_v2  ;;  %vm3407_vm7 = vmor %vm3405_vm6, %vm3406_vm5  ;;  %v5569_v2 = vmov 0  }
 0x49c   : > { %v3425_v3 = vmul.f32 %v3398_v44, %v7542_v41  ;;  %v3402_v34 = vsub.f32 1.0, %v3401_v60 }
 0x49e   : > { %v3607_v8 = vpack.c.bf16 %v3425_v3, %v3424_v26  ;;  %v3403_v38 = vmul.f32 %v5441_v9, %v3402_v34 }
 0x4a0   : > { %v3404_v45 = vadd.f32 %v5441_v9, %v3403_v38  ;;  %5009 = vmatmul.msk.bf16.vlgmr.msrb.gmra.mxu2 %vm3455_vm12, %v7504_v4  ;;  %v7587_v4 = vld [vmem:[%s7825_s1 + $0xc8] sm:$0xff] }
 0x4a1   : > { %3979 = vmatpush.bf16.msrb.mxu1 %v7587_v4  ;;  %4153 = vmatpush.bf16.msra.mxu2 %v7587_v4 }
 0x4a2   : > { %v3408_v5 = vsel %vm3407_vm7, %v5441_v9, %v3404_v45  ;;  %4211 = vmatpush.bf16.msra.mxu3 %v7587_v4 }
 0x4a3   : > { %v3413_v62 = vsel %vm3410_vm2, %v3412_v28, %v3408_v5 }
 0x4a4   : > { %v3426_v17 = vmul.f32 %v3413_v62, %v7558_v42 }
 0x4a5   : > { %3980 = vmatpush.bf16.msrb.mxu1 %v7615_v48  ;;  %4154 = vmatpush.bf16.msra.mxu2 %v7615_v48 }
 0x4a6   : > { %v3664_v54 = vpack.c.bf16 %v3426_v17, %v3425_v3  ;;  %4212 = vmatpush.bf16.msra.mxu3 %v7615_v48 }
 0x4a8   : > { %5022 = vmatmul.msk.bf16.gmra.mxu3 %vm3455_vm12, %v7555_v50  ;;  %3981 = vmatmul.bf16.vlgmr.msrb.gmra.mxu1 %v5569_v2 }
 0x4a9   : > { %4037 = vmatpush.bf16.msra.mxu1 %v7587_v4  ;;  %4385 = vmatpush.bf16.msrb.mxu2 %v7587_v4 }
 0x4ad   : > { %4038 = vmatpush.bf16.msra.mxu1 %v7615_v48  ;;  %4386 = vmatpush.bf16.msrb.mxu2 %v7615_v48 }
 0x4b0   : > { %5010 = vmatmul.msk.bf16.gmra.mxu2 %vm3455_vm12, %v7539_v49 }
 0x4b1   : > { %4095 = vmatpush.bf16.msrb.mxu1 %v7587_v4 }
 0x4b5   : > { %4096 = vmatpush.bf16.msrb.mxu1 %v7615_v48 }
 0x4b8   : > { %5023 = vmatmul.msk.bf16.gmra.mxu3 %vm3455_vm12, %v3550_v56  ;;  %v5128_v56 = vld [vmem:[%s7825_s1 + $0xb0] sm:$0xff] }
 0x4b9   : > { %3932 = vmatpush.bf16.msrb.mxu0 %v5128_v56 }
 0x4bd   : > { %4269 = vmatpush.bf16.msra.mxu0 %v7587_v4 }
 0x4c0   : > { %5011 = vmatmul.msk.bf16.gmra.mxu2 %vm3455_vm12, %v3438_v21 }
 0x4c1   : > { %4270 = vmatpush.bf16.msra.mxu0 %v7615_v48 }
 0x4c8   : > { %5024 = vmatmul.msk.bf16.gmra.mxu3 %vm3455_vm12, %v3664_v54 }
 0x4d0   : > { %5012 = vmatmul.msk.bf16.gmra.mxu2 %vm3455_vm12, %v3607_v8 }
 0x4db   : > { %v3530_v49 = vpop.f32.mrf.mxu3 }
 0x4e3   : > { %v3477_v41 = vpop.f32.mrf.mxu2  ;;  %v3532_v29 = vpop.f32.mrf.mxu3 }
 0x4e4   : > { %v3531_v37 = vadd.f32 %v3530_v49, %v3477_v41 }
 0x4e5   : > { %v3579_v16 = vpop.f32.mrf.mxu0 }
 0x4e6   : > { %v3599_v35 = vadd.f32 %v3579_v16, %v3531_v37 }
 0x4eb   : > { %v3479_v61 = vpop.f32.mrf.mxu2  ;;  %v3535_v43 = vpop.f32.mrf.mxu3 }
 0x4ec   : > { %v3533_v23 = vadd.f32 %v3532_v29, %v3479_v61 }
 0x4ed   : > { %v3581_v30 = vpop.f32.mrf.mxu0 }
 0x4ee   : > { %v3600_v36 = vadd.f32 %v3581_v30, %v3533_v23 }
 0x4f3   : > { %v3482_v46 = vpop.f32.mrf.mxu2  ;;  %v3537_v27 = vpop.f32.mrf.mxu3 }
 0x4f4   : > { %v3536_v12 = vadd.f32 %v3535_v43, %v3482_v46 }
 0x4f5   : > { %v3584_v14 = vpop.f32.mrf.mxu0 }
 0x4f6   : > { %v3601_v32 = vadd.f32 %v3584_v14, %v3536_v12 }
 0x4fb   : > { %v3484_v63 = vpop.f32.mrf.mxu2  ;;  %v3540_v15 = vpop.f32.mrf.mxu3 }
 0x4fc   : > { %v3538_v3 = vadd.f32 %v3537_v27, %v3484_v63 }
 0x4fd   : > { %v3586_v26 = vpop.f32.mrf.mxu0 }
 0x4fe   : > { %v3602_v19 = vadd.f32 %v3586_v26, %v3538_v3 }
 0x503   : > { %v3487_v39 = vpop.f32.mrf.mxu2  ;;  %v7595_v50 = vpop.f32.mrf.mxu3 }
 0x504   : > { %v7597_v52 = vadd.f32 %v3540_v15, %v3487_v39 }
 0x505   : > { %v3589_v31 = vpop.f32.mrf.mxu0 }
 0x506   : > { %v3603_v12 = vadd.f32 %v3589_v31, %v7597_v52 }
 0x50b   : > { %v7599_v42 = vpop.f32.mrf.mxu2  ;;  %v3545_v55 = vpop.f32.mrf.mxu3 }
 0x50c   : > { %v3543_v23 = vadd.f32 %v7595_v50, %v7599_v42 }
 0x50d   : > { %v3591_v6 = vpop.f32.mrf.mxu0 }
 0x513   : > { %v3492_v1 = vpop.f32.mrf.mxu2  ;;  %v7601_v58 = vpop.f32.mrf.mxu3 }
 0x514   : > { %v7603_v20 = vadd.f32 %v3545_v55, %v3492_v1 }
 0x51b   : > { %v7605_v47 = vpop.f32.mrf.mxu2  ;;  %v3693_v11 = vpop.f32.mrf.mxu3 }
 0x523   : > { %v3636_v25 = vpop.f32.mrf.mxu2  ;;  %v3695_v40 = vpop.f32.mrf.mxu3 }
 0x524   : > { %v3656_v21 = vadd.f32 %v3636_v25, %v3599_v35 }
 0x526   : > { %v3713_v22 = vadd.f32 %v3693_v11, %v3656_v21 }
 0x528   : > { %v7618_v18 = vadd.f32 %v7610_v7, %v3713_v22 }
 0x52a   : > { %v5025_v24 = vmul.f32 -1.442695, %v7618_v18 }
 0x52b   : > { %v3638_v57 = vpop.f32.mrf.mxu2  ;;  %v3698_v51 = vpop.f32.mrf.mxu3 }
 0x52c   : > { %5442 = vpow2.f32 %v5025_v24  ;;  %v3657_v33 = vadd.f32 %v3638_v57, %v3600_v36 }
 0x52e   : > { %v3714_v53 = vadd.f32 %v3695_v40, %v3657_v33 }
 0x530   : > { %v7629_v0 = vadd.f32 %v7610_v7, %v3714_v53 }
 0x532   : > { %v5443_v10 = vpop.eup %5442  ;;  %v5026_v13 = vmul.f32 -1.442695, %v7629_v0 }
 0x533   : > { %v3755_v9 = vadd.f32 1.0, %v5443_v10  ;;  %v3641_v59 = vpop.f32.mrf.mxu2  ;;  %v3700_v44 = vpop.f32.mrf.mxu3 }
 0x534   : > { %5444 = vpow2.f32 %v5026_v13  ;;  %v3658_v60 = vadd.f32 %v3641_v59, %v3601_v32  ;;  %v3594_v32 = vpop.f32.mrf.mxu0 }
 0x535   : > { %5446 = vrcp.f32 %v3755_v9  ;;  %v3774_v16 = vand.u32 2147483648, %v3755_v9  ;;  %vm3768_vm10 = vweird.f32 %v3755_v9  ;;  %v3772_v1 = vand.u32 2147483647, %v3755_v9 }
 0x536   : > { %v3715_v34 = vadd.f32 %v3698_v51, %v3658_v60 }
 0x537   : > { %v3775_v22 = vor.u32 1.1754944e-38, %v3774_v16  ;;  %vm3773_vm15 = vcmp.eq.f32.partialorder %v3772_v1, 8.507059e+37 }
 0x538   : > { %v7639_v8 = vadd.f32 %v7610_v7, %v3715_v34 }
 0x53a   : > { %v5445_v38 = vpop.eup %5444  ;;  %v5027_v45 = vmul.f32 -1.442695, %v7639_v8 }
 0x53b   : > { %v5447_v28 = vpop.eup %5446  ;;  %v3756_v5 = vadd.f32 1.0, %v5445_v38  ;;  %v3643_v62 = vpop.f32.mrf.mxu2 }
 0x53c   : > { %v3764_v17 = vmul.f32 %v5447_v28, %v3755_v9  ;;  %5448 = vpow2.f32 %v5027_v45  ;;  %v3659_v54 = vadd.f32 %v3643_v62, %v3602_v19  ;;  %v3703_v29 = vpop.f32.mrf.mxu3  ;;  %vm3769_vm9 = vweird.f32 %v5447_v28 }
 0x53d   : > { %5450 = vrcp.f32 %v3756_v5  ;;  %vm7651_vm13 = vmor %vm3768_vm10, %vm3769_vm9  ;;  %v3787_v25 = vand.u32 2147483647, %v3756_v5  ;;  %v3789_v52 = vand.u32 2147483648, %v3756_v5  ;;  %vm3783_vm0 = vweird.f32 %v3756_v5 }
 0x53e   : > { %v3765_v49 = vsub.f32 1.0, %v3764_v17  ;;  %v3716_v41 = vadd.f32 %v3700_v44, %v3659_v54  ;;  %v3604_v9 = vadd.f32 %v3591_v6, %v3543_v23  ;;  %v3605_v19 = vadd.f32 %v3594_v32, %v7603_v20 }
 0x53f   : > { %v3790_v53 = vor.u32 1.1754944e-38, %v3789_v52  ;;  %vm3788_vm4 = vcmp.eq.f32.partialorder %v3787_v25, 8.507059e+37 }
 0x540   : > { %v3766_v37 = vmul.f32 %v5447_v28, %v3765_v49  ;;  %v7644_v61 = vadd.f32 %v7610_v7, %v3716_v41 }
 0x542   : > { %v5449_v43 = vpop.eup %5448  ;;  %v5028_v46 = vmul.f32 -1.442695, %v7644_v61  ;;  %v3767_v39 = vadd.f32 %v5447_v28, %v3766_v37  ;;  %v3596_v37 = vpop.f32.mrf.mxu0 }
 0x543   : > { %v5451_v27 = vpop.eup %5450  ;;  %v7648_v63 = vadd.f32 1.0, %v5449_v43  ;;  %v3646_v15 = vpop.f32.mrf.mxu2 }
 0x544   : > { %v3779_v55 = vmul.f32 %v5451_v27, %v3756_v5  ;;  %5452 = vpow2.f32 %v5028_v46  ;;  %v3660_v11 = vadd.f32 %v3646_v15, %v3603_v12  ;;  %v3771_v40 = vsel %vm7651_vm13, %v5447_v28, %v3767_v39  ;;  %v3705_v36 = vpop.f32.mrf.mxu3 }
 0x545   : > { %5454 = vrcp.f32 %v7648_v63  ;;  %vm3784_vm14 = vweird.f32 %v5451_v27  ;;  %v3776_v26 = vsel %vm3773_vm15, %v3775_v22, %v3771_v40  ;;  %vm3798_vm11 = vweird.f32 %v7648_v63 }
 0x546   : > { %v3780_v30 = vsub.f32 1.0, %v3779_v55  ;;  %v3717_v21 = vadd.f32 %v3703_v29, %v3660_v11  ;;  %vm3785_vm3 = vmor %vm3783_vm0, %vm3784_vm14  ;;  %v3883_v2 = vmul.f32 %v3776_v26, %v7618_v18  ;;  %v3804_v20 = vand.u32 2147483648, %v7648_v63 }
 0x547   : > { %v3802_v6 = vand.u32 2147483647, %v7648_v63 }
 0x548   : > { %v3781_v14 = vmul.f32 %v5451_v27, %v3780_v30  ;;  %v7660_v51 = vadd.f32 %v7610_v7, %v3717_v21  ;;  %v3805_v16 = vor.u32 1.1754944e-38, %v3804_v20 }
 0x549   : > { %vm3803_vm7 = vcmp.eq.f32.partialorder %v3802_v6, 8.507059e+37 }
 0x54a   : > { %v5453_v24 = vpop.eup %5452  ;;  %v3782_v57 = vadd.f32 %v5451_v27, %v3781_v14  ;;  %v5029_v42 = vmul.f32 -1.442695, %v7660_v51 }
 0x54b   : > { %v5455_v33 = vpop.eup %5454  ;;  %v3758_v56 = vadd.f32 1.0, %v5453_v24  ;;  %v3648_v10 = vpop.f32.mrf.mxu2 }
 0x54c   : > { %v3786_v13 = vsel %vm3785_vm3, %v5451_v27, %v3782_v57  ;;  %v3794_v50 = vmul.f32 %v5455_v33, %v7648_v63  ;;  %v3661_v3 = vadd.f32 %v3648_v10, %v3604_v9  ;;  %vm3799_vm8 = vweird.f32 %v5455_v33  ;;  %v3708_v62 = vpop.f32.mrf.mxu3 }
 0x54d   : > { %v3791_v59 = vsel %vm3788_vm4, %v3790_v53, %v3786_v13  ;;  %5456 = vrcp.f32 %v3758_v56  ;;  %vm7678_vm5 = vmor %vm3798_vm11, %vm3799_vm8  ;;  %v3819_v12 = vand.u32 2147483648, %v3758_v56  ;;  %vm3813_vm2 = vweird.f32 %v3758_v56 }
 0x54e   : > { %v3884_v60 = vmul.f32 %v3791_v59, %v7629_v0  ;;  %v3795_v44 = vsub.f32 1.0, %v3794_v50  ;;  %5458 = vpow2.f32 %v5029_v42  ;;  %v3718_v38 = vadd.f32 %v3705_v36, %v3661_v3 }
 0x54f   : > { %v3548_v0 = vadd.f32 %v7601_v58, %v7605_v47  ;;  %v3817_v47 = vand.u32 2147483647, %v3758_v56  ;;  %v3820_v11 = vor.u32 1.1754944e-38, %v3819_v12 }
 0x550   : > { %v3891_v34 = vpack.c.bf16 %v3884_v60, %v3883_v2  ;;  %v3796_v31 = vmul.f32 %v5455_v33, %v3795_v44  ;;  %v7669_v5 = vadd.f32 %v7610_v7, %v3718_v38 }
 0x551   : > { %v3606_v55 = vadd.f32 %v3596_v37, %v3548_v0  ;;  %vm3818_vm10 = vcmp.eq.f32.partialorder %v3817_v47, 8.507059e+37 }
 0x552   : > { %5041 = vmatmul.msk.bf16.vlgmr.msrb.gmra.mxu0 %vm3455_vm12, %v3891_v34  ;;  %v3797_v28 = vadd.f32 %v5455_v33, %v3796_v31  ;;  %v5030_v29 = vmul.f32 -1.442695, %v7669_v5 }
 0x553   : > { %v5457_v45 = vpop.eup %5456  ;;  %v3651_v18 = vpop.f32.mrf.mxu2 }
 0x554   : > { %v5459_v17 = vpop.eup %5458  ;;  %v3809_v54 = vmul.f32 %v5457_v45, %v3758_v56  ;;  %v3662_v49 = vadd.f32 %v3651_v18, %v3605_v19  ;;  %v3801_v58 = vsel %vm7678_vm5, %v5455_v33, %v3797_v28  ;;  %vm3814_vm6 = vweird.f32 %v5457_v45  ;;  %v3710_v21 = vpop.f32.mrf.mxu3 }
 0x555   : > { %v7675_v41 = vadd.f32 1.0, %v5459_v17  ;;  %v3806_v30 = vsel %vm3803_vm7, %v3805_v16, %v3801_v58  ;;  %vm3815_vm9 = vmor %vm3813_vm2, %vm3814_vm6 }
 0x556   : > { %v3810_v46 = vsub.f32 1.0, %v3809_v54  ;;  %v3719_v27 = vadd.f32 %v3708_v62, %v3662_v49  ;;  %v3885_v22 = vmul.f32 %v3806_v30, %v7639_v8 }
 0x557   : > { %5460 = vrcp.f32 %v7675_v41  ;;  %v3834_v9 = vand.u32 2147483648, %v7675_v41  ;;  %vm3828_vm14 = vweird.f32 %v7675_v41 }
 0x558   : > { %v3811_v15 = vmul.f32 %v5457_v45, %v3810_v46  ;;  %5462 = vpow2.f32 %v5030_v29  ;;  %v7687_v39 = vadd.f32 %v7610_v7, %v3719_v27 }
 0x55a   : > { %v3812_v1 = vadd.f32 %v5457_v45, %v3811_v15  ;;  %v5031_v63 = vmul.f32 -1.442695, %v7687_v39 }
 0x55b   : > { %v3653_v35 = vpop.f32.mrf.mxu2 }
 0x55c   : > { %v3816_v25 = vsel %vm3815_vm9, %v5457_v45, %v3812_v1  ;;  %5464 = vpow2.f32 %v5031_v63  ;;  %v3663_v52 = vadd.f32 %v3653_v35, %v3606_v55  ;;  %v3835_v45 = vor.u32 1.1754944e-38, %v3834_v9 }
 0x55d   : > { %v5461_v40 = vpop.eup %5460  ;;  %v3821_v14 = vsel %vm3818_vm10, %v3820_v11, %v3816_v25 }
 0x55e   : > { %v5463_v23 = vpop.eup %5462  ;;  %v3886_v36 = vmul.f32 %v3821_v14, %v7644_v61  ;;  %v3824_v24 = vmul.f32 %v5461_v40, %v7675_v41  ;;  %v3720_v57 = vadd.f32 %v3710_v21, %v3663_v52  ;;  %vm3829_vm13 = vweird.f32 %v5461_v40  ;;  %v3982_v52 = vpop.f32.mrf.mxu1  ;;  %v7710_v14 = vld [vmem:[%s7826_s2 + $0x4] ss:$0 sm:$0xff] }
 0x55f   : > { %v3760_v33 = vadd.f32 1.0, %v5463_v23  ;;  %vm3830_vm15 = vmor %vm3828_vm14, %vm3829_vm13 }
 0x560   : > { %v3825_v26 = vsub.f32 1.0, %v3824_v24  ;;  %v7694_v53 = vadd.f32 %v7610_v7, %v3720_v57  ;;  %v3892_v56 = vpack.c.bf16 %v3886_v36, %v3885_v22  ;;  %v3832_v7 = vand.u32 2147483647, %v7675_v41 }
 0x561   : > { %5466 = vrcp.f32 %v3760_v33  ;;  %v3847_v44 = vand.u32 2147483647, %v3760_v33  ;;  %v3849_v3 = vand.u32 2147483648, %v3760_v33  ;;  %vm3843_vm4 = vweird.f32 %v3760_v33 }
 0x562   : > { %v5465_v10 = vpop.eup %5464  ;;  %v5032_v32 = vmul.f32 -1.442695, %v7694_v53  ;;  %5042 = vmatmul.msk.bf16.gmra.mxu0 %vm3455_vm12, %v3892_v56  ;;  %v3826_v50 = vmul.f32 %v5461_v40, %v3825_v26  ;;  %vm3833_vm3 = vcmp.eq.f32.partialorder %v3832_v7, 8.507059e+37 }
 0x563   : > { %v3761_v13 = vadd.f32 1.0, %v5465_v10  ;;  %v3850_v17 = vor.u32 1.1754944e-38, %v3849_v3  ;;  %vm3848_vm11 = vcmp.eq.f32.partialorder %v3847_v44, 8.507059e+37 }
 0x564   : > { %5468 = vpow2.f32 %v5032_v32  ;;  %v3827_v61 = vadd.f32 %v5461_v40, %v3826_v50 }
 0x565   : > { %5470 = vrcp.f32 %v3761_v13  ;;  %v3864_v46 = vand.u32 2147483648, %v3761_v13  ;;  %vm3858_vm6 = vweird.f32 %v3761_v13  ;;  %v3862_v27 = vand.u32 2147483647, %v3761_v13 }
 0x566   : > { %v3831_v31 = vsel %vm3830_vm15, %v5461_v40, %v3827_v61  ;;  %v3984_v40 = vpop.f32.mrf.mxu1 }
 0x567   : > { %v5467_v8 = vpop.eup %5466  ;;  %v3836_v18 = vsel %vm3833_vm3, %v3835_v45, %v3831_v31  ;;  %vm3863_vm9 = vcmp.eq.f32.partialorder %v3862_v27, 8.507059e+37 }
 0x568   : > { %v3839_v42 = vmul.f32 %v5467_v8, %v3760_v33  ;;  %vm3844_vm0 = vweird.f32 %v5467_v8  ;;  %v3887_v20 = vmul.f32 %v3836_v18, %v7660_v51  ;;  %v3865_v51 = vor.u32 1.1754944e-38, %v3864_v46 }
 0x569   : > { %vm3845_vm8 = vmor %vm3843_vm4, %vm3844_vm0 }
 0x56a   : > { %v5469_v59 = vpop.eup %5468  ;;  %v3840_v2 = vsub.f32 1.0, %v3839_v42 }
 0x56b   : > { %v5471_v60 = vpop.eup %5470  ;;  %v3762_v34 = vadd.f32 1.0, %v5469_v59 }
 0x56c   : > { %v3841_v38 = vmul.f32 %v5467_v8, %v3840_v2  ;;  %v3854_v19 = vmul.f32 %v5471_v60, %v3761_v13  ;;  %vm3859_vm5 = vweird.f32 %v5471_v60 }
 0x56d   : > { %5472 = vrcp.f32 %v3762_v34  ;;  %vm3860_vm7 = vmor %vm3858_vm6, %vm3859_vm5  ;;  %v3879_v47 = vand.u32 2147483648, %v3762_v34  ;;  %v3877_v55 = vand.u32 2147483647, %v3762_v34  ;;  %vm3873_vm10 = vweird.f32 %v3762_v34 }
 0x56e   : > { %v3842_v28 = vadd.f32 %v5467_v8, %v3841_v38  ;;  %v3855_v62 = vsub.f32 1.0, %v3854_v19 }
 0x56f   : > { %v3880_v1 = vor.u32 1.1754944e-38, %v3879_v47  ;;  %vm3878_vm14 = vcmp.eq.f32.partialorder %v3877_v55, 8.507059e+37 }
 0x570   : > { %v3846_v0 = vsel %vm3845_vm8, %v5467_v8, %v3842_v28  ;;  %v3856_v54 = vmul.f32 %v5471_v60, %v3855_v62 }
 0x571   : > { %v3851_v49 = vsel %vm3848_vm11, %v3850_v17, %v3846_v0 }
 0x572   : > { %v3888_v41 = vmul.f32 %v3851_v49, %v7669_v5  ;;  %v3857_v37 = vadd.f32 %v5471_v60, %v3856_v54 }
 0x573   : > { %v5473_v29 = vpop.eup %5472 }
 0x574   : > { %v3869_v43 = vmul.f32 %v5473_v29, %v3762_v34  ;;  %v3893_v6 = vpack.c.bf16 %v3888_v41, %v3887_v20  ;;  %v3861_v12 = vsel %vm3860_vm7, %v5471_v60, %v3857_v37  ;;  %vm3874_vm2 = vweird.f32 %v5473_v29 }
 0x575   : > { %v3866_v16 = vsel %vm3863_vm9, %v3865_v51, %v3861_v12  ;;  %vm3875_vm13 = vmor %vm3873_vm10, %vm3874_vm2 }
 0x576   : > { %v3870_v58 = vsub.f32 1.0, %v3869_v43  ;;  %5043 = vmatmul.msk.bf16.gmra.mxu0 %vm3455_vm12, %v3893_v6  ;;  %v3889_v11 = vmul.f32 %v3866_v16, %v7687_v39 }
 0x578   : > { %v3871_v15 = vmul.f32 %v5473_v29, %v3870_v58 }
 0x57a   : > { %v3872_v5 = vadd.f32 %v5473_v29, %v3871_v15 }
 0x57c   : > { %v3876_v63 = vsel %vm3875_vm13, %v5473_v29, %v3872_v5 }
 0x57d   : > { %v3881_v30 = vsel %vm3878_vm14, %v3880_v1, %v3876_v63 }
 0x57e   : > { %v3890_v35 = vmul.f32 %v3881_v30, %v7694_v53 }
 0x580   : > { %v3894_v25 = vpack.c.bf16 %v3890_v35, %v3889_v11 }
 0x586   : > { %5044 = vmatmul.msk.bf16.gmra.mxu0 %vm3455_vm12, %v3894_v25 }
 0x5cf   : > { %v3934_v21 = vpop.f32.mrf.mxu0 }
 0x5d0   : > { %v3935_v23 = vadd.f32 %v7710_v14, %v3934_v21 }
 0x5d2   : > { %v3986_v22 = vadd.f32 %v3982_v52, %v3935_v23 }
 0x5d4   : > { %5474 = vtanh.f32 %v3986_v22  ;;  %v5053_v10 = vmul.f32 -1.442695, %v3986_v22 }
 0x5d6   : > { %5476 = vpow2.f32 %v5053_v10 }
 0x5d7   : > { %v3936_v36 = vpop.f32.mrf.mxu0 }
 0x5d8   : > { %v3937_v0 = vadd.f32 %v7710_v14, %v3936_v36 }
 0x5da   : > { %v5475_v24 = vpop.eup %5474 }
 0x5db   : > { %4009 = vrot.lane.b32.xlu1 %v5475_v24, %s5570_s19 }
 0x5dc   : > { %v5477_v32 = vpop.eup %5476 }
 0x5dd   : > { %v3990_v13 = vadd.f32 1.0, %v5477_v32 }
 0x5df   : > { %v7714_v39 = vpop.f32.mrf.mxu0  ;;  %5478 = vrcp.f32 %v3990_v13  ;;  %v4002_v59 = vand.u32 2147483648, %v3990_v13  ;;  %vm3996_vm0 = vweird.f32 %v3990_v13  ;;  %v4000_v7 = vand.u32 2147483647, %v3990_v13 }
 0x5e0   : > { %v3940_v40 = vadd.f32 %v7710_v14, %v7714_v39 }
 0x5e1   : > { %v4003_v60 = vor.u32 1.1754944e-38, %v4002_v59  ;;  %vm4001_vm4 = vcmp.eq.f32.partialorder %v4000_v7, 8.507059e+37 }
 0x5e5   : > { %v5479_v50 = vpop.eup %5478 }
 0x5e6   : > { %v3992_v8 = vmul.f32 %v5479_v50, %v3990_v13  ;;  %vm3997_vm15 = vweird.f32 %v5479_v50 }
 0x5e7   : > { %v7716_v57 = vpop.f32.mrf.mxu0  ;;  %vm3998_vm3 = vmor %vm3996_vm0, %vm3997_vm15 }
 0x5e8   : > { %v3993_v61 = vsub.f32 1.0, %v3992_v8 }
 0x5ea   : > { %v3994_v42 = vmul.f32 %v5479_v50, %v3993_v61 }
 0x5ec   : > { %v3995_v9 = vadd.f32 %v5479_v50, %v3994_v42 }
 0x5ee   : > { %v3999_v2 = vsel %vm3998_vm3, %v5479_v50, %v3995_v9 }
 0x5ef   : > { %v4004_v3 = vsel %vm4001_vm4, %v4003_v60, %v3999_v2 }
 0x5f0   : > { %v4007_v31 = vmul.f32 0.0, %v4004_v3 }
 0x5f3   : > { %v7718_v33 = vpop.f32.mrf.mxu0 }
 0x5fb   : > { %v7720_v26 = vpop.f32.mrf.mxu0 }
 0x603   : > { %v3949_v53 = vpop.f32.mrf.mxu0 }
 0x604   : > { %v7723_v56 = vadd.f32 %v7710_v14, %v3949_v53 }
 0x64d   : > { %v4010_v44 = vpop.permute.xlu1 %4009 }
 0x64e   : > { %v4012_v34 = vmul.f32 %v4010_v44, %v4004_v3 }
 0x650   : > { %4014 = vrot.lane.b32.xlu2 %v4012_v34, %s5571_s20 }
 0x6aa   : > { %v4015_v38 = vpop.permute.xlu2 %4014 }
 0x6ab   : > { %v4017_v19 = vadd.f32 %v4015_v38, %v4007_v31 }
 0x6ad   : > { %5480 = vtanh.f32 %v4017_v19 }
 0x6b3   : > { %v5481_v45 = vpop.eup %5480 }
 0x6b4   : > { %4020 = vrot.lane.b32.xlu0 %v5481_v45, %s5570_s19 }
 0x726   : > { %v4021_v28 = vpop.permute.xlu0 %4020 }
 0x727   : > { %v4023_v62 = vmul.f32 %v4021_v28, %v4004_v3 }
 0x729   : > { %v4024_v18 = vpack.c.bf16 %v4023_v62, %v4023_v62  ;;  %v3942_v62 = vadd.f32 %v7710_v14, %v7716_v57 }
 0x72b   : > { %4026 = vrot.lane.b32.xlu1 %v4024_v18, %s5571_s20 }
 0x79d   : > { %v4027_v17 = vpop.permute.xlu1 %4026 }
 0x79e   : > { %5054 = vmatmul.msk.bf16.vlgmr.msra.gmra.mxu1 %vm3455_vm12, %v4027_v17 }
 0x79f   : > { %4327 = vmatpush.bf16.msra.mxu1 %v7587_v4 }
 0x7a3   : > { %4328 = vmatpush.bf16.msra.mxu1 %v7615_v48 }
 0x81b   : > { %v4040_v54 = vpop.f32.mrf.mxu1 }
 0x81c   : > { %v4044_v49 = vadd.f32 %v4040_v54, %v3937_v0 }
 0x81e   : > { %5482 = vtanh.f32 %v4044_v49  ;;  %v5055_v29 = vmul.f32 -1.442695, %v4044_v49 }
 0x820   : > { %5484 = vpow2.f32 %v5055_v29 }
 0x823   : > { %v4042_v20 = vpop.f32.mrf.mxu1 }
 0x824   : > { %v5483_v41 = vpop.eup %5482 }
 0x825   : > { %4067 = vrot.lane.b32.xlu2 %v5483_v41, %s5570_s19 }
 0x826   : > { %v5485_v37 = vpop.eup %5484 }
 0x827   : > { %v4048_v43 = vadd.f32 1.0, %v5485_v37 }
 0x829   : > { %5486 = vrcp.f32 %v4048_v43  ;;  %v4060_v48 = vand.u32 2147483648, %v4048_v43  ;;  %vm4054_vm11 = vweird.f32 %v4048_v43  ;;  %v4058_v47 = vand.u32 2147483647, %v4048_v43 }
 0x82b   : > { %v4061_v15 = vor.u32 1.1754944e-38, %v4060_v48  ;;  %vm4059_vm6 = vcmp.eq.f32.partialorder %v4058_v47, 8.507059e+37 }
 0x82f   : > { %v5487_v6 = vpop.eup %5486 }
 0x830   : > { %v4050_v46 = vmul.f32 %v5487_v6, %v4048_v43  ;;  %vm4055_vm8 = vweird.f32 %v5487_v6 }
 0x831   : > { %vm4056_vm5 = vmor %vm4054_vm11, %vm4055_vm8 }
 0x832   : > { %v4051_v27 = vsub.f32 1.0, %v4050_v46 }
 0x834   : > { %v4052_v4 = vmul.f32 %v5487_v6, %v4051_v27 }
 0x836   : > { %v4053_v58 = vadd.f32 %v5487_v6, %v4052_v4 }
 0x838   : > { %v4057_v12 = vsel %vm4056_vm5, %v5487_v6, %v4053_v58 }
 0x839   : > { %v4062_v51 = vsel %vm4059_vm6, %v4061_v15, %v4057_v12 }
 0x83a   : > { %v4065_v16 = vmul.f32 %v4062_v51, %v4017_v19 }
 0x87f   : > { %v4068_v55 = vpop.permute.xlu2 %4067 }
 0x880   : > { %v4070_v5 = vmul.f32 %v4068_v55, %v4062_v51 }
 0x882   : > { %4072 = vrot.lane.b32.xlu0 %v4070_v5, %s5571_s20 }
 0x8f4   : > { %v4073_v1 = vpop.permute.xlu0 %4072 }
 0x8f5   : > { %v4075_v63 = vadd.f32 %v4073_v1, %v4065_v16 }
 0x8f7   : > { %5488 = vtanh.f32 %v4075_v63 }
 0x8fd   : > { %v5489_v30 = vpop.eup %5488 }
 0x8fe   : > { %4078 = vrot.lane.b32.xlu1 %v5489_v30, %s5570_s19 }
 0x970   : > { %v4079_v11 = vpop.permute.xlu1 %4078 }
 0x971   : > { %v4081_v35 = vmul.f32 %v4079_v11, %v4062_v51  ;;  %v3945_v11 = vadd.f32 %v7710_v14, %v7718_v33 }
 0x973   : > { %v4082_v25 = vpack.c.bf16 %v4081_v35, %v4081_v35 }
 0x975   : > { %4084 = vrot.lane.b32.xlu2 %v4082_v25, %s5571_s20 }
 0x9cf   : > { %v4085_v52 = vpop.permute.xlu2 %4084 }
 0x9d0   : > { %5056 = vmatmul.msk.bf16.vlgmr.msrb.gmra.mxu1 %vm3455_vm12, %v4085_v52 }
 0xa4d   : > { %v4098_v21 = vpop.f32.mrf.mxu1 }
 0xa4e   : > { %v4102_v23 = vadd.f32 %v4098_v21, %v3940_v40 }
 0xa50   : > { %5490 = vtanh.f32 %v4102_v23  ;;  %v5057_v24 = vmul.f32 -1.442695, %v4102_v23 }
 0xa52   : > { %5492 = vpow2.f32 %v5057_v24 }
 0xa55   : > { %v4100_v22 = vpop.f32.mrf.mxu1 }
 0xa56   : > { %v5491_v36 = vpop.eup %5490 }
 0xa57   : > { %4125 = vrot.lane.b32.xlu0 %v5491_v36, %s5570_s19 }
 0xa58   : > { %v5493_v53 = vpop.eup %5492 }
 0xa59   : > { %v4106_v10 = vadd.f32 1.0, %v5493_v53 }
 0xa5b   : > { %5494 = vrcp.f32 %v4106_v10  ;;  %v4118_v42 = vand.u32 2147483648, %v4106_v10  ;;  %vm4112_vm2 = vweird.f32 %v4106_v10  ;;  %v4116_v39 = vand.u32 2147483647, %v4106_v10 }
 0xa5d   : > { %v4119_v59 = vor.u32 1.1754944e-38, %v4118_v42  ;;  %vm4117_vm10 = vcmp.eq.f32.partialorder %v4116_v39, 8.507059e+37 }
 0xa61   : > { %v5495_v32 = vpop.eup %5494 }
 0xa62   : > { %v4108_v13 = vmul.f32 %v5495_v32, %v4106_v10  ;;  %vm4113_vm7 = vweird.f32 %v5495_v32 }
 0xa63   : > { %vm4114_vm9 = vmor %vm4112_vm2, %vm4113_vm7 }
 0xa64   : > { %v4109_v50 = vsub.f32 1.0, %v4108_v13 }
 0xa66   : > { %v4110_v8 = vmul.f32 %v5495_v32, %v4109_v50 }
 0xa68   : > { %v4111_v61 = vadd.f32 %v5495_v32, %v4110_v8 }
 0xa6a   : > { %v4115_v9 = vsel %vm4114_vm9, %v5495_v32, %v4111_v61 }
 0xa6b   : > { %v4120_v2 = vsel %vm4117_vm10, %v4119_v59, %v4115_v9 }
 0xa6c   : > { %v4123_v44 = vmul.f32 %v4120_v2, %v4075_v63 }
 0xac9   : > { %v4126_v7 = vpop.permute.xlu0 %4125 }
 0xaca   : > { %v4128_v60 = vmul.f32 %v4126_v7, %v4120_v2 }
 0xacc   : > { %4130 = vrot.lane.b32.xlu1 %v4128_v60, %s5571_s20 }
 0xb3e   : > { %v4131_v3 = vpop.permute.xlu1 %4130 }
 0xb3f   : > { %v4133_v34 = vadd.f32 %v4131_v3, %v4123_v44 }
 0xb41   : > { %5496 = vtanh.f32 %v4133_v34 }
 0xb47   : > { %v5497_v31 = vpop.eup %5496 }
 0xb48   : > { %4136 = vrot.lane.b32.xlu2 %v5497_v31, %s5570_s19  ;;  %v7758_v31 = vpop.f32.mrf.mxu0 }
 0xba2   : > { %v4137_v38 = vpop.permute.xlu2 %4136 }
 0xba3   : > { %v4139_v19 = vmul.f32 %v4137_v38, %v4120_v2  ;;  %v3947_v38 = vadd.f32 %v7710_v14, %v7720_v26 }
 0xba5   : > { %v4140_v45 = vpack.c.bf16 %v4139_v19, %v4139_v19 }
 0xba7   : > { %4142 = vrot.lane.b32.xlu0 %v4140_v45, %s5571_s20 }
 0xc19   : > { %v4143_v28 = vpop.permute.xlu0 %4142 }
 0xc1a   : > { %5058 = vmatmul.msk.bf16.vlgmr.msra.gmra.mxu2 %vm3455_vm12, %v4143_v28 }
 0xc9d   : > { %v4156_v18 = vpop.f32.mrf.mxu2 }
 0xc9e   : > { %v4160_v17 = vadd.f32 %v4156_v18, %v3942_v62 }
 0xca0   : > { %5498 = vtanh.f32 %v4160_v17  ;;  %v5059_v49 = vmul.f32 -1.442695, %v4160_v17 }
 0xca2   : > { %5500 = vpow2.f32 %v5059_v49 }
 0xca5   : > { %v4158_v0 = vpop.f32.mrf.mxu2 }
 0xca6   : > { %v5499_v54 = vpop.eup %5498 }
 0xca7   : > { %4183 = vrot.lane.b32.xlu1 %v5499_v54, %s5570_s19 }
 0xca8   : > { %v5501_v20 = vpop.eup %5500 }
 0xca9   : > { %v4164_v41 = vadd.f32 1.0, %v5501_v20 }
 0xcab   : > { %5502 = vrcp.f32 %v4164_v41  ;;  %v4176_v27 = vand.u32 2147483648, %v4164_v41  ;;  %vm4170_vm14 = vweird.f32 %v4164_v41  ;;  %v4174_v57 = vand.u32 2147483647, %v4164_v41 }
 0xcad   : > { %v4177_v58 = vor.u32 1.1754944e-38, %v4176_v27  ;;  %vm4175_vm0 = vcmp.eq.f32.partialorder %v4174_v57, 8.507059e+37 }
 0xcb1   : > { %v5503_v29 = vpop.eup %5502 }
 0xcb2   : > { %v4166_v37 = vmul.f32 %v5503_v29, %v4164_v41  ;;  %vm4171_vm13 = vweird.f32 %v5503_v29 }
 0xcb3   : > { %vm4172_vm15 = vmor %vm4170_vm14, %vm4171_vm13 }
 0xcb4   : > { %v4167_v43 = vsub.f32 1.0, %v4166_v37 }
 0xcb6   : > { %v4168_v6 = vmul.f32 %v5503_v29, %v4167_v43 }
 0xcb8   : > { %v4169_v46 = vadd.f32 %v5503_v29, %v4168_v6 }
 0xcba   : > { %v4173_v4 = vsel %vm4172_vm15, %v5503_v29, %v4169_v46 }
 0xcbb   : > { %v4178_v47 = vsel %vm4175_vm0, %v4177_v58, %v4173_v4 }
 0xcbc   : > { %v4181_v15 = vmul.f32 %v4178_v47, %v4133_v34 }
 0xd19   : > { %v4184_v48 = vpop.permute.xlu1 %4183 }
 0xd1a   : > { %v4186_v12 = vmul.f32 %v4184_v48, %v4178_v47 }
 0xd1c   : > { %4188 = vrot.lane.b32.xlu2 %v4186_v12, %s5571_s20 }
 0xd76   : > { %v4189_v55 = vpop.permute.xlu2 %4188 }
 0xd77   : > { %v4191_v51 = vadd.f32 %v4189_v55, %v4181_v15 }
 0xd79   : > { %5504 = vtanh.f32 %v4191_v51 }
 0xd7f   : > { %v5505_v5 = vpop.eup %5504 }
 0xd80   : > { %4194 = vrot.lane.b32.xlu0 %v5505_v5, %s5570_s19 }
 0xdf2   : > { %v4195_v16 = vpop.permute.xlu0 %4194 }
 0xdf3   : > { %v4197_v1 = vmul.f32 %v4195_v16, %v4178_v47 }
 0xdf5   : > { %v4198_v63 = vpack.c.bf16 %v4197_v1, %v4197_v1 }
 0xdf7   : > { %4200 = vrot.lane.b32.xlu1 %v4198_v63, %s5571_s20 }
 0xe69   : > { %v4201_v30 = vpop.permute.xlu1 %4200 }
 0xe6a   : > { %5060 = vmatmul.msk.bf16.vlgmr.msra.gmra.mxu3 %vm3455_vm12, %v4201_v30 }
 0xeed   : > { %v4214_v35 = vpop.f32.mrf.mxu3 }
 0xeee   : > { %v4218_v25 = vadd.f32 %v4214_v35, %v3945_v11 }
 0xef0   : > { %5506 = vtanh.f32 %v4218_v25  ;;  %v5061_v21 = vmul.f32 -1.442695, %v4218_v25 }
 0xef2   : > { %5508 = vpow2.f32 %v5061_v21 }
 0xef5   : > { %v4216_v52 = vpop.f32.mrf.mxu3 }
 0xef6   : > { %v5507_v40 = vpop.eup %5506 }
 0xef7   : > { %4241 = vrot.lane.b32.xlu2 %v5507_v40, %s5570_s19 }
 0xef8   : > { %v5509_v23 = vpop.eup %5508 }
 0xef9   : > { %v4222_v22 = vadd.f32 1.0, %v5509_v23 }
 0xefb   : > { %5510 = vrcp.f32 %v4222_v22  ;;  %v4234_v13 = vand.u32 2147483648, %v4222_v22  ;;  %vm4228_vm4 = vweird.f32 %v4222_v22  ;;  %v4232_v33 = vand.u32 2147483647, %v4222_v22 }
 0xefd   : > { %v4235_v8 = vor.u32 1.1754944e-38, %v4234_v13  ;;  %vm4233_vm11 = vcmp.eq.f32.partialorder %v4232_v33, 8.507059e+37 }
 0xf01   : > { %v5511_v36 = vpop.eup %5510 }
 0xf02   : > { %v4224_v24 = vmul.f32 %v5511_v36, %v4222_v22  ;;  %vm4229_vm3 = vweird.f32 %v5511_v36 }
 0xf03   : > { %vm4230_vm8 = vmor %vm4228_vm4, %vm4229_vm3 }
 0xf04   : > { %v4225_v53 = vsub.f32 1.0, %v4224_v24 }
 0xf06   : > { %v4226_v10 = vmul.f32 %v5511_v36, %v4225_v53 }
 0xf08   : > { %v4227_v32 = vadd.f32 %v5511_v36, %v4226_v10 }
 0xf0a   : > { %v4231_v50 = vsel %vm4230_vm8, %v5511_v36, %v4227_v32 }
 0xf0b   : > { %v4236_v42 = vsel %vm4233_vm11, %v4235_v8, %v4231_v50 }
 0xf0c   : > { %v4239_v9 = vmul.f32 %v4236_v42, %v4191_v51 }
 0xf51   : > { %v4242_v61 = vpop.permute.xlu2 %4241 }
 0xf52   : > { %v4244_v39 = vmul.f32 %v4242_v61, %v4236_v42 }
 0xf54   : > { %4246 = vrot.lane.b32.xlu0 %v4244_v39, %s5571_s20 }
 0xfc6   : > { %v4247_v59 = vpop.permute.xlu0 %4246 }
 0xfc7   : > { %v4249_v7 = vadd.f32 %v4247_v59, %v4239_v9  ;;  %v3952_v59 = vadd.f32 %v7710_v14, %v7758_v31 }
 0xfc9   : > { %5512 = vtanh.f32 %v4249_v7 }
 0xfcf   : > { %v5513_v2 = vpop.eup %5512 }
 0xfd0   : > { %4252 = vrot.lane.b32.xlu1 %v5513_v2, %s5570_s19 }
0x1042   : > { %v4253_v60 = vpop.permute.xlu1 %4252 }
0x1043   : > { %v4255_v44 = vmul.f32 %v4253_v60, %v4236_v42 }
0x1045   : > { %v4256_v3 = vpack.c.bf16 %v4255_v44, %v4255_v44 }
0x1047   : > { %4258 = vrot.lane.b32.xlu2 %v4256_v3, %s5571_s20 }
0x10a1   : > { %v4259_v34 = vpop.permute.xlu2 %4258 }
0x10a2   : > { %5062 = vmatmul.msk.bf16.vlgmr.msra.gmra.mxu0 %vm3455_vm12, %v4259_v34 }
0x111f   : > { %v4272_v19 = vpop.f32.mrf.mxu0 }
0x1120   : > { %v4276_v45 = vadd.f32 %v4272_v19, %v3947_v38 }
0x1122   : > { %5514 = vtanh.f32 %v4276_v45  ;;  %v5063_v18 = vmul.f32 -1.442695, %v4276_v45 }
0x1124   : > { %5516 = vpow2.f32 %v5063_v18 }
0x1127   : > { %v4274_v28 = vpop.f32.mrf.mxu0 }
0x1128   : > { %v5515_v62 = vpop.eup %5514 }
0x1129   : > { %4299 = vrot.lane.b32.xlu0 %v5515_v62, %s5570_s19 }
0x112a   : > { %v5517_v17 = vpop.eup %5516 }
0x112b   : > { %v4280_v0 = vadd.f32 1.0, %v5517_v17 }
0x112d   : > { %5518 = vrcp.f32 %v4280_v0  ;;  %v4292_v37 = vand.u32 2147483648, %v4280_v0  ;;  %vm4286_vm6 = vweird.f32 %v4280_v0  ;;  %v4290_v26 = vand.u32 2147483647, %v4280_v0 }
0x112f   : > { %v4293_v6 = vor.u32 1.1754944e-38, %v4292_v37  ;;  %vm4291_vm2 = vcmp.eq.f32.partialorder %v4290_v26, 8.507059e+37 }
0x1133   : > { %v5519_v54 = vpop.eup %5518 }
0x1134   : > { %v4282_v49 = vmul.f32 %v5519_v54, %v4280_v0  ;;  %vm4287_vm5 = vweird.f32 %v5519_v54 }
0x1135   : > { %vm4288_vm7 = vmor %vm4286_vm6, %vm4287_vm5 }
0x1136   : > { %v4283_v20 = vsub.f32 1.0, %v4282_v49 }
0x1138   : > { %v4284_v41 = vmul.f32 %v5519_v54, %v4283_v20 }
0x113a   : > { %v4285_v29 = vadd.f32 %v5519_v54, %v4284_v41 }
0x113c   : > { %v4289_v43 = vsel %vm4288_vm7, %v5519_v54, %v4285_v29 }
0x113d   : > { %v4294_v27 = vsel %vm4291_vm2, %v4293_v6, %v4289_v43 }
0x113e   : > { %v4297_v4 = vmul.f32 %v4294_v27, %v4249_v7 }
0x119b   : > { %v4300_v46 = vpop.permute.xlu0 %4299 }
0x119c   : > { %v4302_v57 = vmul.f32 %v4300_v46, %v4294_v27 }
0x119e   : > { %4304 = vrot.lane.b32.xlu1 %v4302_v57, %s5571_s20  ;;  %v5132_v57 = vld [vmem:[%s7825_s1 + $0xd0] sm:$0xff] }
0x1210   : > { %v4305_v58 = vpop.permute.xlu1 %4304 }
0x1211   : > { %v4307_v48 = vadd.f32 %v4305_v58, %v4297_v4 }
0x1213   : > { %5520 = vtanh.f32 %v4307_v48 }
0x1219   : > { %v5521_v47 = vpop.eup %5520 }
0x121a   : > { %4310 = vrot.lane.b32.xlu2 %v5521_v47, %s5570_s19 }
0x1274   : > { %v4311_v12 = vpop.permute.xlu2 %4310 }
0x1275   : > { %v4313_v15 = vmul.f32 %v4311_v12, %v4294_v27  ;;  %v5133_v27 = vld [vmem:[%s7825_s1 + $0xd8] sm:$0xff] }
0x1276   : > { %4481 = vmatpush.bf16.msrb.mxu3 %v5133_v27 }
0x1277   : > { %v4314_v55 = vpack.c.bf16 %v4313_v15, %v4313_v15 }
0x1279   : > { %4316 = vrot.lane.b32.xlu0 %v4314_v55, %s5571_s20 }
0x127a   : > { %4482 = vmatpush.bf16.msrb.mxu3 %v5132_v57 }
0x12eb   : > { %v4317_v51 = vpop.permute.xlu0 %4316 }
0x12ec   : > { %5064 = vmatmul.msk.bf16.vlgmr.msra.gmra.mxu1 %vm3455_vm12, %v4317_v51 }
0x1369   : > { %v4330_v5 = vpop.f32.mrf.mxu1 }
0x136a   : > { %v4334_v16 = vadd.f32 %v4330_v5, %v7723_v56 }
0x136c   : > { %5522 = vtanh.f32 %v4334_v16  ;;  %v5065_v30 = vmul.f32 -1.442695, %v4334_v16 }
0x136e   : > { %5524 = vpow2.f32 %v5065_v30 }
0x1371   : > { %v4332_v1 = vpop.f32.mrf.mxu1 }
0x1372   : > { %v5523_v63 = vpop.eup %5522 }
0x1373   : > { %4357 = vrot.lane.b32.xlu1 %v5523_v63, %s5570_s19 }
0x1374   : > { %v5525_v11 = vpop.eup %5524 }
0x1375   : > { %v4338_v35 = vadd.f32 1.0, %v5525_v11 }
0x1377   : > { %5526 = vrcp.f32 %v4338_v35  ;;  %v4350_v22 = vand.u32 2147483648, %v4338_v35  ;;  %vm4344_vm10 = vweird.f32 %v4338_v35  ;;  %v4348_v36 = vand.u32 2147483647, %v4338_v35 }
0x1379   : > { %v4351_v24 = vor.u32 1.1754944e-38, %v4350_v22  ;;  %vm4349_vm14 = vcmp.eq.f32.partialorder %v4348_v36, 8.507059e+37 }
0x137d   : > { %v5527_v25 = vpop.eup %5526 }
0x137e   : > { %v4340_v52 = vmul.f32 %v5527_v25, %v4338_v35  ;;  %vm4345_vm9 = vweird.f32 %v5527_v25 }
0x137f   : > { %vm4346_vm13 = vmor %vm4344_vm10, %vm4345_vm9 }
0x1380   : > { %v4341_v40 = vsub.f32 1.0, %v4340_v52 }
0x1382   : > { %v4342_v21 = vmul.f32 %v5527_v25, %v4341_v40 }
0x1384   : > { %v4343_v23 = vadd.f32 %v5527_v25, %v4342_v21 }
0x1386   : > { %v4347_v56 = vsel %vm4346_vm13, %v5527_v25, %v4343_v23  ;;  %v5159_v25 = vld [vmem:[%s7826_s2 + $0x5] ss:$0 sm:$0xff] }
0x1387   : > { %v4352_v10 = vsel %vm4349_vm14, %v4351_v24, %v4347_v56 }
0x1388   : > { %v4355_v13 = vmul.f32 %v4352_v10, %v4307_v48 }
0x13e5   : > { %v4358_v53 = vpop.permute.xlu1 %4357 }
0x13e6   : > { %v4360_v32 = vmul.f32 %v4358_v53, %v4352_v10 }
0x13e8   : > { %4362 = vrot.lane.b32.xlu2 %v4360_v32, %s5571_s20 }
0x1442   : > { %v4363_v33 = vpop.permute.xlu2 %4362 }
0x1443   : > { %v4365_v50 = vadd.f32 %v4363_v33, %v4355_v13 }
0x1445   : > { %5528 = vtanh.f32 %v4365_v50 }
0x144b   : > { %v5529_v8 = vpop.eup %5528 }
0x144c   : > { %4368 = vrot.lane.b32.xlu0 %v5529_v8, %s5570_s19 }
0x14be   : > { %v4369_v61 = vpop.permute.xlu0 %4368 }
0x14bf   : > { %v4371_v42 = vmul.f32 %v4369_v61, %v4352_v10 }
0x14c1   : > { %v4372_v39 = vpack.c.bf16 %v4371_v42, %v4371_v42 }
0x14c3   : > { %4374 = vrot.lane.b32.xlu1 %v4372_v39, %s5571_s20 }
0x1535   : > { %v4375_v9 = vpop.permute.xlu1 %4374 }
0x1536   : > { %5066 = vmatmul.msk.bf16.vlgmr.msrb.gmra.mxu2 %vm3455_vm12, %v4375_v9 }
0x15b9   : > { %v4388_v7 = vpop.f32.mrf.mxu2 }
0x15ba   : > { %v4392_v2 = vadd.f32 %v4388_v7, %v3952_v59 }
0x15bc   : > { %5530 = vtanh.f32 %v4392_v2  ;;  %v5067_v3 = vmul.f32 -1.442695, %v4392_v2 }
0x15be   : > { %5532 = vpow2.f32 %v5067_v3  ;;  %v5134_v3 = vld [vmem:[%s7825_s1 + $0xe0] sm:$0xff] }
0x15c1   : > { %v4390_v60 = vpop.f32.mrf.mxu2 }
0x15c2   : > { %v5531_v44 = vpop.eup %5530 }
0x15c3   : > { %4415 = vrot.lane.b32.xlu2 %v5531_v44, %s5570_s19  ;;  %v5135_v44 = vld [vmem:[%s7825_s1 + $0xe8] sm:$0xff] }
0x15c4   : > { %v5533_v34 = vpop.eup %5532  ;;  %4570 = vmatpush.bf16.msrb.mxu0 %v5135_v44 }
0x15c5   : > { %v4396_v38 = vadd.f32 1.0, %v5533_v34 }
0x15c7   : > { %5534 = vrcp.f32 %v4396_v38  ;;  %v4408_v17 = vand.u32 2147483648, %v4396_v38  ;;  %vm4402_vm0 = vweird.f32 %v4396_v38  ;;  %v4406_v14 = vand.u32 2147483647, %v4396_v38 }
0x15c8   : > { %4571 = vmatpush.bf16.msrb.mxu0 %v5134_v3 }
0x15c9   : > { %v4409_v0 = vor.u32 1.1754944e-38, %v4408_v17  ;;  %vm4407_vm4 = vcmp.eq.f32.partialorder %v4406_v14, 8.507059e+37 }
0x15cd   : > { %v5535_v19 = vpop.eup %5534 }
0x15ce   : > { %v4398_v45 = vmul.f32 %v5535_v19, %v4396_v38  ;;  %vm4403_vm15 = vweird.f32 %v5535_v19 }
0x15cf   : > { %vm4404_vm3 = vmor %vm4402_vm0, %vm4403_vm15 }
0x15d0   : > { %v4399_v28 = vsub.f32 1.0, %v4398_v45 }
0x15d2   : > { %v4400_v62 = vmul.f32 %v5535_v19, %v4399_v28 }
0x15d4   : > { %v4401_v18 = vadd.f32 %v5535_v19, %v4400_v62 }
0x15d6   : > { %v4405_v31 = vsel %vm4404_vm3, %v5535_v19, %v4401_v18 }
0x15d7   : > { %v4410_v49 = vsel %vm4407_vm4, %v4409_v0, %v4405_v31 }
0x15d8   : > { %v4413_v41 = vmul.f32 %v4410_v49, %v4365_v50 }
0x161d   : > { %v4416_v54 = vpop.permute.xlu2 %4415 }
0x161e   : > { %v4418_v20 = vmul.f32 %v4416_v54, %v4410_v49 }
0x1620   : > { %4420 = vrot.lane.b32.xlu0 %v4418_v20, %s5571_s20 }
0x1692   : > { %v4421_v29 = vpop.permute.xlu0 %4420 }
0x1693   : > { %v4423_v37 = vadd.f32 %v4421_v29, %v4413_v41  ;;  %v5139_v41 = vld [vmem:[%s7825_s1 + $0x108] sm:$0xff] }
0x1694   : > { %4621 = vmatpush.bf16.msrb.mxu1 %v5139_v41 }
0x1695   : > { %5536 = vtanh.f32 %v4423_v37  ;;  %v5138_v37 = vld [vmem:[%s7825_s1 + $0x100] sm:$0xff] }
0x1698   : > { %4622 = vmatpush.bf16.msrb.mxu1 %v5138_v37 }
0x169b   : > { %v5537_v26 = vpop.eup %5536 }
0x169c   : > { %4426 = vrot.lane.b32.xlu1 %v5537_v26, %s5570_s19  ;;  %v5137_v26 = vld [vmem:[%s7825_s1 + $0xf8] sm:$0xff] }
0x169d   : > { %4623 = vmatpush.bf16.msrb.mxu1 %v5137_v26 }
0x170e   : > { %v4427_v43 = vpop.permute.xlu1 %4426 }
0x170f   : > { %v4429_v6 = vmul.f32 %v4427_v43, %v4410_v49  ;;  %v5136_v43 = vld [vmem:[%s7825_s1 + $0xf0] sm:$0xff] }
0x1710   : > { %4624 = vmatpush.bf16.msrb.mxu1 %v5136_v43 }
0x1711   : > { %v5068_v46 = vmul.f32 -1.442695, %v4429_v6 }
0x1713   : > { %5538 = vpow2.f32 %v5068_v46 }
0x1719   : > { %v5539_v4 = vpop.eup %5538 }
0x171a   : > { %v4433_v58 = vadd.f32 1.0, %v5539_v4 }
0x171c   : > { %5540 = vrcp.f32 %v4433_v58  ;;  %v4445_v15 = vand.u32 2147483648, %v4433_v58  ;;  %v4443_v51 = vand.u32 2147483647, %v4433_v58  ;;  %vm4439_vm11 = vweird.f32 %v4433_v58 }
0x171e   : > { %v4446_v16 = vor.u32 1.1754944e-38, %v4445_v15  ;;  %vm4444_vm6 = vcmp.eq.f32.partialorder %v4443_v51, 8.507059e+37 }
0x1722   : > { %v5541_v48 = vpop.eup %5540 }
0x1723   : > { %v4435_v47 = vmul.f32 %v5541_v48, %v4433_v58  ;;  %vm4440_vm8 = vweird.f32 %v5541_v48 }
0x1724   : > { %vm4441_vm5 = vmor %vm4439_vm11, %vm4440_vm8 }
0x1725   : > { %v4436_v12 = vsub.f32 1.0, %v4435_v47 }
0x1727   : > { %v4437_v55 = vmul.f32 %v5541_v48, %v4436_v12 }
0x1729   : > { %v4438_v5 = vadd.f32 %v5541_v48, %v4437_v55 }
0x172b   : > { %v4442_v1 = vsel %vm4441_vm5, %v5541_v48, %v4438_v5  ;;  %v5161_v48 = vld [vmem:[%s7826_s2 + $0x7] ss:$0 sm:$0xff] }
0x172c   : > { %v4447_v63 = vsel %vm4444_vm6, %v4446_v16, %v4442_v1 }
0x172d   : > { %v4449_v30 = vmul.f32 %v4447_v63, %v4429_v6  ;;  %v5160_v6 = vld [vmem:[%s7826_s2 + $0x6] ss:$0 sm:$0xff] }
0x172f   : > { %v4450_v11 = vpack.c.bf16 %v4449_v30, %v4449_v30 }
0x1731   : > { %4458 = vrot.lane.b32.xlu2 %v4450_v11, %s5571_s20 }
0x178b   : > { %v4459_v35 = vpop.permute.xlu2 %4458 }
0x178c   : > { %5077 = vmatmul.msk.bf16.vlgmr.msrb.gmra.mxu3 %vm3455_vm12, %v4459_v35 }
0x180f   : > { %v4484_v52 = vpop.f32.mrf.mxu3 }
0x1810   : > { %v4485_v40 = vadd.f32 %v5159_v25, %v4484_v52 }
0x1812   : > { %5542 = vtanh.f32 %v4485_v40  ;;  %v5078_v22 = vmul.f32 -1.442695, %v4485_v40 }
0x1814   : > { %5544 = vpow2.f32 %v5078_v22 }
0x1817   : > { %v4486_v21 = vpop.f32.mrf.mxu3 }
0x1818   : > { %v5543_v23 = vpop.eup %5542 }
0x1819   : > { %4509 = vrot.lane.b32.xlu0 %v5543_v23, %s5572_s27 }
0x181a   : > { %v5545_v36 = vpop.eup %5544 }
0x181b   : > { %v4491_v56 = vadd.f32 1.0, %v5545_v36 }
0x181d   : > { %5546 = vrcp.f32 %v4491_v56  ;;  %v4503_v33 = vand.u32 2147483648, %v4491_v56  ;;  %vm4497_vm2 = vweird.f32 %v4491_v56  ;;  %v4501_v50 = vand.u32 2147483647, %v4491_v56 }
0x181f   : > { %v4504_v61 = vor.u32 1.1754944e-38, %v4503_v33  ;;  %vm4502_vm10 = vcmp.eq.f32.partialorder %v4501_v50, 8.507059e+37 }
0x1823   : > { %v5547_v24 = vpop.eup %5546 }
0x1824   : > { %v4493_v53 = vmul.f32 %v5547_v24, %v4491_v56  ;;  %vm4498_vm7 = vweird.f32 %v5547_v24 }
0x1825   : > { %vm4499_vm9 = vmor %vm4497_vm2, %vm4498_vm7 }
0x1826   : > { %v4494_v10 = vsub.f32 1.0, %v4493_v53 }
0x1828   : > { %v4495_v32 = vmul.f32 %v5547_v24, %v4494_v10 }
0x182a   : > { %v4496_v13 = vadd.f32 %v5547_v24, %v4495_v32 }
0x182c   : > { %v4500_v8 = vsel %vm4499_vm9, %v5547_v24, %v4496_v13 }
0x182d   : > { %v4505_v39 = vsel %vm4502_vm10, %v4504_v61, %v4500_v8 }
0x188b   : > { %v4510_v42 = vpop.permute.xlu0 %4509 }
0x188c   : > { %v4512_v9 = vmul.f32 %v4510_v42, %v4505_v39 }
0x188e   : > { %5548 = vtanh.f32 %v4512_v9 }
0x1894   : > { %v5549_v59 = vpop.eup %5548 }
0x1895   : > { %4515 = vrot.lane.b32.xlu1 %v5549_v59, %s5570_s19 }
0x1907   : > { %v4516_v7 = vpop.permute.xlu1 %4515 }
0x1908   : > { %v4518_v2 = vmul.f32 %v4516_v7, %v4505_v39 }
0x190a   : > { %v5079_v60 = vmul.f32 -1.442695, %v4518_v2 }
0x190c   : > { %5550 = vpow2.f32 %v5079_v60 }
0x1912   : > { %v5551_v34 = vpop.eup %5550 }
0x1913   : > { %v4522_v38 = vadd.f32 1.0, %v5551_v34 }
0x1915   : > { %5552 = vrcp.f32 %v4522_v38  ;;  %v4534_v62 = vand.u32 2147483648, %v4522_v38  ;;  %v4532_v17 = vand.u32 2147483647, %v4522_v38  ;;  %vm4528_vm14 = vweird.f32 %v4522_v38 }
0x1917   : > { %v4535_v31 = vor.u32 1.1754944e-38, %v4534_v62  ;;  %vm4533_vm0 = vcmp.eq.f32.partialorder %v4532_v17, 8.507059e+37 }
0x191b   : > { %v5553_v19 = vpop.eup %5552 }
0x191c   : > { %v4524_v45 = vmul.f32 %v5553_v19, %v4522_v38  ;;  %vm4529_vm13 = vweird.f32 %v5553_v19 }
0x191d   : > { %vm4530_vm15 = vmor %vm4528_vm14, %vm4529_vm13 }
0x191e   : > { %v4525_v28 = vsub.f32 1.0, %v4524_v45 }
0x1920   : > { %v4526_v18 = vmul.f32 %v5553_v19, %v4525_v28 }
0x1922   : > { %v4527_v14 = vadd.f32 %v5553_v19, %v4526_v18 }
0x1924   : > { %v4531_v0 = vsel %vm4530_vm15, %v5553_v19, %v4527_v14 }
0x1925   : > { %v4536_v54 = vsel %vm4533_vm0, %v4535_v31, %v4531_v0 }
0x1926   : > { %v4538_v49 = vmul.f32 %v4536_v54, %v4518_v2 }
0x1928   : > { %v4539_v20 = vpack.c.bf16 %v4538_v49, %v4538_v49 }
0x192a   : > { %4547 = vrot.lane.b32.xlu2 %v4539_v20, %s5570_s19 }
0x1984   : > { %v4548_v29 = vpop.permute.xlu2 %4547 }
0x1985   : > { %5088 = vmatmul.msk.bf16.vlgmr.msrb.gmra.mxu0 %vm3455_vm12, %v4548_v29  ;;  %vm4613_vm12 = vcmask 523264  }
0x1a02   : > { %v4573_v46 = vpop.f32.mrf.mxu0 }
0x1a03   : > { %v4574_v27 = vadd.f32 %v5160_v6, %v4573_v46 }
0x1a05   : > { %5554 = vtanh.f32 %v4574_v27 }
0x1a0a   : > { %v4575_v57 = vpop.f32.mrf.mxu0 }
0x1a0b   : > { %v5555_v4 = vpop.eup %5554 }
0x1a0c   : > { %v4578_v58 = vpack.c.bf16 %v5555_v4, %v5555_v4 }
0x1a0e   : > { %5105 = vmatmul.msk.bf16.vlgmr.msrb.gmra.mxu1 %vm4613_vm12, %v4578_v58 }
0x1a8b   : > { %v4626_v47 = vpop.f32.mrf.mxu1 }
0x1a8c   : > { %v4627_v12 = vadd.f32 %v5161_v48, %v4626_v47 }
0x1a8e   : > { %4630 = vst.msk [vmem:[%s168_s22] sm:$0xff] %vm197_vm1, %v4627_v12 }
0x1a93   : > { %v4628_v15 = vpop.f32.mrf.mxu1 }
0x1a94 PF: > { %s13_s12 = sadd.s32 1, %s5565_s12  }
0x1a95   : > { %p10_p4 = scmp.ge.s32.totalorder %s13_s12, 4  }
0x1a97   :  { %12 = sbr.rel (!%p10_p4) target bundleno = 1 (0x1), region = 62 }

</bundles_post_ra>
